<compile_context>
chip_gen: v6e
topology: v6e:2x2x1
jax: 0.10.0
libtpu: 0.0.40
codegen_flags: <defaults>
</compile_context>

<pallas_src>
import numpy as np
import jax
import jax.numpy as jnp
from jax import lax
from jax.experimental import pallas as pl
from jax.experimental.pallas import tpu as pltpu

_CHANNELS = [(3, 16), (16, 24), (24, 16), (16, 32), (32, 40)]
_POOLED = [True, True, True, False, False]
_NEG_SLOPE = 0.01     # PyTorch nn.LeakyReLU default
_BN_EPS = 1e-5


# ---------------- constant scatter matrices (built with numpy at trace time) --

def _pad_scatter(h, w):
    """(h*w, (h+2)*(w+2)): scatter a compact row-major map into a zero-padded
    (pad=1) row-major map."""
    wp = w + 2
    t = np.zeros((h * w, (h + 2) * wp), np.float32)
    for y in range(h):
        for x in range(w):
            t[y * w + x, (y + 1) * wp + (x + 1)] = 1.0
    return t


def _conv_to_pad_scatter(h, w):
    """(Lc, (h+2)*(w+2)): take the conv output in 'flat padded-stride' layout
    (row pitch w+2, valid width w) and scatter the valid columns into the next
    zero-padded buffer of the SAME spatial size (no pooling)."""
    wp = w + 2
    lc = (h - 1) * wp + w
    t = np.zeros((lc, (h + 2) * wp), np.float32)
    for y in range(h):
        for x in range(w):
            t[y * wp + x, (y + 1) * wp + (x + 1)] = 1.0
    return t


def _pool_to_pad_scatter(h, w):
    """(Lv, (h//2+2)*(w//2+2)): select the stride-2 columns of the 2x2-max
    reduced flat conv output (row pitch w+2) and scatter them into the next
    layer's zero-padded buffer."""
    wp = w + 2
    lv = (h - 2) * wp + w - 1
    ho, wo = h // 2, w // 2
    wpn = wo + 2
    t = np.zeros((lv, (ho + 2) * wpn), np.float32)
    for yo in range(ho):
        for xo in range(wo):
            t[(2 * yo) * wp + 2 * xo, (yo + 1) * wpn + (xo + 1)] = 1.0
    return t


# ----------------------------- fused Pallas kernel ----------------------------

def _build_kernel(hw_list):
    """hw_list: per-conv-layer input spatial size [(H, W)] (static)."""

    def kernel(x_ref,
               w1_ref, b1_ref, w2_ref, b2_ref, w3_ref, b3_ref,
               w4_ref, b4_ref, w5_ref, b5_ref,
               wfc_ref, bfc_ref,
               t0_ref, t1_ref, t2_ref, t3_ref, t4_ref,
               o_ref):
        w_refs = (w1_ref, w2_ref, w3_ref, w4_ref, w5_ref)
        b_refs = (b1_ref, b2_ref, b3_ref, b4_ref, b5_ref)
        t_refs = (t0_ref, t1_ref, t2_ref, t3_ref, t4_ref)

        act = x_ref[0]                              # (Cin0, H0*W0), spatial on lanes
        for l, (h, w) in enumerate(hw_list):
            wp = w + 2
            lc = (h - 1) * wp + w
            # Scatter into a zero-padded flat buffer (padding columns are zero
            # columns of the constant matrix) -- all in VMEM, no HBM im2col.
            pad = jnp.dot(act, t_refs[l][...], preferred_element_type=jnp.float32)
            # 3x3 conv (pad=1) as 9 shifted-slab matmuls; BN scale pre-folded
            # into the weights.  Start the accumulator from the folded BN bias
            # (broadcast over lanes) so the epilogue is just the activation.
            acc = b_refs[l][...] + jnp.dot(w_refs[l][0], pad[:, 0:lc],
                                           preferred_element_type=jnp.float32)
            for k in range(1, 9):
                kh, kw = divmod(k, 3)
                s = kh * wp + kw
                acc = acc + jnp.dot(w_refs[l][k], pad[:, s:s + lc],
                                    preferred_element_type=jnp.float32)
            a = jnp.maximum(acc, _NEG_SLOPE * acc)            # LeakyReLU(0.01)
            if _POOLED[l]:
                # Fused 2x2/stride-2 max pool in the flat layout: max with the
                # lane neighbour, then with the next-row neighbour; the stride-2
                # column selection is folded into the next scatter matrix.
                ah = jnp.maximum(a[:, :-1], a[:, 1:])
                a = jnp.maximum(ah[:, :-wp], ah[:, wp:])
            act = a
        # Final Linear (out_features=1): VPU multiply + full reduce (no 1-lane
        # MXU column).  wfc is pre-arranged to the (C, flat padded-stride)
        # layout with zeros on the garbage columns.
        out = jnp.sum(wfc_ref[...] * act) + bfc_ref[0, 0]
        o_ref[...] = jnp.full((1, 1, 1), out, jnp.float32)

    return kernel


# --------------------------------- forward -----------------------------------

def custom_cnn_forward(params, x_nchw):
    n, cin, h, w = x_nchw.shape
    assert cin == 3 and h % 8 == 0 and w % 8 == 0

    hw_list = [(h, w), (h // 2, w // 2), (h // 4, w // 4),
               (h // 8, w // 8), (h // 8, w // 8)]

    # Fold eval-mode BatchNorm into conv weights / biases (trace time).
    w_mats, b_vecs = [], []
    for i, (ci, co) in enumerate(_CHANNELS):
        p = params[f"conv{i + 1}"]
        scale = p["gamma"] / jnp.sqrt(p["var"] + _BN_EPS)                # (co,)
        wk = jnp.transpose(p["w"], (2, 3, 0, 1)).reshape(9, co, ci)      # k=kh*3+kw
        w_mats.append((wk * scale[None, :, None]).astype(jnp.float32))
        b_vecs.append((p["beta"] + scale * (p["b"] - p["mean"]))
                      .reshape(co, 1).astype(jnp.float32))

    # Constant scatter matrices (pad / compact / pool-decimate).
    ts = [jnp.asarray(_pad_scatter(*hw_list[0]))]
    for l in range(1, 5):
        hh, ww = hw_list[l - 1]
        ts.append(jnp.asarray(_pool_to_pad_scatter(hh, ww) if _POOLED[l - 1]
                              else _conv_to_pad_scatter(hh, ww)))

    # FC weight pre-arranged to the kernel's (C, flat padded-stride) layout.
    h5, w5 = hw_list[4]
    wp5 = w5 + 2
    lc5 = (h5 - 1) * wp5 + w5
    fcw = params["fc"]["w"].reshape(40, h5, w5)
    fcw = jnp.pad(fcw, ((0, 0), (0, 0), (0, 2))).reshape(40, h5 * wp5)[:, :lc5]
    fcw = fcw.astype(jnp.float32)
    fcb = params["fc"]["b"].reshape(1, 1).astype(jnp.float32)

    # NCHW -> (N, C, H*W): channels on sublanes, spatial on lanes (free reshape).
    x2d = x_nchw.reshape(n, cin, h * w).astype(jnp.float32)

    operands = [x2d]
    for wm, bv in zip(w_mats, b_vecs):
        operands += [wm, bv]
    operands += [fcw, fcb] + ts

    def full_spec(a):
        return pl.BlockSpec(a.shape, lambda i, _nd=a.ndim: (0,) * _nd)

    in_specs = [pl.BlockSpec((1, cin, h * w), lambda i: (i, 0, 0))]
    in_specs += [full_spec(a) for a in operands[1:]]

    out = pl.pallas_call(
        _build_kernel(hw_list),
        out_shape=jax.ShapeDtypeStruct((n, 1, 1), jnp.float32),
        grid=(n,),
        in_specs=in_specs,
        out_specs=pl.BlockSpec((1, 1, 1), lambda i: (i, 0, 0)),
        compiler_params=pltpu.CompilerParams(
            dimension_semantics=("parallel",)),
    )(*operands)
    return out.reshape(n, 1)


# ------------------------------ params / reference ----------------------------

def init_params(key, in_hw=(16, 16)):
    params = {}
    for i, (cin, cout) in enumerate(_CHANNELS):
        key, kw, kb, kg, kbt = jax.random.split(key, 5)
        params[f"conv{i + 1}"] = dict(
            w=0.1 * jax.random.normal(kw, (cout, cin, 3, 3), jnp.float32),
            b=0.1 * jax.random.normal(kb, (cout,), jnp.float32),
            gamma=1.0 + 0.1 * jax.random.normal(kg, (cout,), jnp.float32),
            beta=0.1 * jax.random.normal(kbt, (cout,), jnp.float32),
            mean=jnp.zeros((cout,), jnp.float32),
            var=jnp.ones((cout,), jnp.float32),
        )
    fc_in = 40 * (in_hw[0] // 8) * (in_hw[1] // 8)
    key, kw, kb = jax.random.split(key, 3)
    params["fc"] = dict(
        w=0.1 * jax.random.normal(kw, (1, fc_in), jnp.float32),
        b=0.1 * jax.random.normal(kb, (1,), jnp.float32),
    )
    return params


def _reference_forward(params, x_nchw):
    """Pure-JAX reference with identical semantics (for a sanity check)."""
    x = x_nchw
    for i in range(5):
        p = params[f"conv{i + 1}"]
        x = lax.conv_general_dilated(
            x, p["w"], window_strides=(1, 1), padding=((1, 1), (1, 1)),
            dimension_numbers=("NCHW", "OIHW", "NCHW"),
            precision=lax.Precision.HIGHEST)
        x = x + p["b"][None, :, None, None]
        inv = 1.0 / jnp.sqrt(p["var"] + _BN_EPS)
        x = (p["gamma"] * inv)[None, :, None, None] * \
            (x - p["mean"][None, :, None, None]) + p["beta"][None, :, None, None]
        x = jnp.where(x > 0, x, _NEG_SLOPE * x)
        if _POOLED[i]:
            n_, c_, hh, ww = x.shape
            x = x.reshape(n_, c_, hh // 2, 2, ww // 2, 2).max(axis=(3, 5))
    flat = x.reshape(x.shape[0], -1)        # NCHW channel-major flatten
    return jnp.dot(flat, params["fc"]["w"].T,
                   precision=lax.Precision.HIGHEST) + params["fc"]["b"][None, :]


if __name__ == "__main__":
    key = jax.random.PRNGKey(0)
    key, kx = jax.random.split(key)
    x = jax.random.normal(kx, (2, 3, 16, 16), jnp.float32)   # NCHW input
    params = init_params(key, in_hw=(16, 16))

    out = jax.jit(custom_cnn_forward)(params, x)
    out = jax.block_until_ready(out)
    assert out.shape == (2, 1) and out.dtype == jnp.float32

    ref = _reference_forward(params, x)
    if not bool(jnp.allclose(out, ref, atol=5e-2, rtol=5e-2)):
        raise SystemExit("mismatch vs reference: "
                         f"max abs err = {float(jnp.max(jnp.abs(out - ref)))}")
    print("KERNEL_OK")
</pallas_src>

<mosaic_0001>
module attributes {stable_mosaic.version = 11 : i64} {
  func.func @kernel(%arg0: i32, %arg1: memref<1x3x256xf32, #tpu.memory_space<vmem>>, %arg2: memref<9x16x3xf32, #tpu.memory_space<vmem>>, %arg3: memref<16x1xf32, #tpu.memory_space<vmem>>, %arg4: memref<9x24x16xf32, #tpu.memory_space<vmem>>, %arg5: memref<24x1xf32, #tpu.memory_space<vmem>>, %arg6: memref<9x16x24xf32, #tpu.memory_space<vmem>>, %arg7: memref<16x1xf32, #tpu.memory_space<vmem>>, %arg8: memref<9x32x16xf32, #tpu.memory_space<vmem>>, %arg9: memref<32x1xf32, #tpu.memory_space<vmem>>, %arg10: memref<9x40x32xf32, #tpu.memory_space<vmem>>, %arg11: memref<40x1xf32, #tpu.memory_space<vmem>>, %arg12: memref<40x6xf32, #tpu.memory_space<vmem>>, %arg13: memref<1x1xf32, #tpu.memory_space<vmem>>, %arg14: memref<256x324xf32, #tpu.memory_space<vmem>>, %arg15: memref<267x100xf32, #tpu.memory_space<vmem>>, %arg16: memref<67x36xf32, #tpu.memory_space<vmem>>, %arg17: memref<15x16xf32, #tpu.memory_space<vmem>>, %arg18: memref<6x16xf32, #tpu.memory_space<vmem>>, %arg19: memref<1x1x1xf32, #tpu.memory_space<vmem>>) attributes {dimension_semantics = [#tpu.dimension_semantics<parallel>], iteration_bounds = array<i64: 2>, scalar_prefetch = 0 : i64, scratch_operands = 0 : i64, tpu.core_type = #tpu.core_type<tc>, window_params = [{transform_indices = @transform_0, window_bounds = array<i64: 1, 3, 256>}, {pipeline_mode = #tpu.pipeline_mode<synchronous>, transform_indices = @transform_1, window_bounds = array<i64: 9, 16, 3>}, {pipeline_mode = #tpu.pipeline_mode<synchronous>, transform_indices = @transform_2, window_bounds = array<i64: 16, 1>}, {pipeline_mode = #tpu.pipeline_mode<synchronous>, transform_indices = @transform_3, window_bounds = array<i64: 9, 24, 16>}, {pipeline_mode = #tpu.pipeline_mode<synchronous>, transform_indices = @transform_4, window_bounds = array<i64: 24, 1>}, {pipeline_mode = #tpu.pipeline_mode<synchronous>, transform_indices = @transform_5, window_bounds = array<i64: 9, 16, 24>}, {pipeline_mode = #tpu.pipeline_mode<synchronous>, transform_indices = @transform_6, window_bounds = array<i64: 16, 1>}, {pipeline_mode = #tpu.pipeline_mode<synchronous>, transform_indices = @transform_7, window_bounds = array<i64: 9, 32, 16>}, {pipeline_mode = #tpu.pipeline_mode<synchronous>, transform_indices = @transform_8, window_bounds = array<i64: 32, 1>}, {pipeline_mode = #tpu.pipeline_mode<synchronous>, transform_indices = @transform_9, window_bounds = array<i64: 9, 40, 32>}, {pipeline_mode = #tpu.pipeline_mode<synchronous>, transform_indices = @transform_10, window_bounds = array<i64: 40, 1>}, {pipeline_mode = #tpu.pipeline_mode<synchronous>, transform_indices = @transform_11, window_bounds = array<i64: 40, 6>}, {pipeline_mode = #tpu.pipeline_mode<synchronous>, transform_indices = @transform_12, window_bounds = array<i64: 1, 1>}, {pipeline_mode = #tpu.pipeline_mode<synchronous>, transform_indices = @transform_13, window_bounds = array<i64: 256, 324>}, {pipeline_mode = #tpu.pipeline_mode<synchronous>, transform_indices = @transform_14, window_bounds = array<i64: 267, 100>}, {pipeline_mode = #tpu.pipeline_mode<synchronous>, transform_indices = @transform_15, window_bounds = array<i64: 67, 36>}, {pipeline_mode = #tpu.pipeline_mode<synchronous>, transform_indices = @transform_16, window_bounds = array<i64: 15, 16>}, {pipeline_mode = #tpu.pipeline_mode<synchronous>, transform_indices = @transform_17, window_bounds = array<i64: 6, 16>}, {transform_indices = @transform_18, window_bounds = array<i64: 1, 1, 1>}]} {
    %c0 = arith.constant 0 : index
    %c0_0 = arith.constant 0 : index
    %c0_1 = arith.constant 0 : index
    %0 = vector.load %arg1[%c0, %c0_0, %c0_1] : memref<1x3x256xf32, #tpu.memory_space<vmem>>, vector<1x3x256xf32>
    %1 = vector.shape_cast %0 : vector<1x3x256xf32> to vector<3x256xf32>
    %c0_2 = arith.constant 0 : index
    %c0_3 = arith.constant 0 : index
    %2 = vector.load %arg14[%c0_2, %c0_3] : memref<256x324xf32, #tpu.memory_space<vmem>>, vector<256x324xf32>
    %cst = arith.constant dense<0.000000e+00> : vector<3x324xf32>
    %3 = tpu.matmul %1, %2, %cst {dimension_numbers = #tpu.dot_dimension_numbers<[1], [0], [0], [1], [0, 0, 1, 1], [], []>} : vector<3x256xf32>, vector<256x324xf32>, vector<3x324xf32> -> vector<3x324xf32>
    %c0_4 = arith.constant 0 : index
    %c0_5 = arith.constant 0 : index
    %4 = vector.load %arg3[%c0_4, %c0_5] : memref<16x1xf32, #tpu.memory_space<vmem>>, vector<16x1xf32>
    %c0_6 = arith.constant 0 : index
    %c0_7 = arith.constant 0 : index
    %c0_8 = arith.constant 0 : index
    %5 = vector.load %arg2[%c0_6, %c0_7, %c0_8] : memref<9x16x3xf32, #tpu.memory_space<vmem>>, vector<1x16x3xf32>
    %6 = vector.shape_cast %5 : vector<1x16x3xf32> to vector<16x3xf32>
    %7 = vector.extract_strided_slice %3 {offsets = [0, 0], sizes = [3, 286], strides = [1, 1]} : vector<3x324xf32> to vector<3x286xf32>
    %cst_9 = arith.constant dense<0.000000e+00> : vector<16x286xf32>
    %8 = tpu.matmul %6, %7, %cst_9 {dimension_numbers = #tpu.dot_dimension_numbers<[1], [0], [0], [1], [0, 0, 1, 1], [], []>} : vector<16x3xf32>, vector<3x286xf32>, vector<16x286xf32> -> vector<16x286xf32>
    %9 = vector.broadcast %4 : vector<16x1xf32> to vector<16x286xf32>
    %10 = arith.addf %9, %8 : vector<16x286xf32>
    %c1 = arith.constant 1 : index
    %c0_10 = arith.constant 0 : index
    %c0_11 = arith.constant 0 : index
    %11 = vector.load %arg2[%c1, %c0_10, %c0_11] : memref<9x16x3xf32, #tpu.memory_space<vmem>>, vector<1x16x3xf32>
    %12 = vector.shape_cast %11 : vector<1x16x3xf32> to vector<16x3xf32>
    %13 = vector.extract_strided_slice %3 {offsets = [0, 1], sizes = [3, 286], strides = [1, 1]} : vector<3x324xf32> to vector<3x286xf32>
    %cst_12 = arith.constant dense<0.000000e+00> : vector<16x286xf32>
    %14 = tpu.matmul %12, %13, %cst_12 {dimension_numbers = #tpu.dot_dimension_numbers<[1], [0], [0], [1], [0, 0, 1, 1], [], []>} : vector<16x3xf32>, vector<3x286xf32>, vector<16x286xf32> -> vector<16x286xf32>
    %15 = arith.addf %10, %14 : vector<16x286xf32>
    %c2 = arith.constant 2 : index
    %c0_13 = arith.constant 0 : index
    %c0_14 = arith.constant 0 : index
    %16 = vector.load %arg2[%c2, %c0_13, %c0_14] : memref<9x16x3xf32, #tpu.memory_space<vmem>>, vector<1x16x3xf32>
    %17 = vector.shape_cast %16 : vector<1x16x3xf32> to vector<16x3xf32>
    %18 = vector.extract_strided_slice %3 {offsets = [0, 2], sizes = [3, 286], strides = [1, 1]} : vector<3x324xf32> to vector<3x286xf32>
    %cst_15 = arith.constant dense<0.000000e+00> : vector<16x286xf32>
    %19 = tpu.matmul %17, %18, %cst_15 {dimension_numbers = #tpu.dot_dimension_numbers<[1], [0], [0], [1], [0, 0, 1, 1], [], []>} : vector<16x3xf32>, vector<3x286xf32>, vector<16x286xf32> -> vector<16x286xf32>
    %20 = arith.addf %15, %19 : vector<16x286xf32>
    %c3 = arith.constant 3 : index
    %c0_16 = arith.constant 0 : index
    %c0_17 = arith.constant 0 : index
    %21 = vector.load %arg2[%c3, %c0_16, %c0_17] : memref<9x16x3xf32, #tpu.memory_space<vmem>>, vector<1x16x3xf32>
    %22 = vector.shape_cast %21 : vector<1x16x3xf32> to vector<16x3xf32>
    %23 = vector.extract_strided_slice %3 {offsets = [0, 18], sizes = [3, 286], strides = [1, 1]} : vector<3x324xf32> to vector<3x286xf32>
    %cst_18 = arith.constant dense<0.000000e+00> : vector<16x286xf32>
    %24 = tpu.matmul %22, %23, %cst_18 {dimension_numbers = #tpu.dot_dimension_numbers<[1], [0], [0], [1], [0, 0, 1, 1], [], []>} : vector<16x3xf32>, vector<3x286xf32>, vector<16x286xf32> -> vector<16x286xf32>
    %25 = arith.addf %20, %24 : vector<16x286xf32>
    %c4 = arith.constant 4 : index
    %c0_19 = arith.constant 0 : index
    %c0_20 = arith.constant 0 : index
    %26 = vector.load %arg2[%c4, %c0_19, %c0_20] : memref<9x16x3xf32, #tpu.memory_space<vmem>>, vector<1x16x3xf32>
    %27 = vector.shape_cast %26 : vector<1x16x3xf32> to vector<16x3xf32>
    %28 = vector.extract_strided_slice %3 {offsets = [0, 19], sizes = [3, 286], strides = [1, 1]} : vector<3x324xf32> to vector<3x286xf32>
    %cst_21 = arith.constant dense<0.000000e+00> : vector<16x286xf32>
    %29 = tpu.matmul %27, %28, %cst_21 {dimension_numbers = #tpu.dot_dimension_numbers<[1], [0], [0], [1], [0, 0, 1, 1], [], []>} : vector<16x3xf32>, vector<3x286xf32>, vector<16x286xf32> -> vector<16x286xf32>
    %30 = arith.addf %25, %29 : vector<16x286xf32>
    %c5 = arith.constant 5 : index
    %c0_22 = arith.constant 0 : index
    %c0_23 = arith.constant 0 : index
    %31 = vector.load %arg2[%c5, %c0_22, %c0_23] : memref<9x16x3xf32, #tpu.memory_space<vmem>>, vector<1x16x3xf32>
    %32 = vector.shape_cast %31 : vector<1x16x3xf32> to vector<16x3xf32>
    %33 = vector.extract_strided_slice %3 {offsets = [0, 20], sizes = [3, 286], strides = [1, 1]} : vector<3x324xf32> to vector<3x286xf32>
    %cst_24 = arith.constant dense<0.000000e+00> : vector<16x286xf32>
    %34 = tpu.matmul %32, %33, %cst_24 {dimension_numbers = #tpu.dot_dimension_numbers<[1], [0], [0], [1], [0, 0, 1, 1], [], []>} : vector<16x3xf32>, vector<3x286xf32>, vector<16x286xf32> -> vector<16x286xf32>
    %35 = arith.addf %30, %34 : vector<16x286xf32>
    %c6 = arith.constant 6 : index
    %c0_25 = arith.constant 0 : index
    %c0_26 = arith.constant 0 : index
    %36 = vector.load %arg2[%c6, %c0_25, %c0_26] : memref<9x16x3xf32, #tpu.memory_space<vmem>>, vector<1x16x3xf32>
    %37 = vector.shape_cast %36 : vector<1x16x3xf32> to vector<16x3xf32>
    %38 = vector.extract_strided_slice %3 {offsets = [0, 36], sizes = [3, 286], strides = [1, 1]} : vector<3x324xf32> to vector<3x286xf32>
    %cst_27 = arith.constant dense<0.000000e+00> : vector<16x286xf32>
    %39 = tpu.matmul %37, %38, %cst_27 {dimension_numbers = #tpu.dot_dimension_numbers<[1], [0], [0], [1], [0, 0, 1, 1], [], []>} : vector<16x3xf32>, vector<3x286xf32>, vector<16x286xf32> -> vector<16x286xf32>
    %40 = arith.addf %35, %39 : vector<16x286xf32>
    %c7 = arith.constant 7 : index
    %c0_28 = arith.constant 0 : index
    %c0_29 = arith.constant 0 : index
    %41 = vector.load %arg2[%c7, %c0_28, %c0_29] : memref<9x16x3xf32, #tpu.memory_space<vmem>>, vector<1x16x3xf32>
    %42 = vector.shape_cast %41 : vector<1x16x3xf32> to vector<16x3xf32>
    %43 = vector.extract_strided_slice %3 {offsets = [0, 37], sizes = [3, 286], strides = [1, 1]} : vector<3x324xf32> to vector<3x286xf32>
    %cst_30 = arith.constant dense<0.000000e+00> : vector<16x286xf32>
    %44 = tpu.matmul %42, %43, %cst_30 {dimension_numbers = #tpu.dot_dimension_numbers<[1], [0], [0], [1], [0, 0, 1, 1], [], []>} : vector<16x3xf32>, vector<3x286xf32>, vector<16x286xf32> -> vector<16x286xf32>
    %45 = arith.addf %40, %44 : vector<16x286xf32>
    %c8 = arith.constant 8 : index
    %c0_31 = arith.constant 0 : index
    %c0_32 = arith.constant 0 : index
    %46 = vector.load %arg2[%c8, %c0_31, %c0_32] : memref<9x16x3xf32, #tpu.memory_space<vmem>>, vector<1x16x3xf32>
    %47 = vector.shape_cast %46 : vector<1x16x3xf32> to vector<16x3xf32>
    %48 = vector.extract_strided_slice %3 {offsets = [0, 38], sizes = [3, 286], strides = [1, 1]} : vector<3x324xf32> to vector<3x286xf32>
    %cst_33 = arith.constant dense<0.000000e+00> : vector<16x286xf32>
    %49 = tpu.matmul %47, %48, %cst_33 {dimension_numbers = #tpu.dot_dimension_numbers<[1], [0], [0], [1], [0, 0, 1, 1], [], []>} : vector<16x3xf32>, vector<3x286xf32>, vector<16x286xf32> -> vector<16x286xf32>
    %50 = arith.addf %45, %49 : vector<16x286xf32>
    %cst_34 = arith.constant 0.00999999977 : f32
    %51 = vector.broadcast %cst_34 : f32 to vector<16x286xf32>
    %52 = arith.mulf %51, %50 : vector<16x286xf32>
    %53 = arith.maximumf %50, %52 : vector<16x286xf32>
    %54 = vector.extract_strided_slice %53 {offsets = [0, 0], sizes = [16, 285], strides = [1, 1]} : vector<16x286xf32> to vector<16x285xf32>
    %55 = vector.extract_strided_slice %53 {offsets = [0, 1], sizes = [16, 285], strides = [1, 1]} : vector<16x286xf32> to vector<16x285xf32>
    %56 = arith.maximumf %54, %55 : vector<16x285xf32>
    %57 = vector.extract_strided_slice %56 {offsets = [0, 0], sizes = [16, 267], strides = [1, 1]} : vector<16x285xf32> to vector<16x267xf32>
    %58 = vector.extract_strided_slice %56 {offsets = [0, 18], sizes = [16, 267], strides = [1, 1]} : vector<16x285xf32> to vector<16x267xf32>
    %59 = arith.maximumf %57, %58 : vector<16x267xf32>
    %c0_35 = arith.constant 0 : index
    %c0_36 = arith.constant 0 : index
    %60 = vector.load %arg15[%c0_35, %c0_36] : memref<267x100xf32, #tpu.memory_space<vmem>>, vector<267x100xf32>
    %cst_37 = arith.constant dense<0.000000e+00> : vector<16x100xf32>
    %61 = tpu.matmul %59, %60, %cst_37 {dimension_numbers = #tpu.dot_dimension_numbers<[1], [0], [0], [1], [0, 0, 1, 1], [], []>} : vector<16x267xf32>, vector<267x100xf32>, vector<16x100xf32> -> vector<16x100xf32>
    %c0_38 = arith.constant 0 : index
    %c0_39 = arith.constant 0 : index
    %62 = vector.load %arg5[%c0_38, %c0_39] : memref<24x1xf32, #tpu.memory_space<vmem>>, vector<24x1xf32>
    %c0_40 = arith.constant 0 : index
    %c0_41 = arith.constant 0 : index
    %c0_42 = arith.constant 0 : index
    %63 = vector.load %arg4[%c0_40, %c0_41, %c0_42] : memref<9x24x16xf32, #tpu.memory_space<vmem>>, vector<1x24x16xf32>
    %64 = vector.shape_cast %63 : vector<1x24x16xf32> to vector<24x16xf32>
    %65 = vector.extract_strided_slice %61 {offsets = [0, 0], sizes = [16, 78], strides = [1, 1]} : vector<16x100xf32> to vector<16x78xf32>
    %cst_43 = arith.constant dense<0.000000e+00> : vector<24x78xf32>
    %66 = tpu.matmul %64, %65, %cst_43 {dimension_numbers = #tpu.dot_dimension_numbers<[1], [0], [0], [1], [0, 0, 1, 1], [], []>} : vector<24x16xf32>, vector<16x78xf32>, vector<24x78xf32> -> vector<24x78xf32>
    %67 = vector.broadcast %62 : vector<24x1xf32> to vector<24x78xf32>
    %68 = arith.addf %67, %66 : vector<24x78xf32>
    %c1_44 = arith.constant 1 : index
    %c0_45 = arith.constant 0 : index
    %c0_46 = arith.constant 0 : index
    %69 = vector.load %arg4[%c1_44, %c0_45, %c0_46] : memref<9x24x16xf32, #tpu.memory_space<vmem>>, vector<1x24x16xf32>
    %70 = vector.shape_cast %69 : vector<1x24x16xf32> to vector<24x16xf32>
    %71 = vector.extract_strided_slice %61 {offsets = [0, 1], sizes = [16, 78], strides = [1, 1]} : vector<16x100xf32> to vector<16x78xf32>
    %cst_47 = arith.constant dense<0.000000e+00> : vector<24x78xf32>
    %72 = tpu.matmul %70, %71, %cst_47 {dimension_numbers = #tpu.dot_dimension_numbers<[1], [0], [0], [1], [0, 0, 1, 1], [], []>} : vector<24x16xf32>, vector<16x78xf32>, vector<24x78xf32> -> vector<24x78xf32>
    %73 = arith.addf %68, %72 : vector<24x78xf32>
    %c2_48 = arith.constant 2 : index
    %c0_49 = arith.constant 0 : index
    %c0_50 = arith.constant 0 : index
    %74 = vector.load %arg4[%c2_48, %c0_49, %c0_50] : memref<9x24x16xf32, #tpu.memory_space<vmem>>, vector<1x24x16xf32>
    %75 = vector.shape_cast %74 : vector<1x24x16xf32> to vector<24x16xf32>
    %76 = vector.extract_strided_slice %61 {offsets = [0, 2], sizes = [16, 78], strides = [1, 1]} : vector<16x100xf32> to vector<16x78xf32>
    %cst_51 = arith.constant dense<0.000000e+00> : vector<24x78xf32>
    %77 = tpu.matmul %75, %76, %cst_51 {dimension_numbers = #tpu.dot_dimension_numbers<[1], [0], [0], [1], [0, 0, 1, 1], [], []>} : vector<24x16xf32>, vector<16x78xf32>, vector<24x78xf32> -> vector<24x78xf32>
    %78 = arith.addf %73, %77 : vector<24x78xf32>
    %c3_52 = arith.constant 3 : index
    %c0_53 = arith.constant 0 : index
    %c0_54 = arith.constant 0 : index
    %79 = vector.load %arg4[%c3_52, %c0_53, %c0_54] : memref<9x24x16xf32, #tpu.memory_space<vmem>>, vector<1x24x16xf32>
    %80 = vector.shape_cast %79 : vector<1x24x16xf32> to vector<24x16xf32>
    %81 = vector.extract_strided_slice %61 {offsets = [0, 10], sizes = [16, 78], strides = [1, 1]} : vector<16x100xf32> to vector<16x78xf32>
    %cst_55 = arith.constant dense<0.000000e+00> : vector<24x78xf32>
    %82 = tpu.matmul %80, %81, %cst_55 {dimension_numbers = #tpu.dot_dimension_numbers<[1], [0], [0], [1], [0, 0, 1, 1], [], []>} : vector<24x16xf32>, vector<16x78xf32>, vector<24x78xf32> -> vector<24x78xf32>
    %83 = arith.addf %78, %82 : vector<24x78xf32>
    %c4_56 = arith.constant 4 : index
    %c0_57 = arith.constant 0 : index
    %c0_58 = arith.constant 0 : index
    %84 = vector.load %arg4[%c4_56, %c0_57, %c0_58] : memref<9x24x16xf32, #tpu.memory_space<vmem>>, vector<1x24x16xf32>
    %85 = vector.shape_cast %84 : vector<1x24x16xf32> to vector<24x16xf32>
    %86 = vector.extract_strided_slice %61 {offsets = [0, 11], sizes = [16, 78], strides = [1, 1]} : vector<16x100xf32> to vector<16x78xf32>
    %cst_59 = arith.constant dense<0.000000e+00> : vector<24x78xf32>
    %87 = tpu.matmul %85, %86, %cst_59 {dimension_numbers = #tpu.dot_dimension_numbers<[1], [0], [0], [1], [0, 0, 1, 1], [], []>} : vector<24x16xf32>, vector<16x78xf32>, vector<24x78xf32> -> vector<24x78xf32>
    %88 = arith.addf %83, %87 : vector<24x78xf32>
    %c5_60 = arith.constant 5 : index
    %c0_61 = arith.constant 0 : index
    %c0_62 = arith.constant 0 : index
    %89 = vector.load %arg4[%c5_60, %c0_61, %c0_62] : memref<9x24x16xf32, #tpu.memory_space<vmem>>, vector<1x24x16xf32>
    %90 = vector.shape_cast %89 : vector<1x24x16xf32> to vector<24x16xf32>
    %91 = vector.extract_strided_slice %61 {offsets = [0, 12], sizes = [16, 78], strides = [1, 1]} : vector<16x100xf32> to vector<16x78xf32>
    %cst_63 = arith.constant dense<0.000000e+00> : vector<24x78xf32>
    %92 = tpu.matmul %90, %91, %cst_63 {dimension_numbers = #tpu.dot_dimension_numbers<[1], [0], [0], [1], [0, 0, 1, 1], [], []>} : vector<24x16xf32>, vector<16x78xf32>, vector<24x78xf32> -> vector<24x78xf32>
    %93 = arith.addf %88, %92 : vector<24x78xf32>
    %c6_64 = arith.constant 6 : index
    %c0_65 = arith.constant 0 : index
    %c0_66 = arith.constant 0 : index
    %94 = vector.load %arg4[%c6_64, %c0_65, %c0_66] : memref<9x24x16xf32, #tpu.memory_space<vmem>>, vector<1x24x16xf32>
    %95 = vector.shape_cast %94 : vector<1x24x16xf32> to vector<24x16xf32>
    %96 = vector.extract_strided_slice %61 {offsets = [0, 20], sizes = [16, 78], strides = [1, 1]} : vector<16x100xf32> to vector<16x78xf32>
    %cst_67 = arith.constant dense<0.000000e+00> : vector<24x78xf32>
    %97 = tpu.matmul %95, %96, %cst_67 {dimension_numbers = #tpu.dot_dimension_numbers<[1], [0], [0], [1], [0, 0, 1, 1], [], []>} : vector<24x16xf32>, vector<16x78xf32>, vector<24x78xf32> -> vector<24x78xf32>
    %98 = arith.addf %93, %97 : vector<24x78xf32>
    %c7_68 = arith.constant 7 : index
    %c0_69 = arith.constant 0 : index
    %c0_70 = arith.constant 0 : index
    %99 = vector.load %arg4[%c7_68, %c0_69, %c0_70] : memref<9x24x16xf32, #tpu.memory_space<vmem>>, vector<1x24x16xf32>
    %100 = vector.shape_cast %99 : vector<1x24x16xf32> to vector<24x16xf32>
    %101 = vector.extract_strided_slice %61 {offsets = [0, 21], sizes = [16, 78], strides = [1, 1]} : vector<16x100xf32> to vector<16x78xf32>
    %cst_71 = arith.constant dense<0.000000e+00> : vector<24x78xf32>
    %102 = tpu.matmul %100, %101, %cst_71 {dimension_numbers = #tpu.dot_dimension_numbers<[1], [0], [0], [1], [0, 0, 1, 1], [], []>} : vector<24x16xf32>, vector<16x78xf32>, vector<24x78xf32> -> vector<24x78xf32>
    %103 = arith.addf %98, %102 : vector<24x78xf32>
    %c8_72 = arith.constant 8 : index
    %c0_73 = arith.constant 0 : index
    %c0_74 = arith.constant 0 : index
    %104 = vector.load %arg4[%c8_72, %c0_73, %c0_74] : memref<9x24x16xf32, #tpu.memory_space<vmem>>, vector<1x24x16xf32>
    %105 = vector.shape_cast %104 : vector<1x24x16xf32> to vector<24x16xf32>
    %106 = vector.extract_strided_slice %61 {offsets = [0, 22], sizes = [16, 78], strides = [1, 1]} : vector<16x100xf32> to vector<16x78xf32>
    %cst_75 = arith.constant dense<0.000000e+00> : vector<24x78xf32>
    %107 = tpu.matmul %105, %106, %cst_75 {dimension_numbers = #tpu.dot_dimension_numbers<[1], [0], [0], [1], [0, 0, 1, 1], [], []>} : vector<24x16xf32>, vector<16x78xf32>, vector<24x78xf32> -> vector<24x78xf32>
    %108 = arith.addf %103, %107 : vector<24x78xf32>
    %cst_76 = arith.constant 0.00999999977 : f32
    %109 = vector.broadcast %cst_76 : f32 to vector<24x78xf32>
    %110 = arith.mulf %109, %108 : vector<24x78xf32>
    %111 = arith.maximumf %108, %110 : vector<24x78xf32>
    %112 = vector.extract_strided_slice %111 {offsets = [0, 0], sizes = [24, 77], strides = [1, 1]} : vector<24x78xf32> to vector<24x77xf32>
    %113 = vector.extract_strided_slice %111 {offsets = [0, 1], sizes = [24, 77], strides = [1, 1]} : vector<24x78xf32> to vector<24x77xf32>
    %114 = arith.maximumf %112, %113 : vector<24x77xf32>
    %115 = vector.extract_strided_slice %114 {offsets = [0, 0], sizes = [24, 67], strides = [1, 1]} : vector<24x77xf32> to vector<24x67xf32>
    %116 = vector.extract_strided_slice %114 {offsets = [0, 10], sizes = [24, 67], strides = [1, 1]} : vector<24x77xf32> to vector<24x67xf32>
    %117 = arith.maximumf %115, %116 : vector<24x67xf32>
    %c0_77 = arith.constant 0 : index
    %c0_78 = arith.constant 0 : index
    %118 = vector.load %arg16[%c0_77, %c0_78] : memref<67x36xf32, #tpu.memory_space<vmem>>, vector<67x36xf32>
    %cst_79 = arith.constant dense<0.000000e+00> : vector<24x36xf32>
    %119 = tpu.matmul %117, %118, %cst_79 {dimension_numbers = #tpu.dot_dimension_numbers<[1], [0], [0], [1], [0, 0, 1, 1], [], []>} : vector<24x67xf32>, vector<67x36xf32>, vector<24x36xf32> -> vector<24x36xf32>
    %c0_80 = arith.constant 0 : index
    %c0_81 = arith.constant 0 : index
    %120 = vector.load %arg7[%c0_80, %c0_81] : memref<16x1xf32, #tpu.memory_space<vmem>>, vector<16x1xf32>
    %c0_82 = arith.constant 0 : index
    %c0_83 = arith.constant 0 : index
    %c0_84 = arith.constant 0 : index
    %121 = vector.load %arg6[%c0_82, %c0_83, %c0_84] : memref<9x16x24xf32, #tpu.memory_space<vmem>>, vector<1x16x24xf32>
    %122 = vector.shape_cast %121 : vector<1x16x24xf32> to vector<16x24xf32>
    %123 = vector.extract_strided_slice %119 {offsets = [0, 0], sizes = [24, 22], strides = [1, 1]} : vector<24x36xf32> to vector<24x22xf32>
    %cst_85 = arith.constant dense<0.000000e+00> : vector<16x22xf32>
    %124 = tpu.matmul %122, %123, %cst_85 {dimension_numbers = #tpu.dot_dimension_numbers<[1], [0], [0], [1], [0, 0, 1, 1], [], []>} : vector<16x24xf32>, vector<24x22xf32>, vector<16x22xf32> -> vector<16x22xf32>
    %125 = vector.broadcast %120 : vector<16x1xf32> to vector<16x22xf32>
    %126 = arith.addf %125, %124 : vector<16x22xf32>
    %c1_86 = arith.constant 1 : index
    %c0_87 = arith.constant 0 : index
    %c0_88 = arith.constant 0 : index
    %127 = vector.load %arg6[%c1_86, %c0_87, %c0_88] : memref<9x16x24xf32, #tpu.memory_space<vmem>>, vector<1x16x24xf32>
    %128 = vector.shape_cast %127 : vector<1x16x24xf32> to vector<16x24xf32>
    %129 = vector.extract_strided_slice %119 {offsets = [0, 1], sizes = [24, 22], strides = [1, 1]} : vector<24x36xf32> to vector<24x22xf32>
    %cst_89 = arith.constant dense<0.000000e+00> : vector<16x22xf32>
    %130 = tpu.matmul %128, %129, %cst_89 {dimension_numbers = #tpu.dot_dimension_numbers<[1], [0], [0], [1], [0, 0, 1, 1], [], []>} : vector<16x24xf32>, vector<24x22xf32>, vector<16x22xf32> -> vector<16x22xf32>
    %131 = arith.addf %126, %130 : vector<16x22xf32>
    %c2_90 = arith.constant 2 : index
    %c0_91 = arith.constant 0 : index
    %c0_92 = arith.constant 0 : index
    %132 = vector.load %arg6[%c2_90, %c0_91, %c0_92] : memref<9x16x24xf32, #tpu.memory_space<vmem>>, vector<1x16x24xf32>
    %133 = vector.shape_cast %132 : vector<1x16x24xf32> to vector<16x24xf32>
    %134 = vector.extract_strided_slice %119 {offsets = [0, 2], sizes = [24, 22], strides = [1, 1]} : vector<24x36xf32> to vector<24x22xf32>
    %cst_93 = arith.constant dense<0.000000e+00> : vector<16x22xf32>
    %135 = tpu.matmul %133, %134, %cst_93 {dimension_numbers = #tpu.dot_dimension_numbers<[1], [0], [0], [1], [0, 0, 1, 1], [], []>} : vector<16x24xf32>, vector<24x22xf32>, vector<16x22xf32> -> vector<16x22xf32>
    %136 = arith.addf %131, %135 : vector<16x22xf32>
    %c3_94 = arith.constant 3 : index
    %c0_95 = arith.constant 0 : index
    %c0_96 = arith.constant 0 : index
    %137 = vector.load %arg6[%c3_94, %c0_95, %c0_96] : memref<9x16x24xf32, #tpu.memory_space<vmem>>, vector<1x16x24xf32>
    %138 = vector.shape_cast %137 : vector<1x16x24xf32> to vector<16x24xf32>
    %139 = vector.extract_strided_slice %119 {offsets = [0, 6], sizes = [24, 22], strides = [1, 1]} : vector<24x36xf32> to vector<24x22xf32>
    %cst_97 = arith.constant dense<0.000000e+00> : vector<16x22xf32>
    %140 = tpu.matmul %138, %139, %cst_97 {dimension_numbers = #tpu.dot_dimension_numbers<[1], [0], [0], [1], [0, 0, 1, 1], [], []>} : vector<16x24xf32>, vector<24x22xf32>, vector<16x22xf32> -> vector<16x22xf32>
    %141 = arith.addf %136, %140 : vector<16x22xf32>
    %c4_98 = arith.constant 4 : index
    %c0_99 = arith.constant 0 : index
    %c0_100 = arith.constant 0 : index
    %142 = vector.load %arg6[%c4_98, %c0_99, %c0_100] : memref<9x16x24xf32, #tpu.memory_space<vmem>>, vector<1x16x24xf32>
    %143 = vector.shape_cast %142 : vector<1x16x24xf32> to vector<16x24xf32>
    %144 = vector.extract_strided_slice %119 {offsets = [0, 7], sizes = [24, 22], strides = [1, 1]} : vector<24x36xf32> to vector<24x22xf32>
    %cst_101 = arith.constant dense<0.000000e+00> : vector<16x22xf32>
    %145 = tpu.matmul %143, %144, %cst_101 {dimension_numbers = #tpu.dot_dimension_numbers<[1], [0], [0], [1], [0, 0, 1, 1], [], []>} : vector<16x24xf32>, vector<24x22xf32>, vector<16x22xf32> -> vector<16x22xf32>
    %146 = arith.addf %141, %145 : vector<16x22xf32>
    %c5_102 = arith.constant 5 : index
    %c0_103 = arith.constant 0 : index
    %c0_104 = arith.constant 0 : index
    %147 = vector.load %arg6[%c5_102, %c0_103, %c0_104] : memref<9x16x24xf32, #tpu.memory_space<vmem>>, vector<1x16x24xf32>
    %148 = vector.shape_cast %147 : vector<1x16x24xf32> to vector<16x24xf32>
    %149 = vector.extract_strided_slice %119 {offsets = [0, 8], sizes = [24, 22], strides = [1, 1]} : vector<24x36xf32> to vector<24x22xf32>
    %cst_105 = arith.constant dense<0.000000e+00> : vector<16x22xf32>
    %150 = tpu.matmul %148, %149, %cst_105 {dimension_numbers = #tpu.dot_dimension_numbers<[1], [0], [0], [1], [0, 0, 1, 1], [], []>} : vector<16x24xf32>, vector<24x22xf32>, vector<16x22xf32> -> vector<16x22xf32>
    %151 = arith.addf %146, %150 : vector<16x22xf32>
    %c6_106 = arith.constant 6 : index
    %c0_107 = arith.constant 0 : index
    %c0_108 = arith.constant 0 : index
    %152 = vector.load %arg6[%c6_106, %c0_107, %c0_108] : memref<9x16x24xf32, #tpu.memory_space<vmem>>, vector<1x16x24xf32>
    %153 = vector.shape_cast %152 : vector<1x16x24xf32> to vector<16x24xf32>
    %154 = vector.extract_strided_slice %119 {offsets = [0, 12], sizes = [24, 22], strides = [1, 1]} : vector<24x36xf32> to vector<24x22xf32>
    %cst_109 = arith.constant dense<0.000000e+00> : vector<16x22xf32>
    %155 = tpu.matmul %153, %154, %cst_109 {dimension_numbers = #tpu.dot_dimension_numbers<[1], [0], [0], [1], [0, 0, 1, 1], [], []>} : vector<16x24xf32>, vector<24x22xf32>, vector<16x22xf32> -> vector<16x22xf32>
    %156 = arith.addf %151, %155 : vector<16x22xf32>
    %c7_110 = arith.constant 7 : index
    %c0_111 = arith.constant 0 : index
    %c0_112 = arith.constant 0 : index
    %157 = vector.load %arg6[%c7_110, %c0_111, %c0_112] : memref<9x16x24xf32, #tpu.memory_space<vmem>>, vector<1x16x24xf32>
    %158 = vector.shape_cast %157 : vector<1x16x24xf32> to vector<16x24xf32>
    %159 = vector.extract_strided_slice %119 {offsets = [0, 13], sizes = [24, 22], strides = [1, 1]} : vector<24x36xf32> to vector<24x22xf32>
    %cst_113 = arith.constant dense<0.000000e+00> : vector<16x22xf32>
    %160 = tpu.matmul %158, %159, %cst_113 {dimension_numbers = #tpu.dot_dimension_numbers<[1], [0], [0], [1], [0, 0, 1, 1], [], []>} : vector<16x24xf32>, vector<24x22xf32>, vector<16x22xf32> -> vector<16x22xf32>
    %161 = arith.addf %156, %160 : vector<16x22xf32>
    %c8_114 = arith.constant 8 : index
    %c0_115 = arith.constant 0 : index
    %c0_116 = arith.constant 0 : index
    %162 = vector.load %arg6[%c8_114, %c0_115, %c0_116] : memref<9x16x24xf32, #tpu.memory_space<vmem>>, vector<1x16x24xf32>
    %163 = vector.shape_cast %162 : vector<1x16x24xf32> to vector<16x24xf32>
    %164 = vector.extract_strided_slice %119 {offsets = [0, 14], sizes = [24, 22], strides = [1, 1]} : vector<24x36xf32> to vector<24x22xf32>
    %cst_117 = arith.constant dense<0.000000e+00> : vector<16x22xf32>
    %165 = tpu.matmul %163, %164, %cst_117 {dimension_numbers = #tpu.dot_dimension_numbers<[1], [0], [0], [1], [0, 0, 1, 1], [], []>} : vector<16x24xf32>, vector<24x22xf32>, vector<16x22xf32> -> vector<16x22xf32>
    %166 = arith.addf %161, %165 : vector<16x22xf32>
    %cst_118 = arith.constant 0.00999999977 : f32
    %167 = vector.broadcast %cst_118 : f32 to vector<16x22xf32>
    %168 = arith.mulf %167, %166 : vector<16x22xf32>
    %169 = arith.maximumf %166, %168 : vector<16x22xf32>
    %170 = vector.extract_strided_slice %169 {offsets = [0, 0], sizes = [16, 21], strides = [1, 1]} : vector<16x22xf32> to vector<16x21xf32>
    %171 = vector.extract_strided_slice %169 {offsets = [0, 1], sizes = [16, 21], strides = [1, 1]} : vector<16x22xf32> to vector<16x21xf32>
    %172 = arith.maximumf %170, %171 : vector<16x21xf32>
    %173 = vector.extract_strided_slice %172 {offsets = [0, 0], sizes = [16, 15], strides = [1, 1]} : vector<16x21xf32> to vector<16x15xf32>
    %174 = vector.extract_strided_slice %172 {offsets = [0, 6], sizes = [16, 15], strides = [1, 1]} : vector<16x21xf32> to vector<16x15xf32>
    %175 = arith.maximumf %173, %174 : vector<16x15xf32>
    %c0_119 = arith.constant 0 : index
    %c0_120 = arith.constant 0 : index
    %176 = vector.load %arg17[%c0_119, %c0_120] : memref<15x16xf32, #tpu.memory_space<vmem>>, vector<15x16xf32>
    %cst_121 = arith.constant dense<0.000000e+00> : vector<16x16xf32>
    %177 = tpu.matmul %175, %176, %cst_121 {dimension_numbers = #tpu.dot_dimension_numbers<[1], [0], [0], [1], [0, 0, 1, 1], [], []>} : vector<16x15xf32>, vector<15x16xf32>, vector<16x16xf32> -> vector<16x16xf32>
    %c0_122 = arith.constant 0 : index
    %c0_123 = arith.constant 0 : index
    %178 = vector.load %arg9[%c0_122, %c0_123] : memref<32x1xf32, #tpu.memory_space<vmem>>, vector<32x1xf32>
    %c0_124 = arith.constant 0 : index
    %c0_125 = arith.constant 0 : index
    %c0_126 = arith.constant 0 : index
    %179 = vector.load %arg8[%c0_124, %c0_125, %c0_126] : memref<9x32x16xf32, #tpu.memory_space<vmem>>, vector<1x32x16xf32>
    %180 = vector.shape_cast %179 : vector<1x32x16xf32> to vector<32x16xf32>
    %181 = vector.extract_strided_slice %177 {offsets = [0, 0], sizes = [16, 6], strides = [1, 1]} : vector<16x16xf32> to vector<16x6xf32>
    %cst_127 = arith.constant dense<0.000000e+00> : vector<32x6xf32>
    %182 = tpu.matmul %180, %181, %cst_127 {dimension_numbers = #tpu.dot_dimension_numbers<[1], [0], [0], [1], [0, 0, 1, 1], [], []>} : vector<32x16xf32>, vector<16x6xf32>, vector<32x6xf32> -> vector<32x6xf32>
    %183 = vector.broadcast %178 : vector<32x1xf32> to vector<32x6xf32>
    %184 = arith.addf %183, %182 : vector<32x6xf32>
    %c1_128 = arith.constant 1 : index
    %c0_129 = arith.constant 0 : index
    %c0_130 = arith.constant 0 : index
    %185 = vector.load %arg8[%c1_128, %c0_129, %c0_130] : memref<9x32x16xf32, #tpu.memory_space<vmem>>, vector<1x32x16xf32>
    %186 = vector.shape_cast %185 : vector<1x32x16xf32> to vector<32x16xf32>
    %187 = vector.extract_strided_slice %177 {offsets = [0, 1], sizes = [16, 6], strides = [1, 1]} : vector<16x16xf32> to vector<16x6xf32>
    %cst_131 = arith.constant dense<0.000000e+00> : vector<32x6xf32>
    %188 = tpu.matmul %186, %187, %cst_131 {dimension_numbers = #tpu.dot_dimension_numbers<[1], [0], [0], [1], [0, 0, 1, 1], [], []>} : vector<32x16xf32>, vector<16x6xf32>, vector<32x6xf32> -> vector<32x6xf32>
    %189 = arith.addf %184, %188 : vector<32x6xf32>
    %c2_132 = arith.constant 2 : index
    %c0_133 = arith.constant 0 : index
    %c0_134 = arith.constant 0 : index
    %190 = vector.load %arg8[%c2_132, %c0_133, %c0_134] : memref<9x32x16xf32, #tpu.memory_space<vmem>>, vector<1x32x16xf32>
    %191 = vector.shape_cast %190 : vector<1x32x16xf32> to vector<32x16xf32>
    %192 = vector.extract_strided_slice %177 {offsets = [0, 2], sizes = [16, 6], strides = [1, 1]} : vector<16x16xf32> to vector<16x6xf32>
    %cst_135 = arith.constant dense<0.000000e+00> : vector<32x6xf32>
    %193 = tpu.matmul %191, %192, %cst_135 {dimension_numbers = #tpu.dot_dimension_numbers<[1], [0], [0], [1], [0, 0, 1, 1], [], []>} : vector<32x16xf32>, vector<16x6xf32>, vector<32x6xf32> -> vector<32x6xf32>
    %194 = arith.addf %189, %193 : vector<32x6xf32>
    %c3_136 = arith.constant 3 : index
    %c0_137 = arith.constant 0 : index
    %c0_138 = arith.constant 0 : index
    %195 = vector.load %arg8[%c3_136, %c0_137, %c0_138] : memref<9x32x16xf32, #tpu.memory_space<vmem>>, vector<1x32x16xf32>
    %196 = vector.shape_cast %195 : vector<1x32x16xf32> to vector<32x16xf32>
    %197 = vector.extract_strided_slice %177 {offsets = [0, 4], sizes = [16, 6], strides = [1, 1]} : vector<16x16xf32> to vector<16x6xf32>
    %cst_139 = arith.constant dense<0.000000e+00> : vector<32x6xf32>
    %198 = tpu.matmul %196, %197, %cst_139 {dimension_numbers = #tpu.dot_dimension_numbers<[1], [0], [0], [1], [0, 0, 1, 1], [], []>} : vector<32x16xf32>, vector<16x6xf32>, vector<32x6xf32> -> vector<32x6xf32>
    %199 = arith.addf %194, %198 : vector<32x6xf32>
    %c4_140 = arith.constant 4 : index
    %c0_141 = arith.constant 0 : index
    %c0_142 = arith.constant 0 : index
    %200 = vector.load %arg8[%c4_140, %c0_141, %c0_142] : memref<9x32x16xf32, #tpu.memory_space<vmem>>, vector<1x32x16xf32>
    %201 = vector.shape_cast %200 : vector<1x32x16xf32> to vector<32x16xf32>
    %202 = vector.extract_strided_slice %177 {offsets = [0, 5], sizes = [16, 6], strides = [1, 1]} : vector<16x16xf32> to vector<16x6xf32>
    %cst_143 = arith.constant dense<0.000000e+00> : vector<32x6xf32>
    %203 = tpu.matmul %201, %202, %cst_143 {dimension_numbers = #tpu.dot_dimension_numbers<[1], [0], [0], [1], [0, 0, 1, 1], [], []>} : vector<32x16xf32>, vector<16x6xf32>, vector<32x6xf32> -> vector<32x6xf32>
    %204 = arith.addf %199, %203 : vector<32x6xf32>
    %c5_144 = arith.constant 5 : index
    %c0_145 = arith.constant 0 : index
    %c0_146 = arith.constant 0 : index
    %205 = vector.load %arg8[%c5_144, %c0_145, %c0_146] : memref<9x32x16xf32, #tpu.memory_space<vmem>>, vector<1x32x16xf32>
    %206 = vector.shape_cast %205 : vector<1x32x16xf32> to vector<32x16xf32>
    %207 = vector.extract_strided_slice %177 {offsets = [0, 6], sizes = [16, 6], strides = [1, 1]} : vector<16x16xf32> to vector<16x6xf32>
    %cst_147 = arith.constant dense<0.000000e+00> : vector<32x6xf32>
    %208 = tpu.matmul %206, %207, %cst_147 {dimension_numbers = #tpu.dot_dimension_numbers<[1], [0], [0], [1], [0, 0, 1, 1], [], []>} : vector<32x16xf32>, vector<16x6xf32>, vector<32x6xf32> -> vector<32x6xf32>
    %209 = arith.addf %204, %208 : vector<32x6xf32>
    %c6_148 = arith.constant 6 : index
    %c0_149 = arith.constant 0 : index
    %c0_150 = arith.constant 0 : index
    %210 = vector.load %arg8[%c6_148, %c0_149, %c0_150] : memref<9x32x16xf32, #tpu.memory_space<vmem>>, vector<1x32x16xf32>
    %211 = vector.shape_cast %210 : vector<1x32x16xf32> to vector<32x16xf32>
    %212 = vector.extract_strided_slice %177 {offsets = [0, 8], sizes = [16, 6], strides = [1, 1]} : vector<16x16xf32> to vector<16x6xf32>
    %cst_151 = arith.constant dense<0.000000e+00> : vector<32x6xf32>
    %213 = tpu.matmul %211, %212, %cst_151 {dimension_numbers = #tpu.dot_dimension_numbers<[1], [0], [0], [1], [0, 0, 1, 1], [], []>} : vector<32x16xf32>, vector<16x6xf32>, vector<32x6xf32> -> vector<32x6xf32>
    %214 = arith.addf %209, %213 : vector<32x6xf32>
    %c7_152 = arith.constant 7 : index
    %c0_153 = arith.constant 0 : index
    %c0_154 = arith.constant 0 : index
    %215 = vector.load %arg8[%c7_152, %c0_153, %c0_154] : memref<9x32x16xf32, #tpu.memory_space<vmem>>, vector<1x32x16xf32>
    %216 = vector.shape_cast %215 : vector<1x32x16xf32> to vector<32x16xf32>
    %217 = vector.extract_strided_slice %177 {offsets = [0, 9], sizes = [16, 6], strides = [1, 1]} : vector<16x16xf32> to vector<16x6xf32>
    %cst_155 = arith.constant dense<0.000000e+00> : vector<32x6xf32>
    %218 = tpu.matmul %216, %217, %cst_155 {dimension_numbers = #tpu.dot_dimension_numbers<[1], [0], [0], [1], [0, 0, 1, 1], [], []>} : vector<32x16xf32>, vector<16x6xf32>, vector<32x6xf32> -> vector<32x6xf32>
    %219 = arith.addf %214, %218 : vector<32x6xf32>
    %c8_156 = arith.constant 8 : index
    %c0_157 = arith.constant 0 : index
    %c0_158 = arith.constant 0 : index
    %220 = vector.load %arg8[%c8_156, %c0_157, %c0_158] : memref<9x32x16xf32, #tpu.memory_space<vmem>>, vector<1x32x16xf32>
    %221 = vector.shape_cast %220 : vector<1x32x16xf32> to vector<32x16xf32>
    %222 = vector.extract_strided_slice %177 {offsets = [0, 10], sizes = [16, 6], strides = [1, 1]} : vector<16x16xf32> to vector<16x6xf32>
    %cst_159 = arith.constant dense<0.000000e+00> : vector<32x6xf32>
    %223 = tpu.matmul %221, %222, %cst_159 {dimension_numbers = #tpu.dot_dimension_numbers<[1], [0], [0], [1], [0, 0, 1, 1], [], []>} : vector<32x16xf32>, vector<16x6xf32>, vector<32x6xf32> -> vector<32x6xf32>
    %224 = arith.addf %219, %223 : vector<32x6xf32>
    %cst_160 = arith.constant 0.00999999977 : f32
    %225 = vector.broadcast %cst_160 : f32 to vector<32x6xf32>
    %226 = arith.mulf %225, %224 : vector<32x6xf32>
    %227 = arith.maximumf %224, %226 : vector<32x6xf32>
    %c0_161 = arith.constant 0 : index
    %c0_162 = arith.constant 0 : index
    %228 = vector.load %arg18[%c0_161, %c0_162] : memref<6x16xf32, #tpu.memory_space<vmem>>, vector<6x16xf32>
    %cst_163 = arith.constant dense<0.000000e+00> : vector<32x16xf32>
    %229 = tpu.matmul %227, %228, %cst_163 {dimension_numbers = #tpu.dot_dimension_numbers<[1], [0], [0], [1], [0, 0, 1, 1], [], []>} : vector<32x6xf32>, vector<6x16xf32>, vector<32x16xf32> -> vector<32x16xf32>
    %c0_164 = arith.constant 0 : index
    %c0_165 = arith.constant 0 : index
    %230 = vector.load %arg11[%c0_164, %c0_165] : memref<40x1xf32, #tpu.memory_space<vmem>>, vector<40x1xf32>
    %c0_166 = arith.constant 0 : index
    %c0_167 = arith.constant 0 : index
    %c0_168 = arith.constant 0 : index
    %231 = vector.load %arg10[%c0_166, %c0_167, %c0_168] : memref<9x40x32xf32, #tpu.memory_space<vmem>>, vector<1x40x32xf32>
    %232 = vector.shape_cast %231 : vector<1x40x32xf32> to vector<40x32xf32>
    %233 = vector.extract_strided_slice %229 {offsets = [0, 0], sizes = [32, 6], strides = [1, 1]} : vector<32x16xf32> to vector<32x6xf32>
    %cst_169 = arith.constant dense<0.000000e+00> : vector<40x6xf32>
    %234 = tpu.matmul %232, %233, %cst_169 {dimension_numbers = #tpu.dot_dimension_numbers<[1], [0], [0], [1], [0, 0, 1, 1], [], []>} : vector<40x32xf32>, vector<32x6xf32>, vector<40x6xf32> -> vector<40x6xf32>
    %235 = vector.broadcast %230 : vector<40x1xf32> to vector<40x6xf32>
    %236 = arith.addf %235, %234 : vector<40x6xf32>
    %c1_170 = arith.constant 1 : index
    %c0_171 = arith.constant 0 : index
    %c0_172 = arith.constant 0 : index
    %237 = vector.load %arg10[%c1_170, %c0_171, %c0_172] : memref<9x40x32xf32, #tpu.memory_space<vmem>>, vector<1x40x32xf32>
    %238 = vector.shape_cast %237 : vector<1x40x32xf32> to vector<40x32xf32>
    %239 = vector.extract_strided_slice %229 {offsets = [0, 1], sizes = [32, 6], strides = [1, 1]} : vector<32x16xf32> to vector<32x6xf32>
    %cst_173 = arith.constant dense<0.000000e+00> : vector<40x6xf32>
    %240 = tpu.matmul %238, %239, %cst_173 {dimension_numbers = #tpu.dot_dimension_numbers<[1], [0], [0], [1], [0, 0, 1, 1], [], []>} : vector<40x32xf32>, vector<32x6xf32>, vector<40x6xf32> -> vector<40x6xf32>
    %241 = arith.addf %236, %240 : vector<40x6xf32>
    %c2_174 = arith.constant 2 : index
    %c0_175 = arith.constant 0 : index
    %c0_176 = arith.constant 0 : index
    %242 = vector.load %arg10[%c2_174, %c0_175, %c0_176] : memref<9x40x32xf32, #tpu.memory_space<vmem>>, vector<1x40x32xf32>
    %243 = vector.shape_cast %242 : vector<1x40x32xf32> to vector<40x32xf32>
    %244 = vector.extract_strided_slice %229 {offsets = [0, 2], sizes = [32, 6], strides = [1, 1]} : vector<32x16xf32> to vector<32x6xf32>
    %cst_177 = arith.constant dense<0.000000e+00> : vector<40x6xf32>
    %245 = tpu.matmul %243, %244, %cst_177 {dimension_numbers = #tpu.dot_dimension_numbers<[1], [0], [0], [1], [0, 0, 1, 1], [], []>} : vector<40x32xf32>, vector<32x6xf32>, vector<40x6xf32> -> vector<40x6xf32>
    %246 = arith.addf %241, %245 : vector<40x6xf32>
    %c3_178 = arith.constant 3 : index
    %c0_179 = arith.constant 0 : index
    %c0_180 = arith.constant 0 : index
    %247 = vector.load %arg10[%c3_178, %c0_179, %c0_180] : memref<9x40x32xf32, #tpu.memory_space<vmem>>, vector<1x40x32xf32>
    %248 = vector.shape_cast %247 : vector<1x40x32xf32> to vector<40x32xf32>
    %249 = vector.extract_strided_slice %229 {offsets = [0, 4], sizes = [32, 6], strides = [1, 1]} : vector<32x16xf32> to vector<32x6xf32>
    %cst_181 = arith.constant dense<0.000000e+00> : vector<40x6xf32>
    %250 = tpu.matmul %248, %249, %cst_181 {dimension_numbers = #tpu.dot_dimension_numbers<[1], [0], [0], [1], [0, 0, 1, 1], [], []>} : vector<40x32xf32>, vector<32x6xf32>, vector<40x6xf32> -> vector<40x6xf32>
    %251 = arith.addf %246, %250 : vector<40x6xf32>
    %c4_182 = arith.constant 4 : index
    %c0_183 = arith.constant 0 : index
    %c0_184 = arith.constant 0 : index
    %252 = vector.load %arg10[%c4_182, %c0_183, %c0_184] : memref<9x40x32xf32, #tpu.memory_space<vmem>>, vector<1x40x32xf32>
    %253 = vector.shape_cast %252 : vector<1x40x32xf32> to vector<40x32xf32>
    %254 = vector.extract_strided_slice %229 {offsets = [0, 5], sizes = [32, 6], strides = [1, 1]} : vector<32x16xf32> to vector<32x6xf32>
    %cst_185 = arith.constant dense<0.000000e+00> : vector<40x6xf32>
    %255 = tpu.matmul %253, %254, %cst_185 {dimension_numbers = #tpu.dot_dimension_numbers<[1], [0], [0], [1], [0, 0, 1, 1], [], []>} : vector<40x32xf32>, vector<32x6xf32>, vector<40x6xf32> -> vector<40x6xf32>
    %256 = arith.addf %251, %255 : vector<40x6xf32>
    %c5_186 = arith.constant 5 : index
    %c0_187 = arith.constant 0 : index
    %c0_188 = arith.constant 0 : index
    %257 = vector.load %arg10[%c5_186, %c0_187, %c0_188] : memref<9x40x32xf32, #tpu.memory_space<vmem>>, vector<1x40x32xf32>
    %258 = vector.shape_cast %257 : vector<1x40x32xf32> to vector<40x32xf32>
    %259 = vector.extract_strided_slice %229 {offsets = [0, 6], sizes = [32, 6], strides = [1, 1]} : vector<32x16xf32> to vector<32x6xf32>
    %cst_189 = arith.constant dense<0.000000e+00> : vector<40x6xf32>
    %260 = tpu.matmul %258, %259, %cst_189 {dimension_numbers = #tpu.dot_dimension_numbers<[1], [0], [0], [1], [0, 0, 1, 1], [], []>} : vector<40x32xf32>, vector<32x6xf32>, vector<40x6xf32> -> vector<40x6xf32>
    %261 = arith.addf %256, %260 : vector<40x6xf32>
    %c6_190 = arith.constant 6 : index
    %c0_191 = arith.constant 0 : index
    %c0_192 = arith.constant 0 : index
    %262 = vector.load %arg10[%c6_190, %c0_191, %c0_192] : memref<9x40x32xf32, #tpu.memory_space<vmem>>, vector<1x40x32xf32>
    %263 = vector.shape_cast %262 : vector<1x40x32xf32> to vector<40x32xf32>
    %264 = vector.extract_strided_slice %229 {offsets = [0, 8], sizes = [32, 6], strides = [1, 1]} : vector<32x16xf32> to vector<32x6xf32>
    %cst_193 = arith.constant dense<0.000000e+00> : vector<40x6xf32>
    %265 = tpu.matmul %263, %264, %cst_193 {dimension_numbers = #tpu.dot_dimension_numbers<[1], [0], [0], [1], [0, 0, 1, 1], [], []>} : vector<40x32xf32>, vector<32x6xf32>, vector<40x6xf32> -> vector<40x6xf32>
    %266 = arith.addf %261, %265 : vector<40x6xf32>
    %c7_194 = arith.constant 7 : index
    %c0_195 = arith.constant 0 : index
    %c0_196 = arith.constant 0 : index
    %267 = vector.load %arg10[%c7_194, %c0_195, %c0_196] : memref<9x40x32xf32, #tpu.memory_space<vmem>>, vector<1x40x32xf32>
    %268 = vector.shape_cast %267 : vector<1x40x32xf32> to vector<40x32xf32>
    %269 = vector.extract_strided_slice %229 {offsets = [0, 9], sizes = [32, 6], strides = [1, 1]} : vector<32x16xf32> to vector<32x6xf32>
    %cst_197 = arith.constant dense<0.000000e+00> : vector<40x6xf32>
    %270 = tpu.matmul %268, %269, %cst_197 {dimension_numbers = #tpu.dot_dimension_numbers<[1], [0], [0], [1], [0, 0, 1, 1], [], []>} : vector<40x32xf32>, vector<32x6xf32>, vector<40x6xf32> -> vector<40x6xf32>
    %271 = arith.addf %266, %270 : vector<40x6xf32>
    %c8_198 = arith.constant 8 : index
    %c0_199 = arith.constant 0 : index
    %c0_200 = arith.constant 0 : index
    %272 = vector.load %arg10[%c8_198, %c0_199, %c0_200] : memref<9x40x32xf32, #tpu.memory_space<vmem>>, vector<1x40x32xf32>
    %273 = vector.shape_cast %272 : vector<1x40x32xf32> to vector<40x32xf32>
    %274 = vector.extract_strided_slice %229 {offsets = [0, 10], sizes = [32, 6], strides = [1, 1]} : vector<32x16xf32> to vector<32x6xf32>
    %cst_201 = arith.constant dense<0.000000e+00> : vector<40x6xf32>
    %275 = tpu.matmul %273, %274, %cst_201 {dimension_numbers = #tpu.dot_dimension_numbers<[1], [0], [0], [1], [0, 0, 1, 1], [], []>} : vector<40x32xf32>, vector<32x6xf32>, vector<40x6xf32> -> vector<40x6xf32>
    %276 = arith.addf %271, %275 : vector<40x6xf32>
    %cst_202 = arith.constant 0.00999999977 : f32
    %277 = vector.broadcast %cst_202 : f32 to vector<40x6xf32>
    %278 = arith.mulf %277, %276 : vector<40x6xf32>
    %279 = arith.maximumf %276, %278 : vector<40x6xf32>
    %c0_203 = arith.constant 0 : index
    %c0_204 = arith.constant 0 : index
    %280 = vector.load %arg12[%c0_203, %c0_204] : memref<40x6xf32, #tpu.memory_space<vmem>>, vector<40x6xf32>
    %281 = arith.mulf %280, %279 : vector<40x6xf32>
    %282 = vector.shape_cast %281 : vector<40x6xf32> to vector<1x40x6xf32>
    %cst_205 = arith.constant dense<0.000000e+00> : vector<1xf32>
    %283 = vector.multi_reduction <add>, %282, %cst_205 [1, 2] : vector<1x40x6xf32> to vector<1xf32>
    %284 = vector.shape_cast %283 : vector<1xf32> to vector<1x1x1xf32>
    %285 = vector.extract %284[0, 0, 0] : f32 from vector<1x1x1xf32>
    %c0_206 = arith.constant 0 : index
    %c0_207 = arith.constant 0 : index
    %286 = vector.load %arg13[%c0_206, %c0_207] : memref<1x1xf32, #tpu.memory_space<vmem>>, vector<1x1xf32>
    %287 = vector.extract %286[0, 0] : f32 from vector<1x1xf32>
    %288 = arith.addf %285, %287 : f32
    %289 = vector.broadcast %288 : f32 to vector<1x1x1xf32>
    %c0_208 = arith.constant 0 : index
    %c0_209 = arith.constant 0 : index
    %c0_210 = arith.constant 0 : index
    %290 = vector.load %arg19[%c0_208, %c0_209, %c0_210] : memref<1x1x1xf32, #tpu.memory_space<vmem>>, vector<1x1x1xf32>
    tpu.vector_store %arg19[%c0_208, %c0_209, %c0_210], %289 {strides = array<i32>} : memref<1x1x1xf32, #tpu.memory_space<vmem>>, vector<1x1x1xf32>,
    return
  }
  func.func @transform_0(%arg0: i32) -> (i32, i32, i32) {
    %c0_i32 = arith.constant 0 : i32
    %c0_i32_0 = arith.constant 0 : i32
    %c0_i32_1 = arith.constant 0 : i32
    return %arg0, %c0_i32, %c0_i32_0 : i32, i32, i32
  }
  func.func @transform_1(%arg0: i32) -> (i32, i32, i32) {
    %c0_i32 = arith.constant 0 : i32
    %c0_i32_0 = arith.constant 0 : i32
    %c0_i32_1 = arith.constant 0 : i32
    %c0_i32_2 = arith.constant 0 : i32
    return %c0_i32, %c0_i32_0, %c0_i32_1 : i32, i32, i32
  }
  func.func @transform_2(%arg0: i32) -> (i32, i32) {
    %c0_i32 = arith.constant 0 : i32
    %c0_i32_0 = arith.constant 0 : i32
    %c0_i32_1 = arith.constant 0 : i32
    return %c0_i32, %c0_i32_0 : i32, i32
  }
  func.func @transform_3(%arg0: i32) -> (i32, i32, i32) {
    %c0_i32 = arith.constant 0 : i32
    %c0_i32_0 = arith.constant 0 : i32
    %c0_i32_1 = arith.constant 0 : i32
    %c0_i32_2 = arith.constant 0 : i32
    return %c0_i32, %c0_i32_0, %c0_i32_1 : i32, i32, i32
  }
  func.func @transform_4(%arg0: i32) -> (i32, i32) {
    %c0_i32 = arith.constant 0 : i32
    %c0_i32_0 = arith.constant 0 : i32
    %c0_i32_1 = arith.constant 0 : i32
    return %c0_i32, %c0_i32_0 : i32, i32
  }
  func.func @transform_5(%arg0: i32) -> (i32, i32, i32) {
    %c0_i32 = arith.constant 0 : i32
    %c0_i32_0 = arith.constant 0 : i32
    %c0_i32_1 = arith.constant 0 : i32
    %c0_i32_2 = arith.constant 0 : i32
    return %c0_i32, %c0_i32_0, %c0_i32_1 : i32, i32, i32
  }
  func.func @transform_6(%arg0: i32) -> (i32, i32) {
    %c0_i32 = arith.constant 0 : i32
    %c0_i32_0 = arith.constant 0 : i32
    %c0_i32_1 = arith.constant 0 : i32
    return %c0_i32, %c0_i32_0 : i32, i32
  }
  func.func @transform_7(%arg0: i32) -> (i32, i32, i32) {
    %c0_i32 = arith.constant 0 : i32
    %c0_i32_0 = arith.constant 0 : i32
    %c0_i32_1 = arith.constant 0 : i32
    %c0_i32_2 = arith.constant 0 : i32
    return %c0_i32, %c0_i32_0, %c0_i32_1 : i32, i32, i32
  }
  func.func @transform_8(%arg0: i32) -> (i32, i32) {
    %c0_i32 = arith.constant 0 : i32
    %c0_i32_0 = arith.constant 0 : i32
    %c0_i32_1 = arith.constant 0 : i32
    return %c0_i32, %c0_i32_0 : i32, i32
  }
  func.func @transform_9(%arg0: i32) -> (i32, i32, i32) {
    %c0_i32 = arith.constant 0 : i32
    %c0_i32_0 = arith.constant 0 : i32
    %c0_i32_1 = arith.constant 0 : i32
    %c0_i32_2 = arith.constant 0 : i32
    return %c0_i32, %c0_i32_0, %c0_i32_1 : i32, i32, i32
  }
  func.func @transform_10(%arg0: i32) -> (i32, i32) {
    %c0_i32 = arith.constant 0 : i32
    %c0_i32_0 = arith.constant 0 : i32
    %c0_i32_1 = arith.constant 0 : i32
    return %c0_i32, %c0_i32_0 : i32, i32
  }
  func.func @transform_11(%arg0: i32) -> (i32, i32) {
    %c0_i32 = arith.constant 0 : i32
    %c0_i32_0 = arith.constant 0 : i32
    %c0_i32_1 = arith.constant 0 : i32
    return %c0_i32, %c0_i32_0 : i32, i32
  }
  func.func @transform_12(%arg0: i32) -> (i32, i32) {
    %c0_i32 = arith.constant 0 : i32
    %c0_i32_0 = arith.constant 0 : i32
    %c0_i32_1 = arith.constant 0 : i32
    return %c0_i32, %c0_i32_0 : i32, i32
  }
  func.func @transform_13(%arg0: i32) -> (i32, i32) {
    %c0_i32 = arith.constant 0 : i32
    %c0_i32_0 = arith.constant 0 : i32
    %c0_i32_1 = arith.constant 0 : i32
    return %c0_i32, %c0_i32_0 : i32, i32
  }
  func.func @transform_14(%arg0: i32) -> (i32, i32) {
    %c0_i32 = arith.constant 0 : i32
    %c0_i32_0 = arith.constant 0 : i32
    %c0_i32_1 = arith.constant 0 : i32
    return %c0_i32, %c0_i32_0 : i32, i32
  }
  func.func @transform_15(%arg0: i32) -> (i32, i32) {
    %c0_i32 = arith.constant 0 : i32
    %c0_i32_0 = arith.constant 0 : i32
    %c0_i32_1 = arith.constant 0 : i32
    return %c0_i32, %c0_i32_0 : i32, i32
  }
  func.func @transform_16(%arg0: i32) -> (i32, i32) {
    %c0_i32 = arith.constant 0 : i32
    %c0_i32_0 = arith.constant 0 : i32
    %c0_i32_1 = arith.constant 0 : i32
    return %c0_i32, %c0_i32_0 : i32, i32
  }
  func.func @transform_17(%arg0: i32) -> (i32, i32) {
    %c0_i32 = arith.constant 0 : i32
    %c0_i32_0 = arith.constant 0 : i32
    %c0_i32_1 = arith.constant 0 : i32
    return %c0_i32, %c0_i32_0 : i32, i32
  }
  func.func @transform_18(%arg0: i32) -> (i32, i32, i32) {
    %c0_i32 = arith.constant 0 : i32
    %c0_i32_0 = arith.constant 0 : i32
    %c0_i32_1 = arith.constant 0 : i32
    return %arg0, %c0_i32, %c0_i32_0 : i32, i32, i32
  }
}

</mosaic_0001>

<bundles_post_ra>
// kernel: custom_cnn_forward.1
= control target key start
LH: loop header
LB: loop body
LE: loop exit
PB: predicated region body
PF: predicated region fallthrough
CT: control target
= control target key end

     0   :  { %s8650_s29 = smov 0   ;;  %s10259_s0 = inlined_call_operand.vmem [shape: f32[2,3,256], index: 0, kind: input, shape index: {}]   ;;  %s10260_s1 = inlined_call_operand.vmem [shape: f32[9,16,3], index: 1, kind: input, shape index: {}]   ;;  %s10261_s2 = inlined_call_operand.vmem [shape: f32[16,1], index: 2, kind: input, shape index: {}]   ;;  %s10262_s3 = inlined_call_operand.vmem [shape: f32[9,24,16], index: 3, kind: input, shape index: {}]   ;;  %s10263_s4 = inlined_call_operand.vmem [shape: f32[24,1], index: 4, kind: input, shape index: {}]   ;;  %s10264_s5 = inlined_call_operand.vmem [shape: f32[9,16,24], index: 5, kind: input, shape index: {}]   ;;  %s10265_s6 = inlined_call_operand.vmem [shape: f32[16,1], index: 6, kind: input, shape index: {}]   ;;  %s10266_s7 = inlined_call_operand.vmem [shape: f32[9,32,16], index: 7, kind: input, shape index: {}]   ;;  %s10267_s8 = inlined_call_operand.vmem [shape: f32[32,1], index: 8, kind: input, shape index: {}]   ;;  %s10268_s9 = inlined_call_operand.vmem [shape: f32[9,40,32], index: 9, kind: input, shape index: {}]   ;;  %s10269_s10 = inlined_call_operand.vmem [shape: f32[40,1], index: 10, kind: input, shape index: {}]   ;;  %s10270_s11 = inlined_call_operand.vmem [shape: f32[40,6], index: 11, kind: input, shape index: {}]   ;;  %s10271_s12 = inlined_call_operand.<no memory space> [shape: f32[1,1], index: 12, kind: input, shape index: {}]   ;;  %s10272_s13 = inlined_call_operand.vmem [shape: f32[256,324], index: 13, kind: input, shape index: {}]   ;;  %s10273_s14 = inlined_call_operand.vmem [shape: f32[267,100], index: 14, kind: input, shape index: {}]   ;;  %s10274_s15 = inlined_call_operand.vmem [shape: f32[67,36], index: 15, kind: input, shape index: {}]   ;;  %s10275_s16 = inlined_call_operand.vmem [shape: f32[15,16], index: 16, kind: input, shape index: {}]   ;;  %s10276_s17 = inlined_call_operand.vmem [shape: f32[6,16], index: 17, kind: input, shape index: {}]   ;;  %s10277_s18 = inlined_call_operand.vmem [shape: f32[2,1,1], index: 18, kind: output, shape index: {}]  }
   0x1   :  { %10294 = sst [smem:[#allocation3_spill]] %s10259_s0  ;;  %v23_v0 = vstv %s10271_s12 }
   0x2   :  { %10295 = sst [smem:[#allocation4_spill]] %s10260_s1  ;;  %24 = vst [vmem:[#allocation2] sm:$0x1] %v23_v0 }
   0x3   :  { %10296 = sst [smem:[#allocation5_spill]] %s10261_s2 }
   0x4 LB: > { %s7180_s30 = sadd.s32 4294967295, %s8526_s29   ;;  %p7184_p0 = scmp.ge.s32.totalorder %s8526_s29, 1  ;;  %s8526_s29 = sphi %s8650_s29, %s30_s29  }
   0x5   : > { %p514_p1 = scmp.lt.s32.totalorder %s8526_s29, 3 }
   0x7   : > { %p515_p2 = pnand %p7184_p0, %p514_p1 }
   0x8   : > { %p8777_p3 = scmp.lt.s32.totalorder (!%p515_p2), %s7180_s30, 1  ;;  %s10298_s12 = sld [smem:[#allocation3_spill]] (!%p515_p2) }
   0x9   : > { %518 = sbr.rel (%p515_p2) target bundleno = 3851 (0xf0b), region = 92  ;;  %s10299_s22 = sld [smem:[#allocation4_spill]] (!%p515_p2) }
   0xa   : > { %s8529_s2 = smov (!%p515_p2), 127   ;;  %s8531_s27 = smov (!%p515_p2), 110  }
   0xb   : > { %s8532_s28 = smov (!%p515_p2), 109   ;;  %s10280_s19 = smov (!%p515_p2), 108  }
   0xc   : > { %s8535_s23 = smov (!%p515_p2), 91   ;;  %s8536_s20 = smov (!%p515_p2), 90  }
   0xd   : > { %s10300_s25 = sld [smem:[#allocation5_spill]] (!%p515_p2)  ;;  %s8540_s24 = smov (!%p515_p2), 117  }
   0xe   : > { %v621_v1 = vld [vmem:[%s10272_s13 + $0x170] sm:$0xff]  ;;  %v620_v2 = vld [vmem:[%s10272_s13 + $0x168] sm:$0xff]  ;;  %v618_v3 = vld [vmem:[%s10272_s13 + $0x158] sm:$0xff]  ;;  %s10309_s30 = smov (!%p8777_p3, %s7180_s30), 1  ;;  %vm826_vm0 = vcmask 1042432   ;;  %vm819_vm1 = vcmask 23552  }
   0xf   : > { %674 = vmatprep.subr.mxu0 %v621_v1  ;;  %v617_v4 = vld [vmem:[%s10272_s13 + $0x150] sm:$0xff]  ;;  %v615_v5 = vld [vmem:[%s10272_s13 + $0x140] sm:$0xff]  ;;  %v614_v6 = vld [vmem:[%s10272_s13 + $0x138] sm:$0xff]  ;;  %s7521_s0 = sshll.u32 %s10309_s30, 3  ;;  %vm1013_vm2 = vcmask 1039360   ;;  %vm1195_vm3 = vcmask 1031168  }
  0x10   : > { %675 = vmatpush1.msra.mxu0 %v620_v2  ;;  %v612_v7 = vld [vmem:[%s10272_s13 + $0x128] sm:$0xff]  ;;  %v611_v8 = vld [vmem:[%s10272_s13 + $0x120] sm:$0xff]  ;;  %v609_v9 = vld [vmem:[%s10272_s13 + $0x110] sm:$0xff]  ;;  %s570_s1 = scalar_lea.vmem %s10298_s12, %s7521_s0  ;;  %s8534_s12 = smov 92   ;;  %vm1377_vm4 = vcmask 900096   ;;  %vm1559_vm5 = vcmask 891904  }
  0x11   : > { %676 = vmatprep.subr.mxu0 %v618_v3  ;;  %v608_v10 = vld [vmem:[%s10272_s13 + $0x108] sm:$0xff]  ;;  %v606_v11 = vld [vmem:[%s10272_s13 + $0xf8] sm:$0xff]  ;;  %v605_v12 = vld [vmem:[%s10272_s13 + $0xf0] sm:$0xff]  ;;  %vm1923_vm6 = vcmask 752640   ;;  %vm1741_vm7 = vcmask 883712   ;;  %vm2287_vm8 = vcmask 736256  }
  0x12   : > { %677 = vmatpush1.msra.mxu0 %v617_v4  ;;  %v603_v13 = vld [vmem:[%s10272_s13 + $0xe0] sm:$0xff]  ;;  %v602_v14 = vld [vmem:[%s10272_s13 + $0xd8] sm:$0xff]  ;;  %v600_v17 = vld [vmem:[%s10272_s13 + $0xc8] sm:$0xff]  ;;  %vm2105_vm9 = vcmask 744448   ;;  %vm2574_vm10 = vcmask 89088   ;;  %vm8538_vm11 = vmmov 0  }
  0x13   : > { %678 = vmatprep.subr.mxu0 %v615_v5  ;;  %v670_v15 = vld [vmem:[%s10272_s13 + $0x2f8] sm:$0xff]  ;;  %v667_v18 = vld [vmem:[%s10272_s13 + $0x2e0] sm:$0xff]  ;;  %v664_v21 = vld [vmem:[%s10272_s13 + $0x2c8] sm:$0xff]  ;;  %vm2740_vm12 = vcmask 130048   ;;  %vm3711_vm13 = vcmask 547840   ;;  %vm3808_vm14 = vcmask 195584  }
  0x14   : > { %679 = vmatpush1.msra.mxu0 %v614_v6  ;;  %v622_v16 = vld [vmem:[%s10272_s13 + $0x178] sm:$0xff]  ;;  %7522 = vmatprep.subr.mxu1 %v670_v15  ;;  %v599_v19 = vld [vmem:[%s10272_s13 + $0xc0] sm:$0xff]  ;;  %v597_v22 = vld [vmem:[%s10272_s13 + $0xb0] sm:$0xff]  ;;  %s10286_s21 = smov 122   ;;  %s10288_s26 = smov 120   ;;  %vm4698_vm15 = vcmask 1046528  }
  0x15   : > { %680 = vmatprep.subr.mxu0 %v612_v7  ;;  %7523 = vmatpush3.msra.mxu1 %v622_v16  ;;  %v619_v20 = vld [vmem:[%s10272_s13 + $0x160] sm:$0xff]  ;;  %v616_v23 = vld [vmem:[%s10272_s13 + $0x148] sm:$0xff]  ;;  %v661_v25 = vld [vmem:[%s10272_s13 + $0x2b0] sm:$0xff]  ;;  %s8547_s0 = smov 115  }
  0x16   : > { %681 = vmatpush1.msra.mxu0 %v611_v8  ;;  %7524 = vmatprep.subr.mxu1 %v667_v18  ;;  %v596_v24 = vld [vmem:[%s10272_s13 + $0xa8] sm:$0xff]  ;;  %v594_v26 = vld [vmem:[%s10272_s13 + $0x98] sm:$0xff]  ;;  %v613_v27 = vld [vmem:[%s10272_s13 + $0x130] sm:$0xff] }
  0x17   : > { %682 = vmatprep.subr.mxu0 %v609_v9  ;;  %7525 = vmatpush3.msra.mxu1 %v619_v20  ;;  %v593_v28 = vld [vmem:[%s10272_s13 + $0x90] sm:$0xff]  ;;  %v658_v29 = vld [vmem:[%s10272_s13 + $0x298] sm:$0xff]  ;;  %v591_v30 = vld [vmem:[%s10272_s13 + $0x80] sm:$0xff] }
  0x18   : > { %683 = vmatpush1.msra.mxu0 %v608_v10  ;;  %7526 = vmatprep.subr.mxu1 %v664_v21  ;;  %v610_v31 = vld [vmem:[%s10272_s13 + $0x118] sm:$0xff]  ;;  %v655_v33 = vld [vmem:[%s10272_s13 + $0x280] sm:$0xff]  ;;  %v588_v34 = vld [vmem:[%s10272_s13 + $0x68] sm:$0xff] }
  0x19   : > { %684 = vmatprep.subr.mxu0 %v606_v11  ;;  %7527 = vmatpush3.msra.mxu1 %v616_v23  ;;  %v590_v32 = vld [vmem:[%s10272_s13 + $0x78] sm:$0xff]  ;;  %v607_v35 = vld [vmem:[%s10272_s13 + $0x100] sm:$0xff]  ;;  %v652_v37 = vld [vmem:[%s10272_s13 + $0x268] sm:$0xff] }
  0x1a   : > { %685 = vmatpush1.msra.mxu0 %v605_v12  ;;  %7528 = vmatprep.subr.mxu1 %v661_v25  ;;  %v587_v36 = vld [vmem:[%s10272_s13 + $0x60] sm:$0xff]  ;;  %v585_v38 = vld [vmem:[%s10272_s13 + $0x50] sm:$0xff]  ;;  %v604_v39 = vld [vmem:[%s10272_s13 + $0xe8] sm:$0xff] }
  0x1b   : > { %686 = vmatprep.subr.mxu0 %v603_v13  ;;  %7529 = vmatpush3.msra.mxu1 %v613_v27  ;;  %v584_v40 = vld [vmem:[%s10272_s13 + $0x48] sm:$0xff]  ;;  %v649_v41 = vld [vmem:[%s10272_s13 + $0x250] sm:$0xff]  ;;  %v582_v42 = vld [vmem:[%s10272_s13 + $0x38] sm:$0xff] }
  0x1c   : > { %687 = vmatpush1.msra.mxu0 %v602_v14  ;;  %7530 = vmatprep.subr.mxu1 %v658_v29  ;;  %v601_v43 = vld [vmem:[%s10272_s13 + $0xd0] sm:$0xff]  ;;  %v646_v45 = vld [vmem:[%s10272_s13 + $0x238] sm:$0xff]  ;;  %v579_v46 = vld [vmem:[%s10272_s13 + $0x20] sm:$0xff] }
  0x1d   : > { %688 = vmatprep.subr.mxu0 %v600_v17  ;;  %7531 = vmatpush3.msra.mxu1 %v610_v31  ;;  %v581_v44 = vld [vmem:[%s10272_s13 + $0x30] sm:$0xff]  ;;  %v598_v47 = vld [vmem:[%s10272_s13 + $0xb8] sm:$0xff]  ;;  %v643_v49 = vld [vmem:[%s10272_s13 + $0x220] sm:$0xff] }
  0x1e   : > { %689 = vmatpush1.msra.mxu0 %v599_v19  ;;  %7532 = vmatprep.subr.mxu1 %v655_v33  ;;  %v578_v48 = vld [vmem:[%s10272_s13 + $0x18] sm:$0xff]  ;;  %v576_v50 = vld [vmem:[%s10272_s13 + $0x8] sm:$0xff]  ;;  %v595_v51 = vld [vmem:[%s10272_s13 + $0xa0] sm:$0xff] }
  0x1f   : > { %690 = vmatprep.subr.mxu0 %v597_v22  ;;  %7533 = vmatpush3.msra.mxu1 %v607_v35  ;;  %v575_v52 = vld [vmem:[%s10272_s13] sm:$0xff]  ;;  %v640_v53 = vld [vmem:[%s10272_s13 + $0x208] sm:$0xff]  ;;  %v669_v54 = vld [vmem:[%s10272_s13 + $0x2f0] sm:$0xff]  ;;  %v8528_v35 = vmov 0.0  }
  0x20   : > { %691 = vmatpush1.msra.mxu0 %v596_v24  ;;  %7534 = vmatprep.subr.mxu1 %v652_v37  ;;  %v592_v55 = vld [vmem:[%s10272_s13 + $0x88] sm:$0xff]  ;;  %v637_v57 = vld [vmem:[%s10272_s13 + $0x1f0] sm:$0xff]  ;;  %v666_v58 = vld [vmem:[%s10272_s13 + $0x2d8] sm:$0xff] }
  0x21   : > { %692 = vmatprep.subr.mxu0 %v594_v26  ;;  %7535 = vmatpush3.msra.mxu1 %v604_v39  ;;  %v668_v56 = vld [vmem:[%s10272_s13 + $0x2e8] sm:$0xff]  ;;  %v589_v59 = vld [vmem:[%s10272_s13 + $0x70] sm:$0xff]  ;;  %v634_v61 = vld [vmem:[%s10272_s13 + $0x1d8] sm:$0xff] }
  0x22   : > { %693 = vmatpush1.msra.mxu0 %v593_v28  ;;  %7536 = vmatprep.subr.mxu1 %v649_v41  ;;  %v665_v60 = vld [vmem:[%s10272_s13 + $0x2d0] sm:$0xff]  ;;  %v663_v62 = vld [vmem:[%s10272_s13 + $0x2c0] sm:$0xff]  ;;  %v586_v63 = vld [vmem:[%s10272_s13 + $0x58] sm:$0xff] }
  0x23   : > { %694 = vmatprep.subr.mxu0 %v591_v30  ;;  %7537 = vmatpush3.msra.mxu1 %v601_v43  ;;  %v662_v0 = vld [vmem:[%s10272_s13 + $0x2b8] sm:$0xff]  ;;  %v631_v1 = vld [vmem:[%s10272_s13 + $0x1c0] sm:$0xff]  ;;  %v660_v2 = vld [vmem:[%s10272_s13 + $0x2a8] sm:$0xff] }
  0x24   : > { %695 = vmatpush1.msra.mxu0 %v590_v32  ;;  %7538 = vmatprep.subr.mxu1 %v646_v45  ;;  %v583_v3 = vld [vmem:[%s10272_s13 + $0x40] sm:$0xff]  ;;  %v628_v6 = vld [vmem:[%s10272_s13 + $0x1a8] sm:$0xff]  ;;  %v657_v7 = vld [vmem:[%s10272_s13 + $0x290] sm:$0xff] }
  0x25   : > { %696 = vmatprep.subr.mxu0 %v588_v34  ;;  %7539 = vmatpush3.msra.mxu1 %v598_v47  ;;  %v8875_v4 = vld [vmem:[%s570_s1] sm:$0x77]  ;;  %v580_v8 = vld [vmem:[%s10272_s13 + $0x28] sm:$0xff]  ;;  %v625_v10 = vld [vmem:[%s10272_s13 + $0x190] sm:$0xff]  ;;  %s10282_s1 = smov 126  }
  0x26   : > { %697 = vmatpush1.msra.mxu0 %v587_v36  ;;  %7540 = vmatprep.subr.mxu1 %v643_v49  ;;  %v659_v5 = vld [vmem:[%s10272_s13 + $0x2a0] sm:$0xff]  ;;  %v656_v9 = vld [vmem:[%s10272_s13 + $0x288] sm:$0xff]  ;;  %v672_v11 = vcombine.high %v8875_v4, %v8875_v4  ;;  %v654_v12 = vld [vmem:[%s10272_s13 + $0x278] sm:$0xff] }
  0x27   : > { %698 = vmatprep.subr.mxu0 %v585_v38  ;;  %7541 = vmatpush3.msra.mxu1 %v595_v51  ;;  %v653_v13 = vld [vmem:[%s10272_s13 + $0x270] sm:$0xff]  ;;  %v651_v15 = vld [vmem:[%s10272_s13 + $0x260] sm:$0xff]  ;;  %v650_v16 = vld [vmem:[%s10272_s13 + $0x258] sm:$0xff] }
  0x28   : > { %699 = vmatpush1.msra.mxu0 %v584_v40  ;;  %7542 = vmatprep.subr.mxu1 %v640_v53  ;;  %v577_v14 = vld [vmem:[%s10272_s13 + $0x10] sm:$0xff]  ;;  %v648_v17 = vld [vmem:[%s10272_s13 + $0x248] sm:$0xff]  ;;  %v647_v18 = vld [vmem:[%s10272_s13 + $0x240] sm:$0xff] }
  0x29   : > { %700 = vmatprep.subr.mxu0 %v582_v42  ;;  %7543 = vmatpush3.msra.mxu1 %v592_v55  ;;  %v645_v19 = vld [vmem:[%s10272_s13 + $0x230] sm:$0xff]  ;;  %v644_v20 = vld [vmem:[%s10272_s13 + $0x228] sm:$0xff]  ;;  %v642_v21 = vld [vmem:[%s10272_s13 + $0x218] sm:$0xff] }
  0x2a   : > { %701 = vmatpush1.msra.mxu0 %v581_v44  ;;  %7544 = vmatprep.subr.mxu1 %v637_v57  ;;  %v641_v22 = vld [vmem:[%s10272_s13 + $0x210] sm:$0xff]  ;;  %v639_v23 = vld [vmem:[%s10272_s13 + $0x200] sm:$0xff]  ;;  %v638_v24 = vld [vmem:[%s10272_s13 + $0x1f8] sm:$0xff]  ;;  %v8537_v44 = vmov 0  }
  0x2b   : > { %702 = vmatprep.subr.mxu0 %v579_v46  ;;  %7545 = vmatpush3.msra.mxu1 %v589_v59  ;;  %v636_v25 = vld [vmem:[%s10272_s13 + $0x1e8] sm:$0xff]  ;;  %v635_v26 = vld [vmem:[%s10272_s13 + $0x1e0] sm:$0xff]  ;;  %v633_v27 = vld [vmem:[%s10272_s13 + $0x1d0] sm:$0xff] }
  0x2c   : > { %703 = vmatpush1.msra.mxu0 %v578_v48  ;;  %7546 = vmatprep.subr.mxu1 %v634_v61  ;;  %v632_v28 = vld [vmem:[%s10272_s13 + $0x1c8] sm:$0xff]  ;;  %v630_v29 = vld [vmem:[%s10272_s13 + $0x1b8] sm:$0xff]  ;;  %v629_v30 = vld [vmem:[%s10272_s13 + $0x1b0] sm:$0xff] }
  0x2d   : > { %704 = vmatprep.subr.mxu0 %v576_v50  ;;  %7547 = vmatpush3.msra.mxu1 %v586_v63  ;;  %v627_v31 = vld [vmem:[%s10272_s13 + $0x1a0] sm:$0xff]  ;;  %v626_v32 = vld [vmem:[%s10272_s13 + $0x198] sm:$0xff]  ;;  %v624_v33 = vld [vmem:[%s10272_s13 + $0x188] sm:$0xff] }
  0x2e   : > { %705 = vmatpush1.msra.mxu0 %v575_v52  ;;  %7548 = vmatprep.subr.mxu1 %v631_v1  ;;  %v623_v34 = vld [vmem:[%s10272_s13 + $0x180] sm:$0xff]  ;;  %v818_v43 = vld [vmem:[%s10299_s22 + $0x8] sm:$0xff]  ;;  %v7194_v52 = vld [vmem:[%s10299_s22 + $0x10] sm:$0xff] }
  0x2f   : > { %706 = vmatprep.subr.mxu0 %v669_v54  ;;  %7549 = vmatpush3.msra.mxu1 %v583_v3  ;;  %v8972_v39 = vld [vmem:[%s10299_s22 + $0x20] sm:$0xff]  ;;  %v816_v46 = vld [vmem:[%s10300_s25 + $0x8] sm:$0xff] }
  0x30   : > { %707 = vmatpush2.msra.mxu0 %v668_v56  ;;  %7550 = vmatprep.subr.mxu1 %v628_v6  ;;  %v817_v42 = vld [vmem:[%s10299_s22] sm:$0xff]  ;;  %v7204_v57 = vld [vmem:[%s10299_s22 + $0x28] sm:$0xff] }
  0x31   : > { %708 = vmatprep.subr.mxu0 %v666_v58  ;;  %7551 = vmatpush3.msra.mxu1 %v580_v8  ;;  %v815_v45 = vld [vmem:[%s10300_s25] sm:$0xff]  ;;  %v7195_v58 = vld [vmem:[%s10299_s22 + $0x18] sm:$0xff] }
  0x32   : > { %709 = vmatpush2.msra.mxu0 %v665_v60  ;;  %7552 = vmatprep.subr.mxu1 %v625_v10  ;;  %v7212_v60 = vld [vmem:[%s10299_s22 + $0x30] sm:$0xff] }
  0x33   : > { %710 = vmatprep.subr.mxu0 %v663_v62  ;;  %738 = vmatprep.mubr.f32.mxu0 %v672_v11  ;;  %v7213_v62 = vld [vmem:[%s10299_s22 + $0x38] sm:$0xff] }
  0x34   : > { %711 = vmatpush2.msra.mxu0 %v662_v0  ;;  %7553 = vmatpush3.msra.mxu1 %v577_v14  ;;  %v9046_v0 = vld [vmem:[%s10299_s22 + $0x50] sm:$0xff] }
  0x35   : > { %712 = vmatprep.subr.mxu0 %v660_v2  ;;  %809 = vmatprep.mubr.f32.mxu1 %v672_v11 }
  0x36   : > { %713 = vmatpush2.msra.mxu0 %v659_v5  ;;  %810 = vmatmul.mubr.f32.vlgmr.msra.gmra.mxu1 %v8875_v4 }
  0x37   : > { %714 = vmatprep.subr.mxu0 %v657_v7  ;;  %900 = vmatprep.mubr.f32.mxu1 %v8528_v35 }
  0x38   : > { %715 = vmatpush2.msra.mxu0 %v656_v9  ;;  %8497 = vset.pattern.permute.xlu0 %v8537_v44  ;;  %v9067_v9 = vld [vmem:[%s10299_s22 + $0x58] sm:$0xff] }
  0x39   : > { %716 = vmatprep.subr.mxu0 %v654_v12  ;;  %8498 = vset.pattern.permute.xlu1 %v8537_v44 }
  0x3a   : > { %717 = vmatpush2.msra.mxu0 %v653_v13 }
  0x3b   : > { %718 = vmatprep.subr.mxu0 %v651_v15 }
  0x3c   : > { %719 = vmatpush2.msra.mxu0 %v650_v16 }
  0x3d   : > { %720 = vmatprep.subr.mxu0 %v648_v17  ;;  %v7221_v17 = vld [vmem:[%s10299_s22 + $0x40] sm:$0xff] }
  0x3e   : > { %721 = vmatpush2.msra.mxu0 %v647_v18 }
  0x3f   : > { %722 = vmatprep.subr.mxu0 %v645_v19 }
  0x40   : > { %723 = vmatpush2.msra.mxu0 %v644_v20  ;;  %v7239_v20 = vld [vmem:[%s10299_s22 + $0x60] sm:$0xff] }
  0x41   : > { %724 = vmatprep.subr.mxu0 %v642_v21 }
  0x42   : > { %725 = vmatpush2.msra.mxu0 %v641_v22 }
  0x43   : > { %726 = vmatprep.subr.mxu0 %v639_v23  ;;  %v7222_v23 = vld [vmem:[%s10299_s22 + $0x48] sm:$0xff] }
  0x44   : > { %727 = vmatpush2.msra.mxu0 %v638_v24 }
  0x45   : > { %728 = vmatprep.subr.mxu0 %v636_v25  ;;  %v7240_v25 = vld [vmem:[%s10299_s22 + $0x68] sm:$0xff] }
  0x46   : > { %729 = vmatpush2.msra.mxu0 %v635_v26  ;;  %v7248_v26 = vld [vmem:[%s10299_s22 + $0x70] sm:$0xff] }
  0x47   : > { %730 = vmatprep.subr.mxu0 %v633_v27 }
  0x48   : > { %731 = vmatpush2.msra.mxu0 %v632_v28 }
  0x49   : > { %732 = vmatprep.subr.mxu0 %v630_v29 }
  0x4a   : > { %733 = vmatpush2.msra.mxu0 %v629_v30 }
  0x4b   : > { %734 = vmatprep.subr.mxu0 %v627_v31  ;;  %v7249_v31 = vld [vmem:[%s10299_s22 + $0x78] sm:$0xff] }
  0x4c   : > { %735 = vmatpush2.msra.mxu0 %v626_v32 }
  0x4d   : > { %736 = vmatprep.subr.mxu0 %v624_v33 }
  0x4e   : > { %737 = vmatpush2.msra.mxu0 %v623_v34  ;;  %v7257_v34 = vld [vmem:[%s10299_s22 + $0x80] sm:$0xff] }
  0x4f   : > { %739 = vmatmul.mubr.f32.vlgmr.msra.gmra.mxu0 %v8875_v4 }
  0x50   : > { %7884 = vmatprep.mubr.msk.f32.mxu0 %vm819_vm1, %v8972_v39 }
  0xf6   : > { %v7554_v36 = vpop.f32.mrf.mxu1 }
  0xf8   : > { %v7555_v37 = vpop.f32.mrf.mxu1 }
  0xf9   : > { %v7556_v40 = vadd.f32 %v7555_v37, %v7554_v36  ;;  %v7258_v37 = vld [vmem:[%s10299_s22 + $0x88] sm:$0xff] }
 0x10f   : > { %v740_v38 = vpop.f32.mrf.mxu0 }
 0x110   : > { %1007 = vrot.lane.b32.xlu1 %v740_v38, %s8529_s2 }
 0x111   : > { %v742_v41 = vpop.f32.mrf.mxu0 }
 0x112   : > { %1009 = vrot.lane.b32.xlu0 %v742_v41, %s8529_s2  ;;  %7187 = vmatprep.subr.msk.mxu1 %vm826_vm0, %v742_v41 }
 0x113   : > { %7188 = vmatpush1.msk.msra.mxu1 %vm826_vm0, %v740_v38 }
 0x114   : > { %1191 = vrot.lane.b32.xlu1 %v742_v41, %s10282_s1  ;;  %7872 = vmatprep.subr.msk.mxu1 %vm826_vm0, %v7556_v40 }
 0x115   : > { %7189 = vmatmul.mubr.msk.f32.vlgmr.msra.gmra.mxu1 %vm819_vm1, %v817_v42 }
 0x116   : > { %7873 = vmatpush3.msk.msra.mxu1 %vm826_vm0, %v7556_v40  ;;  %1011 = vrot.lane.b32.xlu0 %v7556_v40, %s8529_s2 }
 0x117   : > { %906 = vmatprep.mubr.f32.mxu1 %v8528_v35 }
 0x118   : > { %1189 = vrot.lane.b32.xlu1 %v740_v38, %s10282_s1 }
 0x119   : > { %7190 = vmatmul.mubr.msk.f32.gmra.mxu1 %vm819_vm1, %v818_v43 }
 0x11a   : > { %1193 = vrot.lane.b32.xlu0 %v7556_v40, %s10282_s1  ;;  %7874 = vmatprep.mubr.msk.f32.mxu1 %vm819_vm1, %v817_v42  ;;  %s8542_s1 = smov 107  }
 0x11c   : > { %1375 = vrot.lane.b32.xlu1 %v7556_v40, %s8531_s27 }
 0x11d   : > { %7875 = vmatmul.mubr.msk.f32.vlgmr.msra.gmra.mxu1 %vm819_vm1, %v818_v43 }
 0x11e   : > { %1373 = vrot.lane.b32.xlu0 %v742_v41, %s8531_s27  ;;  %1092 = vmatprep.mubr.f32.mxu1 %v8528_v35 }
 0x120   : > { %1555 = vrot.lane.b32.xlu1 %v742_v41, %s8532_s28 }
 0x122   : > { %1371 = vrot.lane.b32.xlu0 %v740_v38, %s8531_s27 }
 0x124   : > { %1553 = vrot.lane.b32.xlu1 %v740_v38, %s8532_s28 }
 0x126   : > { %1557 = vrot.lane.b32.xlu0 %v7556_v40, %s8532_s28  ;;  %s10284_s28 = smov 116  }
 0x128   : > { %1739 = vrot.lane.b32.xlu1 %v7556_v40, %s10280_s19 }
 0x12a   : > { %1737 = vrot.lane.b32.xlu0 %v742_v41, %s10280_s19 }
 0x12c   : > { %1917 = vrot.lane.b32.xlu1 %v740_v38, %s8534_s12 }
 0x12e   : > { %1735 = vrot.lane.b32.xlu0 %v740_v38, %s10280_s19  ;;  %s8543_s19 = smov 106  }
 0x130   : > { %1919 = vrot.lane.b32.xlu1 %v742_v41, %s8534_s12 }
 0x132   : > { %1921 = vrot.lane.b32.xlu0 %v7556_v40, %s8534_s12  ;;  %s10302_s12 = smov 108  }
 0x134   : > { %2103 = vrot.lane.b32.xlu1 %v7556_v40, %s8535_s23 }
 0x136   : > { %2101 = vrot.lane.b32.xlu0 %v742_v41, %s8535_s23 }
 0x138   : > { %2283 = vrot.lane.b32.xlu1 %v742_v41, %s8536_s20 }
 0x13a   : > { %2099 = vrot.lane.b32.xlu0 %v740_v38, %s8535_s23  ;;  %s8539_s23 = smov 118  }
 0x13c   : > { %2281 = vrot.lane.b32.xlu1 %v740_v38, %s8536_s20 }
 0x13e   : > { %2285 = vrot.lane.b32.xlu0 %v7556_v40, %s8536_s20  ;;  %s10303_s20 = smov 116  }
 0x140   : > { %995 = vperm.xlu1 %8498, %v816_v46  }
 0x142   : > { %990 = vperm.xlu0 %8497, %v815_v45  }
 0x182   : > { %v1008_v47 = vpop.permute.xlu1 %1007 }
 0x184   : > { %v1010_v48 = vpop.permute.xlu0 %1009 }
 0x185   : > { %v1014_v53 = vsel %vm1013_vm2, %v1008_v47, %v1010_v48 }
 0x186   : > { %v1192_v49 = vpop.permute.xlu1 %1191 }
 0x188   : > { %v1012_v50 = vpop.permute.xlu0 %1011 }
 0x189   : > { %v1015_v51 = vsel %vm1013_vm2, %v1010_v48, %v1012_v50 }
 0x18a   : > { %v1190_v54 = vpop.permute.xlu1 %1189  ;;  %7196 = vmatprep.subr.msk.mxu1 %vm826_vm0, %v1015_v51 }
 0x18b   : > { %7197 = vmatpush1.msk.msra.mxu1 %vm826_vm0, %v1014_v53  ;;  %v1196_v1 = vsel %vm1195_vm3, %v1190_v54, %v1192_v49 }
 0x18c   : > { %v1194_v55 = vpop.permute.xlu0 %1193  ;;  %7198 = vmatmul.mubr.msk.f32.vlgmr.msra.gmra.mxu1 %vm819_vm1, %v7194_v52  ;;  %7877 = vmatprep.subr.msk.mxu1 %vm826_vm0, %v1012_v50 }
 0x18d   : > { %7878 = vmatpush3.msk.msra.mxu1 %vm826_vm0, %v1012_v50  ;;  %7882 = vmatprep.subr.msk.mxu0 %vm826_vm0, %v1194_v55  ;;  %v1197_v56 = vsel %vm1195_vm3, %v1192_v49, %v1194_v55  ;;  %vm5925_vm3 = vcmask 261120  }
 0x18e   : > { %v1376_v59 = vpop.permute.xlu1 %1375  ;;  %7205 = vmatprep.subr.msk.mxu1 %vm826_vm0, %v1197_v56  ;;  %7883 = vmatpush3.msk.msra.mxu0 %vm826_vm0, %v1194_v55 }
 0x18f   : > { %1098 = vmatprep.mubr.f32.mxu1 %v8528_v35  ;;  %7887 = vmatprep.subr.msk.mxu0 %vm826_vm0, %v1376_v59 }
 0x190   : > { %7885 = vmatmul.mubr.msk.f32.vlgmr.msra.gmra.mxu0 %vm819_vm1, %v7204_v57  ;;  %v1374_v61 = vpop.permute.xlu0 %1373  ;;  %7199 = vmatmul.mubr.msk.f32.gmra.mxu1 %vm819_vm1, %v7195_v58 }
 0x191   : > { %7888 = vmatpush3.msk.msra.mxu0 %vm826_vm0, %v1376_v59  ;;  %7879 = vmatprep.mubr.msk.f32.mxu1 %vm819_vm1, %v7194_v52  ;;  %v1379_v3 = vsel %vm1377_vm4, %v1374_v61, %v1376_v59 }
 0x192   : > { %v1556_v63 = vpop.permute.xlu1 %1555  ;;  %7889 = vmatprep.mubr.msk.f32.mxu0 %vm819_vm1, %v7212_v60 }
 0x194   : > { %v1372_v2 = vpop.permute.xlu0 %1371  ;;  %7880 = vmatmul.mubr.msk.f32.vlgmr.msra.gmra.mxu1 %vm819_vm1, %v7195_v58  ;;  %7890 = vmatmul.mubr.msk.f32.vlgmr.msra.gmra.mxu0 %vm819_vm1, %v7213_v62 }
 0x195   : > { %7206 = vmatpush1.msk.msra.mxu1 %vm826_vm0, %v1196_v1  ;;  %1274 = vmatprep.mubr.f32.mxu1 %v8528_v35  ;;  %v1378_v5 = vsel %vm1377_vm4, %v1372_v2, %v1374_v61 }
 0x196   : > { %7214 = vmatprep.subr.msk.mxu1 %vm826_vm0, %v1379_v3  ;;  %v1554_v4 = vpop.permute.xlu1 %1553  ;;  %7899 = vmatprep.mubr.msk.f32.mxu0 %vm819_vm1, %v9046_v0 }
 0x197   : > { %v1560_v12 = vsel %vm1559_vm5, %v1554_v4, %v1556_v63 }
 0x198   : > { %v1558_v6 = vpop.permute.xlu0 %1557  ;;  %7207 = vmatmul.mubr.msk.f32.vlgmr.msra.gmra.mxu1 %vm819_vm1, %v8972_v39 }
 0x199   : > { %7215 = vmatpush1.msk.msra.mxu1 %vm826_vm0, %v1378_v5  ;;  %v1561_v7 = vsel %vm1559_vm5, %v1556_v63, %v1558_v6  ;;  %1280 = vmatprep.mubr.f32.mxu1 %v8528_v35 }
 0x19a   : > { %v1740_v8 = vpop.permute.xlu1 %1739  ;;  %7223 = vmatprep.subr.msk.mxu1 %vm826_vm0, %v1561_v7 }
 0x19b   : > { %7897 = vmatprep.subr.msk.mxu0 %vm826_vm0, %v1740_v8 }
 0x19c   : > { %7898 = vmatpush3.msk.msra.mxu0 %vm826_vm0, %v1740_v8  ;;  %v1738_v10 = vpop.permute.xlu0 %1737  ;;  %7208 = vmatmul.mubr.msk.f32.gmra.mxu1 %vm819_vm1, %v7204_v57 }
 0x19d   : > { %1456 = vmatprep.mubr.f32.mxu1 %v8528_v35  ;;  %7900 = vmatmul.mubr.msk.f32.vlgmr.msra.gmra.mxu0 %vm819_vm1, %v9067_v9  ;;  %v1743_v22 = vsel %vm1741_vm7, %v1738_v10, %v1740_v8 }
 0x19e   : > { %v1918_v11 = vpop.permute.xlu1 %1917  ;;  %2002 = vmatprep.mubr.f32.mxu0 %v8528_v35 }
 0x1a0   : > { %v1736_v13 = vpop.permute.xlu0 %1735  ;;  %7216 = vmatmul.mubr.msk.f32.vlgmr.msra.gmra.mxu1 %vm819_vm1, %v7212_v60 }
 0x1a1   : > { %7224 = vmatpush1.msk.msra.mxu1 %vm826_vm0, %v1560_v12  ;;  %1462 = vmatprep.mubr.f32.mxu1 %v8528_v35  ;;  %v1742_v28 = vsel %vm1741_vm7, %v1736_v13, %v1738_v10 }
 0x1a2   : > { %7892 = vmatprep.subr.msk.mxu1 %vm826_vm0, %v1558_v6  ;;  %v1920_v14 = vpop.permute.xlu1 %1919 }
 0x1a3   : > { %v1924_v18 = vsel %vm1923_vm6, %v1918_v11, %v1920_v14 }
 0x1a4   : > { %v1922_v15 = vpop.permute.xlu0 %1921  ;;  %7217 = vmatmul.mubr.msk.f32.gmra.mxu1 %vm819_vm1, %v7213_v62 }
 0x1a5   : > { %v1925_v16 = vsel %vm1923_vm6, %v1920_v14, %v1922_v15  ;;  %1638 = vmatprep.mubr.f32.mxu1 %v8528_v35 }
 0x1a6   : > { %v2104_v19 = vpop.permute.xlu1 %2103  ;;  %7241 = vmatprep.subr.msk.mxu0 %vm826_vm0, %v1925_v16 }
 0x1a7   : > { %7242 = vmatpush1.msk.msra.mxu0 %vm826_vm0, %v1924_v18 }
 0x1a8   : > { %7907 = vmatprep.subr.msk.mxu0 %vm826_vm0, %v2104_v19  ;;  %v2102_v21 = vpop.permute.xlu0 %2101  ;;  %7225 = vmatmul.mubr.msk.f32.vlgmr.msra.gmra.mxu1 %vm819_vm1, %v7221_v17 }
 0x1a9   : > { %7893 = vmatpush3.msk.msra.mxu1 %vm826_vm0, %v1558_v6  ;;  %7243 = vmatmul.mubr.msk.f32.vlgmr.msra.gmra.mxu0 %vm819_vm1, %v7239_v20  ;;  %v2107_v36 = vsel %vm2105_vm9, %v2102_v21, %v2104_v19 }
 0x1aa   : > { %7232 = vmatprep.subr.msk.mxu1 %vm826_vm0, %v1743_v22  ;;  %7908 = vmatpush3.msk.msra.mxu0 %vm826_vm0, %v2104_v19  ;;  %v2284_v24 = vpop.permute.xlu1 %2283 }
 0x1ab   : > { %1644 = vmatprep.mubr.f32.mxu1 %v8528_v35  ;;  %2008 = vmatprep.mubr.f32.mxu0 %v8528_v35 }
 0x1ac   : > { %v2100_v27 = vpop.permute.xlu0 %2099  ;;  %7226 = vmatmul.mubr.msk.f32.gmra.mxu1 %vm819_vm1, %v7222_v23 }
 0x1ad   : > { %7894 = vmatprep.mubr.msk.f32.mxu1 %vm819_vm1, %v7221_v17  ;;  %7244 = vmatmul.mubr.msk.f32.gmra.mxu0 %vm819_vm1, %v7240_v25  ;;  %v2106_v38 = vsel %vm2105_vm9, %v2100_v27, %v2102_v21 }
 0x1ae   : > { %7909 = vmatprep.mubr.msk.f32.mxu0 %vm819_vm1, %v7248_v26  ;;  %v2282_v29 = vpop.permute.xlu1 %2281 }
 0x1af   : > { %v2288_v33 = vsel %vm2287_vm8, %v2282_v29, %v2284_v24 }
 0x1b0   : > { %v2286_v30 = vpop.permute.xlu0 %2285  ;;  %7895 = vmatmul.mubr.msk.f32.vlgmr.msra.gmra.mxu1 %vm819_vm1, %v7222_v23 }
 0x1b1   : > { %7233 = vmatpush1.msk.msra.mxu1 %vm826_vm0, %v1742_v28  ;;  %v2289_v32 = vsel %vm2287_vm8, %v2284_v24, %v2286_v30  ;;  %1820 = vmatprep.mubr.f32.mxu1 %v8528_v35 }
 0x1b2   : > { %7902 = vmatprep.subr.msk.mxu1 %vm826_vm0, %v1922_v15  ;;  %7259 = vmatprep.subr.msk.mxu0 %vm826_vm0, %v2289_v32 }
 0x1b3   : > { %7910 = vmatmul.mubr.msk.f32.vlgmr.msra.gmra.mxu0 %vm819_vm1, %v7249_v31 }
 0x1b4   : > { %7260 = vmatpush1.msk.msra.mxu0 %vm826_vm0, %v2288_v33  ;;  %7234 = vmatmul.mubr.msk.f32.vlgmr.msra.gmra.mxu1 %vm819_vm1, %v9046_v0 }
 0x1b5   : > { %7903 = vmatpush3.msk.msra.mxu1 %vm826_vm0, %v1922_v15  ;;  %1826 = vmatprep.mubr.f32.mxu1 %v8528_v35 }
 0x1b6   : > { %7250 = vmatprep.subr.msk.mxu1 %vm826_vm0, %v2107_v36  ;;  %2366 = vmatprep.mubr.f32.mxu0 %v8528_v35 }
 0x1b7   : > { %7261 = vmatmul.mubr.msk.f32.vlgmr.msra.gmra.mxu0 %vm819_vm1, %v7257_v34 }
 0x1b8   : > { %7235 = vmatmul.mubr.msk.f32.gmra.mxu1 %vm819_vm1, %v9067_v9  ;;  %2372 = vmatprep.mubr.f32.mxu0 %v8528_v35 }
 0x1b9   : > { %7904 = vmatprep.mubr.msk.f32.mxu1 %vm819_vm1, %v7239_v20 }
 0x1bb   : > { %7262 = vmatmul.mubr.msk.f32.gmra.mxu0 %vm819_vm1, %v7258_v37  ;;  %v996_v11 = vpop.permute.xlu1 %995 }
 0x1bc   : > { %7905 = vmatmul.mubr.msk.f32.vlgmr.msra.gmra.mxu1 %vm819_vm1, %v7240_v25 }
 0x1bd   : > { %7251 = vmatpush1.msk.msra.mxu1 %vm826_vm0, %v2106_v38  ;;  %2184 = vmatprep.mubr.f32.mxu1 %v8528_v35  ;;  %v991_v7 = vpop.permute.xlu0 %990 }
 0x1be   : > { %7912 = vmatprep.subr.msk.mxu1 %vm826_vm0, %v2286_v30 }
 0x1c0   : > { %7252 = vmatmul.mubr.msk.f32.vlgmr.msra.gmra.mxu1 %vm819_vm1, %v7248_v26 }
 0x1c1   : > { %7913 = vmatpush3.msk.msra.mxu1 %vm826_vm0, %v2286_v30  ;;  %2190 = vmatprep.mubr.f32.mxu1 %v8528_v35 }
 0x1c4   : > { %7253 = vmatmul.mubr.msk.f32.gmra.mxu1 %vm819_vm1, %v7249_v31 }
 0x1c5   : > { %7914 = vmatprep.mubr.msk.f32.mxu1 %vm819_vm1, %v7257_v34 }
 0x1c8   : > { %7915 = vmatmul.mubr.msk.f32.vlgmr.msra.gmra.mxu1 %vm819_vm1, %v7258_v37  ;;  %vm5826_vm1 = vcmask 1045504  }
 0x1d5   : > { %v902_v39 = vpop.f32.mrf.mxu1 }
 0x1d6   : > { %v998_v12 = vadd.f32 %v991_v7, %v902_v39 }
 0x1d7   : > { %v904_v40 = vpop.f32.mrf.mxu1 }
 0x1d8   : > { %v999_v15 = vadd.f32 %v991_v7, %v904_v40 }
 0x1d9   : > { %v908_v41 = vpop.f32.mrf.mxu1 }
 0x1da   : > { %v1001_v22 = vadd.f32 %v996_v11, %v908_v41 }
 0x1db   : > { %v910_v42 = vpop.f32.mrf.mxu1 }
 0x1dc   : > { %v1002_v25 = vadd.f32 %v996_v11, %v910_v42 }
 0x1dd   : > { %v7876_v43 = vpop.f32.mrf.mxu1 }
 0x1de   : > { %v1003_v13 = vadd.f32 %v7876_v43, %v996_v11 }
 0x1df   : > { %v979_v44 = vpop.f32.mrf.mxu1 }
 0x1e0   : > { %v1000_v16 = vadd.f32 %v991_v7, %v979_v44 }
 0x24c   : > { %v1094_v45 = vpop.f32.mrf.mxu1 }
 0x24d   : > { %v1180_v17 = vadd.f32 %v1094_v45, %v998_v12 }
 0x24e   : > { %v1096_v46 = vpop.f32.mrf.mxu1 }
 0x24f   : > { %v1181_v21 = vadd.f32 %v1096_v46, %v999_v15 }
 0x250   : > { %v1100_v47 = vpop.f32.mrf.mxu1  ;;  %v7886_v49 = vpop.f32.mrf.mxu0 }
 0x251   : > { %v1183_v28 = vadd.f32 %v1100_v47, %v1001_v22 }
 0x252   : > { %v1102_v48 = vpop.f32.mrf.mxu1  ;;  %v1353_v52 = vpop.f32.mrf.mxu0 }
 0x253   : > { %v1184_v31 = vadd.f32 %v1102_v48, %v1002_v25 }
 0x254   : > { %v7881_v50 = vpop.f32.mrf.mxu1  ;;  %v7891_v55 = vpop.f32.mrf.mxu0 }
 0x255   : > { %v1185_v19 = vadd.f32 %v7881_v50, %v1003_v13 }
 0x256   : > { %v1171_v51 = vpop.f32.mrf.mxu1  ;;  %v1535_v58 = vpop.f32.mrf.mxu0 }
 0x257   : > { %v1182_v23 = vadd.f32 %v1171_v51, %v1000_v16  ;;  %v1367_v32 = vadd.f32 %v7886_v49, %v1185_v19 }
 0x258   : > { %v1276_v53 = vpop.f32.mrf.mxu1 }
 0x259   : > { %v1362_v24 = vadd.f32 %v1276_v53, %v1180_v17  ;;  %v1364_v34 = vadd.f32 %v1353_v52, %v1182_v23  ;;  %v1549_v46 = vadd.f32 %v7891_v55, %v1367_v32 }
 0x25a   : > { %v1278_v54 = vpop.f32.mrf.mxu1 }
 0x25b   : > { %v1363_v29 = vadd.f32 %v1278_v54, %v1181_v21  ;;  %v1546_v50 = vadd.f32 %v1535_v58, %v1364_v34  ;;  %v2570_v34 = vld [vmem:[%s10273_s14 + $0xf0] sm:$0xff] }
 0x25c   : > { %v1282_v56 = vpop.f32.mrf.mxu1 }
 0x25d   : > { %v9154_v60 = vpop.f32.mrf.mxu0  ;;  %v1365_v36 = vadd.f32 %v1282_v56, %v1183_v28 }
 0x25e   : > { %v1284_v57 = vpop.f32.mrf.mxu1 }
 0x25f   : > { %v9156_v63 = vpop.f32.mrf.mxu0  ;;  %v1366_v43 = vadd.f32 %v1284_v57, %v1184_v31 }
 0x260   : > { %v1458_v59 = vpop.f32.mrf.mxu1 }
 0x261   : > { %v1544_v30 = vadd.f32 %v1458_v59, %v1362_v24 }
 0x262   : > { %v1460_v61 = vpop.f32.mrf.mxu1 }
 0x263   : > { %v1545_v37 = vadd.f32 %v1460_v61, %v1363_v29 }
 0x264   : > { %v1464_v62 = vpop.f32.mrf.mxu1 }
 0x265   : > { %v1547_v44 = vadd.f32 %v1464_v62, %v1365_v36  ;;  %v2554_v36 = vld [vmem:[%s10273_s14 + $0x70] sm:$0xff] }
 0x266   : > { %v1466_v0 = vpop.f32.mrf.mxu1 }
 0x267   : > { %v1548_v51 = vadd.f32 %v1466_v0, %v1366_v43  ;;  %v2553_v43 = vld [vmem:[%s10273_s14 + $0x68] sm:$0xff] }
 0x268   : > { %v1640_v1 = vpop.f32.mrf.mxu1 }
 0x269   : > { %v2004_v2 = vpop.f32.mrf.mxu0  ;;  %v1726_v38 = vadd.f32 %v1640_v1, %v1544_v30 }
 0x26a   : > { %v1642_v3 = vpop.f32.mrf.mxu1 }
 0x26b   : > { %v2006_v4 = vpop.f32.mrf.mxu0  ;;  %v1727_v41 = vadd.f32 %v1642_v3, %v1545_v37 }
 0x26c   : > { %v1646_v5 = vpop.f32.mrf.mxu1 }
 0x26d   : > { %v2010_v6 = vpop.f32.mrf.mxu0  ;;  %v1729_v47 = vadd.f32 %v1646_v5, %v1547_v44  ;;  %v2568_v44 = vld [vmem:[%s10273_s14 + $0xe0] sm:$0xff] }
 0x26e   : > { %v1648_v8 = vpop.f32.mrf.mxu1 }
 0x26f   : > { %v2012_v9 = vpop.f32.mrf.mxu0  ;;  %v1730_v59 = vadd.f32 %v1648_v8, %v1548_v51  ;;  %v2550_v51 = vld [vmem:[%s10273_s14 + $0x50] sm:$0xff] }
 0x270   : > { %v7896_v10 = vpop.f32.mrf.mxu1 }
 0x271   : > { %v1731_v54 = vadd.f32 %v7896_v10, %v1549_v46  ;;  %v2567_v46 = vld [vmem:[%s10273_s14 + $0xd8] sm:$0xff] }
 0x272   : > { %v1717_v14 = vpop.f32.mrf.mxu1 }
 0x273   : > { %v7911_v18 = vpop.f32.mrf.mxu0  ;;  %v1728_v52 = vadd.f32 %v1717_v14, %v1546_v50  ;;  %v1913_v62 = vadd.f32 %v9154_v60, %v1731_v54  ;;  %v2566_v50 = vld [vmem:[%s10273_s14 + $0xd0] sm:$0xff]  ;;  %v2564_v54 = vld [vmem:[%s10273_s14 + $0xc0] sm:$0xff] }
 0x274   : > { %v1822_v20 = vpop.f32.mrf.mxu1 }
 0x275   : > { %v2263_v27 = vpop.f32.mrf.mxu0  ;;  %v1908_v45 = vadd.f32 %v1822_v20, %v1726_v38  ;;  %v1910_v58 = vadd.f32 %v9156_v63, %v1728_v52  ;;  %v2562_v52 = vld [vmem:[%s10273_s14 + $0xb0] sm:$0xff] }
 0x276   : > { %v1824_v26 = vpop.f32.mrf.mxu1 }
 0x277   : > { %v2368_v40 = vpop.f32.mrf.mxu0  ;;  %v1909_v53 = vadd.f32 %v1824_v26, %v1727_v41  ;;  %v2090_v56 = vadd.f32 %v2004_v2, %v1908_v45  ;;  %v2552_v41 = vld [vmem:[%s10273_s14 + $0x60] sm:$0xff] }
 0x278   : > { %v1828_v33 = vpop.f32.mrf.mxu1 }
 0x279   : > { %v2370_v49 = vpop.f32.mrf.mxu0  ;;  %v1911_v61 = vadd.f32 %v1828_v33, %v1729_v47  ;;  %v2091_v7 = vadd.f32 %v2006_v4, %v1909_v53  ;;  %v2555_v33 = vld [vmem:[%s10273_s14 + $0x78] sm:$0xff]  ;;  %v2565_v47 = vld [vmem:[%s10273_s14 + $0xc8] sm:$0xff] }
 0x27a   : > { %v1830_v39 = vpop.f32.mrf.mxu1  ;;  %v2549_v53 = vld [vmem:[%s10273_s14 + $0x48] sm:$0xff] }
 0x27b   : > { %v1912_v11 = vadd.f32 %v1830_v39, %v1730_v59  ;;  %v2374_v55 = vpop.f32.mrf.mxu0  ;;  %v2093_v0 = vadd.f32 %v2010_v6, %v1911_v61  ;;  %v2547_v59 = vld [vmem:[%s10273_s14 + $0x38] sm:$0xff]  ;;  %v2561_v61 = vld [vmem:[%s10273_s14 + $0xa8] sm:$0xff] }
 0x27c   : > { %v7906_v42 = vpop.f32.mrf.mxu1 }
 0x27d   : > { %v2095_v10 = vadd.f32 %v7906_v42, %v1913_v62  ;;  %v2094_v15 = vadd.f32 %v2012_v9, %v1912_v11  ;;  %v2376_v4 = vpop.f32.mrf.mxu0  ;;  %v2551_v42 = vld [vmem:[%s10273_s14 + $0x58] sm:$0xff]  ;;  %v2544_v11 = vld [vmem:[%s10273_s14 + $0x20] sm:$0xff] }
 0x27e   : > { %v2081_v48 = vpop.f32.mrf.mxu1  ;;  %v2543_v62 = vld [vmem:[%s10273_s14 + $0x18] sm:$0xff] }
 0x27f   : > { %v2092_v8 = vadd.f32 %v2081_v48, %v1910_v58  ;;  %v2277_v60 = vadd.f32 %v7911_v18, %v2095_v10  ;;  %v2548_v48 = vld [vmem:[%s10273_s14 + $0x40] sm:$0xff]  ;;  %v2542_v58 = vld [vmem:[%s10273_s14 + $0x10] sm:$0xff] }
 0x280   : > { %v2186_v1 = vpop.f32.mrf.mxu1 }
 0x281   : > { %v2272_v57 = vadd.f32 %v2186_v1, %v2090_v56  ;;  %v2274_v23 = vadd.f32 %v2263_v27, %v2092_v8  ;;  %v2571_v27 = vld [vmem:[%s10273_s14 + $0xf8] sm:$0xff]  ;;  %v2546_v56 = vld [vmem:[%s10273_s14 + $0x30] sm:$0xff]  ;;  %v2545_v1 = vld [vmem:[%s10273_s14 + $0x28] sm:$0xff] }
 0x282   : > { %v2188_v3 = vpop.f32.mrf.mxu1  ;;  %7584 = vmatprep.subr.mxu0 %v2571_v27 }
 0x283   : > { %v2273_v5 = vadd.f32 %v2188_v3, %v2091_v7  ;;  %v2454_v12 = vadd.f32 %v2368_v40, %v2272_v57  ;;  %7585 = vmatpush3.msra.mxu0 %v2555_v33  ;;  %v2569_v40 = vld [vmem:[%s10273_s14 + $0xe8] sm:$0xff]  ;;  %v2560_v7 = vld [vmem:[%s10273_s14 + $0xa0] sm:$0xff]  ;;  %v2559_v57 = vld [vmem:[%s10273_s14 + $0x98] sm:$0xff] }
 0x284   : > { %v2192_v13 = vpop.f32.mrf.mxu1  ;;  %7586 = vmatprep.subr.mxu0 %v2570_v34  ;;  %v2573_v3 = vld [vmem:[%s10273_s14 + $0x108] sm:$0x7] }
 0x285   : > { %v2275_v14 = vadd.f32 %v2192_v13, %v2093_v0  ;;  %v2455_v2 = vadd.f32 %v2370_v49, %v2273_v5  ;;  %v2460_v16 = vmul.f32 0.01, %v2454_v12  ;;  %7587 = vmatpush3.msra.mxu0 %v2554_v36  ;;  %v2563_v49 = vld [vmem:[%s10273_s14 + $0xb8] sm:$0xff]  ;;  %7917 = vmatprep.subr.msk.mxu1 %vm826_vm0, %v2573_v3  ;;  %v2572_v0 = vld [vmem:[%s10273_s14 + $0x100] sm:$0xff]  ;;  %v2557_v5 = vld [vmem:[%s10273_s14 + $0x88] sm:$0xff] }
 0x286   : > { %v2194_v17 = vpop.f32.mrf.mxu1  ;;  %7588 = vmatprep.subr.mxu0 %v2569_v40  ;;  %7918 = vmatpush3.msk.msra.mxu1 %vm826_vm0, %v2573_v3  ;;  %v2556_v13 = vld [vmem:[%s10273_s14 + $0x80] sm:$0xff] }
 0x287   : > { %v2461_v19 = vmul.f32 0.01, %v2455_v2  ;;  %v2276_v20 = vadd.f32 %v2194_v17, %v2094_v15  ;;  %v2457_v21 = vadd.f32 %v2374_v55, %v2275_v14  ;;  %v9162_v25 = vmax.f32 %v2454_v12, %v2460_v16  ;;  %7589 = vmatpush3.msra.mxu0 %v2553_v43  ;;  %v2558_v55 = vld [vmem:[%s10273_s14 + $0x90] sm:$0xff]  ;;  %7919 = vmatprep.subr.mxu1 %v2572_v0  ;;  %v2541_v12 = vld [vmem:[%s10273_s14 + $0x8] sm:$0xff]  ;;  %v2540_v15 = vld [vmem:[%s10273_s14] sm:$0xff] }
 0x288   : > { %v7916_v22 = vpop.f32.mrf.mxu1  ;;  %7590 = vmatprep.subr.mxu0 %v2568_v44  ;;  %7920 = vmatpush3.msra.mxu1 %v2572_v0 }
 0x289   : > { %v9160_v24 = vmax.f32 %v2455_v2, %v2461_v19  ;;  %v2463_v63 = vmul.f32 0.01, %v2457_v21  ;;  %v2458_v6 = vadd.f32 %v2376_v4, %v2276_v20  ;;  %v2459_v28 = vadd.f32 %v7916_v22, %v2277_v60  ;;  %7591 = vmatpush3.msra.mxu0 %v2552_v41  ;;  %7924 = vmatprep.subr.mxu1 %v8528_v35 }
 0x28a   : > { %v2445_v26 = vpop.f32.mrf.mxu1  ;;  %7592 = vmatprep.subr.mxu0 %v2567_v46 }
 0x28b   : > { %v2464_v9 = vmul.f32 0.01, %v2458_v6  ;;  %v2456_v29 = vadd.f32 %v2445_v26, %v2274_v23  ;;  %v8499_v30 = vpack.i.bf16 %v9162_v25, %v9160_v24  ;;  %v9166_v31 = vmax.f32 %v2457_v21, %v2463_v63  ;;  %7593 = vmatpush3.msra.mxu0 %v2551_v42 }
 0x28c   : > { %v2465_v37 = vmul.f32 0.01, %v2459_v28  ;;  %7594 = vmatprep.subr.mxu0 %v2566_v50 }
 0x28d   : > { %v9168_v32 = vmax.f32 %v2458_v6, %v2464_v9  ;;  %v2462_v18 = vmul.f32 0.01, %v2456_v29  ;;  %8500 = vrot.lane.b32.xlu1 %v8499_v30, %s8529_s2  ;;  %7595 = vmatpush3.msra.mxu0 %v2550_v51 }
 0x28e   : > { %v9202_v45 = vmax.f32 %v2459_v28, %v2465_v37  ;;  %7596 = vmatprep.subr.mxu0 %v2565_v47 }
 0x28f   : > { %v9183_v38 = vmax.f32 %v2456_v29, %v2462_v18  ;;  %v8504_v39 = vpack.i.bf16 %v9166_v31, %v9168_v32  ;;  %7597 = vmatpush3.msra.mxu0 %v2549_v53 }
 0x290   : > { %7598 = vmatprep.subr.mxu0 %v2564_v54 }
 0x291   : > { %2482 = vrot.lane.b32.xlu0 %v9183_v38, %s8529_s2  ;;  %8505 = vrot.lane.b32.xlu1 %v8504_v39, %s8529_s2 }
 0x292   : > { %7599 = vmatpush3.msra.mxu0 %v2548_v48 }
 0x293   : > { %7600 = vmatprep.subr.mxu0 %v2563_v49 }
 0x294   : > { %7601 = vmatpush3.msra.mxu0 %v2547_v59 }
 0x295   : > { %2488 = vrot.lane.b32.xlu0 %v9202_v45, %s8529_s2  ;;  %7602 = vmatprep.subr.mxu0 %v2562_v52 }
 0x296   : > { %7603 = vmatpush3.msra.mxu0 %v2546_v56  ;;  %v2737_v56 = vld [vmem:[%s10262_s3] sm:$0xff] }
 0x297   : > { %7604 = vmatprep.subr.mxu0 %v2561_v61  ;;  %v2738_v61 = vld [vmem:[%s10262_s3 + $0x8] sm:$0xff] }
 0x298   : > { %7605 = vmatpush3.msra.mxu0 %v2545_v1  ;;  %v2739_v1 = vld [vmem:[%s10262_s3 + $0x10] sm:$0xff] }
 0x299   : > { %7606 = vmatprep.subr.mxu0 %v2560_v7  ;;  %v2735_v7 = vld [vmem:[%s10263_s4 + $0x8] sm:$0xff] }
 0x29a   : > { %7607 = vmatpush3.msra.mxu0 %v2544_v11  ;;  %v2734_v11 = vld [vmem:[%s10263_s4] sm:$0xff] }
 0x29b   : > { %7608 = vmatprep.subr.mxu0 %v2559_v57  ;;  %v2736_v57 = vld [vmem:[%s10263_s4 + $0x10] sm:$0xff] }
 0x29c   : > { %7609 = vmatpush3.msra.mxu0 %v2543_v62 }
 0x29d   : > { %7610 = vmatprep.subr.mxu0 %v2558_v55 }
 0x29e   : > { %7611 = vmatpush3.msra.mxu0 %v2542_v58  ;;  %v7272_v58 = vld [vmem:[%s10262_s3 + $0x18] sm:$0xff] }
 0x29f   : > { %7612 = vmatprep.subr.mxu0 %v2557_v5 }
 0x2a0   : > { %7613 = vmatpush3.msra.mxu0 %v2541_v12  ;;  %v7273_v12 = vld [vmem:[%s10262_s3 + $0x20] sm:$0xff] }
 0x2a1   : > { %7614 = vmatprep.subr.mxu0 %v2556_v13 }
 0x2a2   : > { %7615 = vmatpush3.msra.mxu0 %v2540_v15  ;;  %v7274_v15 = vld [vmem:[%s10262_s3 + $0x28] sm:$0xff] }
 0x2a3   : > { %7963 = vmatprep.subr.mxu0 %v8528_v35 }
 0x2ff   : > { %v8501_v10 = vpop.permute.xlu1 %8500 }
 0x300   : > { %v8503_v8 = vunpack.i.h.bf16 %v8501_v10  ;;  %v8502_v14 = vunpack.i.l.bf16 %v8501_v10 }
 0x302   : > { %v2490_v16 = vsel %vm1013_vm2, %v8503_v8, %v8502_v14  ;;  %v7284_v8 = vld [vmem:[%s10262_s3 + $0x48] sm:$0xff] }
 0x303   : > { %v2483_v2 = vpop.permute.xlu0 %2482  ;;  %v8506_v17 = vpop.permute.xlu1 %8505  ;;  %v2500_v22 = vmax.f32 %v9162_v25, %v2490_v16  ;;  %v7285_v16 = vld [vmem:[%s10262_s3 + $0x50] sm:$0xff] }
 0x304   : > { %v2491_v4 = vsel %vm1013_vm2, %v8502_v14, %v2483_v2  ;;  %v2502_v19 = vmax.f32 %v9183_v38, %v2483_v2  ;;  %v8508_v20 = vunpack.i.h.bf16 %v8506_v17  ;;  %v8507_v21 = vunpack.i.l.bf16 %v8506_v17  ;;  %v7278_v2 = vld [vmem:[%s10262_s3 + $0x30] sm:$0xff] }
 0x305   : > { %v2501_v60 = vmax.f32 %v9160_v24, %v2491_v4 }
 0x306   : > { %2516 = vrot.lane.b32.xlu0 %v2502_v19, %s8531_s27  ;;  %v2492_v6 = vsel %vm1013_vm2, %v8508_v20, %v8507_v21  ;;  %v7286_v20 = vld [vmem:[%s10262_s3 + $0x58] sm:$0xff] }
 0x307   : > { %v2489_v23 = vpop.permute.xlu0 %2488  ;;  %v8509_v63 = vpack.i.bf16 %v2500_v22, %v2501_v60  ;;  %v2503_v29 = vmax.f32 %v9166_v31, %v2492_v6  ;;  %v7290_v6 = vld [vmem:[%s10262_s3 + $0x60] sm:$0xff] }
 0x308   : > { %v2493_v26 = vsel %vm1013_vm2, %v8507_v21, %v2489_v23  ;;  %v2505_v9 = vmax.f32 %v9202_v45, %v2489_v23  ;;  %v7296_v23 = vld [vmem:[%s10262_s3 + $0x78] sm:$0xff]  ;;  %vm5813_vm2 = vcmask 48128  }
 0x309   : > { %v2504_v28 = vmax.f32 %v9168_v32, %v2493_v26  ;;  %8510 = vrot.lane.b32.xlu1 %v8509_v63, %s8531_s27  ;;  %v7297_v26 = vld [vmem:[%s10262_s3 + $0x80] sm:$0xff] }
 0x30a   : > { %2522 = vrot.lane.b32.xlu0 %v2505_v9, %s8531_s27 }
 0x30b   : > { %v8514_v24 = vpack.i.bf16 %v2503_v29, %v2504_v28 }
 0x30d   : > { %8515 = vrot.lane.b32.xlu1 %v8514_v24, %s8531_s27  ;;  %s10301_s27 = smov 126   ;;  %v7292_v24 = vld [vmem:[%s10262_s3 + $0x70] sm:$0xff] }
 0x378   : > { %v2517_v25 = vpop.permute.xlu0 %2516 }
 0x379   : > { %v2536_v30 = vmax.f32 %v2502_v19, %v2517_v25  ;;  %v7279_v19 = vld [vmem:[%s10262_s3 + $0x38] sm:$0xff] }
 0x37b   : > { %v8511_v18 = vpop.permute.xlu1 %8510  ;;  %7921 = vmatprep.mubr.msk.f32.mxu1 %vm2574_vm10, %v2536_v30  ;;  %v7302_v30 = vld [vmem:[%s10262_s3 + $0x90] sm:$0xff] }
 0x37c   : > { %v8513_v27 = vunpack.i.h.bf16 %v8511_v18  ;;  %v8512_v33 = vunpack.i.l.bf16 %v8511_v18  ;;  %v2523_v34 = vpop.permute.xlu0 %2522  ;;  %v7309_v18 = vld [vmem:[%s10262_s3 + $0xb0] sm:$0xff] }
 0x37d   : > { %v2539_v36 = vmax.f32 %v2505_v9, %v2523_v34 }
 0x37e   : > { %v2524_v32 = vsel %vm1377_vm4, %v8513_v27, %v8512_v33  ;;  %v2525_v37 = vsel %vm1377_vm4, %v8512_v33, %v2517_v25  ;;  %v7308_v25 = vld [vmem:[%s10262_s3 + $0xa8] sm:$0xff]  ;;  %v7303_v33 = vld [vmem:[%s10262_s3 + $0x98] sm:$0xff] }
 0x37f   : > { %v2534_v38 = vmax.f32 %v2500_v22, %v2524_v32  ;;  %v8516_v31 = vpop.permute.xlu1 %8515  ;;  %7922 = vmatmul.mubr.msk.f32.vlgmr.msra.gmra.mxu1 %vm2574_vm10, %v2539_v36  ;;  %v2535_v39 = vmax.f32 %v2501_v60, %v2525_v37  ;;  %v7280_v22 = vld [vmem:[%s10262_s3 + $0x40] sm:$0xff] }
 0x380   : > { %v8518_v40 = vunpack.i.h.bf16 %v8516_v31  ;;  %v8517_v43 = vunpack.i.l.bf16 %v8516_v31  ;;  %7928 = vmatprep.mubr.msk.f32.mxu1 %vm8538_vm11, %v8528_v35  ;;  %v7304_v32 = vld [vmem:[%s10262_s3 + $0xa0] sm:$0xff]  ;;  %v7316_v31 = vld [vmem:[%s10262_s3 + $0xd0] sm:$0xff] }
 0x381   : > { %2648 = vmatprep.mubr.f32.mxu0 %v2535_v39  ;;  %v7314_v37 = vld [vmem:[%s10262_s3 + $0xc0] sm:$0xff] }
 0x382   : > { %2649 = vmatmul.mubr.f32.vlgmr.msra.gmra.mxu0 %v2534_v38  ;;  %v2527_v44 = vsel %vm1377_vm4, %v8517_v43, %v2523_v34  ;;  %v2526_v41 = vsel %vm1377_vm4, %v8518_v40, %v8517_v43  ;;  %v7310_v34 = vld [vmem:[%s10262_s3 + $0xb8] sm:$0xff]  ;;  %v7315_v38 = vld [vmem:[%s10262_s3 + $0xc8] sm:$0xff]  ;;  %vm7131_vm4 = vcmask 0  }
 0x383   : > { %v2538_v45 = vmax.f32 %v2504_v28, %v2527_v44  ;;  %v2537_v46 = vmax.f32 %v2503_v29, %v2526_v41  ;;  %v7291_v28 = vld [vmem:[%s10262_s3 + $0x68] sm:$0xff] }
 0x384   : > { %v7298_v29 = vld [vmem:[%s10262_s3 + $0x88] sm:$0xff] }
 0x385   : > { %2653 = vmatprep.mubr.f32.mxu0 %v2538_v45 }
 0x386   : > { %2654 = vmatmul.mubr.f32.gmra.mxu0 %v2537_v46 }
 0x387   : > { %7967 = vmatprep.mubr.msk.f32.mxu0 %vm8538_vm11, %v8528_v35 }
 0x43f   : > { %v7923_v42 = vpop.f32.mrf.mxu1 }
 0x441   : > { %v2725_v53 = vpop.f32.mrf.mxu1 }
 0x442   : > { %v7616_v50 = vpop.f32.mrf.mxu0 }
 0x444   : > { %v7617_v51 = vpop.f32.mrf.mxu0 }
 0x445   : > { %v7618_v47 = vadd.f32 %v7617_v51, %v7616_v50 }
 0x446   : > { %v7619_v54 = vpop.f32.mrf.mxu0 }
 0x447   : > { %v2726_v48 = vadd.f32 %v7618_v47, %v2725_v53 }
 0x448   : > { %v7620_v49 = vpop.f32.mrf.mxu0 }
 0x449   : > { %v7621_v59 = vadd.f32 %v7620_v49, %v7619_v54  ;;  %2854 = vrot.lane.b32.xlu0 %v2726_v48, %s8529_s2 }
 0x44b   : > { %v2731_v52 = vadd.f32 %v7923_v42, %v7621_v59 }
 0x44d   : > { %2956 = vrot.lane.b32.xlu0 %v2726_v48, %s10301_s27  ;;  %2856 = vrot.lane.b32.xlu1 %v2731_v52, %s8529_s2 }
 0x44e   : > { %7925 = vmatpush3.msra.mxu1 %v2731_v52 }
 0x44f   : > { %7926 = vmatprep.subr.mxu1 %v8528_v35 }
 0x450   : > { %7927 = vmatpush3.msra.mxu1 %v2726_v48 }
 0x451   : > { %7929 = vmatmul.mubr.msk.f32.vlgmr.msra.gmra.mxu1 %vm2740_vm12, %v2737_v56  ;;  %3058 = vrot.lane.b32.xlu0 %v2726_v48, %s8539_s23 }
 0x452   : > { %2958 = vrot.lane.b32.xlu1 %v2731_v52, %s10301_s27  ;;  %7931 = vmatprep.mubr.msk.f32.mxu1 %vm8538_vm11, %v8528_v35 }
 0x453   : > { %7937 = vmatprep.subr.mxu1 %v8528_v35 }
 0x455   : > { %7932 = vmatmul.mubr.msk.f32.gmra.mxu1 %vm2740_vm12, %v2738_v61  ;;  %3160 = vrot.lane.b32.xlu0 %v2726_v48, %s8540_s24 }
 0x456   : > { %3060 = vrot.lane.b32.xlu1 %v2731_v52, %s8539_s23  ;;  %7934 = vmatprep.mubr.msk.f32.mxu1 %vm8538_vm11, %v8528_v35 }
 0x459   : > { %7935 = vmatmul.mubr.msk.f32.gmra.mxu1 %vm2740_vm12, %v2739_v1  ;;  %3262 = vrot.lane.b32.xlu0 %v2726_v48, %s10284_s28 }
 0x45a   : > { %3162 = vrot.lane.b32.xlu1 %v2731_v52, %s8540_s24  ;;  %7941 = vmatprep.mubr.msk.f32.mxu1 %vm8538_vm11, %v8528_v35  ;;  %s8545_s24 = smov 121  }
 0x45d   : > { %3364 = vrot.lane.b32.xlu0 %v2726_v48, %s10302_s12 }
 0x45e   : > { %3264 = vrot.lane.b32.xlu1 %v2731_v52, %s10284_s28  ;;  %s10292_s28 = smov 119  }
 0x461   : > { %3466 = vrot.lane.b32.xlu0 %v2726_v48, %s8542_s1 }
 0x462   : > { %3366 = vrot.lane.b32.xlu1 %v2731_v52, %s10302_s12  ;;  %s8548_s12 = smov 114  }
 0x465   : > { %3568 = vrot.lane.b32.xlu0 %v2726_v48, %s8543_s19 }
 0x466   : > { %3468 = vrot.lane.b32.xlu1 %v2731_v52, %s8542_s1  ;;  %s10290_s1 = smov 123  }
 0x469   : > { %2837 = vperm.xlu0 %8497, %v2735_v7  }
 0x46a   : > { %3570 = vrot.lane.b32.xlu1 %v2731_v52, %s8543_s19 }
 0x46e   : > { %2832 = vperm.xlu1 %8498, %v2734_v11  }
 0x472   : > { %2842 = vperm.xlu1 %8498, %v2736_v57  }
 0x4bb   : > { %v2855_v62 = vpop.permute.xlu0 %2854 }
 0x4bf   : > { %v2957_v3 = vpop.permute.xlu0 %2956  ;;  %v2857_v55 = vpop.permute.xlu1 %2856 }
 0x4c0   : > { %7938 = vmatpush3.msra.mxu1 %v2857_v55 }
 0x4c1   : > { %7939 = vmatprep.subr.mxu1 %v8528_v35 }
 0x4c2   : > { %7940 = vmatpush3.msra.mxu1 %v2855_v62 }
 0x4c3   : > { %v3059_v0 = vpop.permute.xlu0 %3058  ;;  %7942 = vmatmul.mubr.msk.f32.vlgmr.msra.gmra.mxu1 %vm2740_vm12, %v7272_v58  ;;  %7950 = vmatprep.subr.mxu1 %v8528_v35 }
 0x4c4   : > { %v2959_v5 = vpop.permute.xlu1 %2958  ;;  %7944 = vmatprep.mubr.msk.f32.mxu1 %vm8538_vm11, %v8528_v35 }
 0x4c5   : > { %7951 = vmatpush3.msra.mxu1 %v2959_v5 }
 0x4c6   : > { %7952 = vmatprep.subr.mxu1 %v8528_v35 }
 0x4c7   : > { %7953 = vmatpush3.msra.mxu1 %v2957_v3  ;;  %v3161_v13 = vpop.permute.xlu0 %3160 }
 0x4c8   : > { %v3061_v10 = vpop.permute.xlu1 %3060  ;;  %7945 = vmatmul.mubr.msk.f32.gmra.mxu1 %vm2740_vm12, %v7273_v12  ;;  %7976 = vmatprep.subr.mxu1 %v8528_v35 }
 0x4c9   : > { %7964 = vmatpush3.msra.mxu0 %v3061_v10  ;;  %7947 = vmatprep.mubr.msk.f32.mxu1 %vm8538_vm11, %v8528_v35 }
 0x4ca   : > { %7965 = vmatprep.subr.mxu0 %v8528_v35 }
 0x4cb   : > { %7966 = vmatpush3.msra.mxu0 %v3059_v0  ;;  %v3263_v17 = vpop.permute.xlu0 %3262 }
 0x4cc   : > { %v3163_v14 = vpop.permute.xlu1 %3162  ;;  %7948 = vmatmul.mubr.msk.f32.gmra.mxu1 %vm2740_vm12, %v7274_v15  ;;  %7968 = vmatmul.mubr.msk.f32.vlgmr.msra.gmra.mxu0 %vm2740_vm12, %v7284_v8 }
 0x4cd   : > { %7954 = vmatprep.mubr.msk.f32.mxu1 %vm8538_vm11, %v8528_v35  ;;  %7970 = vmatprep.mubr.msk.f32.mxu0 %vm8538_vm11, %v8528_v35 }
 0x4ce   : > { %7989 = vmatprep.subr.mxu0 %v8528_v35 }
 0x4cf   : > { %v3365_v60 = vpop.permute.xlu0 %3364 }
 0x4d0   : > { %v3265_v4 = vpop.permute.xlu1 %3264  ;;  %7955 = vmatmul.mubr.msk.f32.vlgmr.msra.gmra.mxu1 %vm2740_vm12, %v7278_v2  ;;  %7971 = vmatmul.mubr.msk.f32.gmra.mxu0 %vm2740_vm12, %v7285_v16 }
 0x4d1   : > { %7977 = vmatpush3.msra.mxu1 %v3163_v14  ;;  %7990 = vmatpush3.msra.mxu0 %v3265_v4 }
 0x4d2   : > { %7978 = vmatprep.subr.mxu1 %v8528_v35  ;;  %7991 = vmatprep.subr.mxu0 %v8528_v35 }
 0x4d3   : > { %7979 = vmatpush3.msra.mxu1 %v3161_v13  ;;  %7957 = vmatprep.mubr.msk.f32.mxu1 %vm8538_vm11, %v8528_v35  ;;  %v3467_v9 = vpop.permute.xlu0 %3466 }
 0x4d4   : > { %7992 = vmatpush3.msra.mxu0 %v3263_v17  ;;  %7973 = vmatprep.mubr.msk.f32.mxu0 %vm8538_vm11, %v8528_v35  ;;  %v3367_v21 = vpop.permute.xlu1 %3366 }
 0x4d5   : > { %7958 = vmatmul.mubr.msk.f32.gmra.mxu1 %vm2740_vm12, %v7279_v19  ;;  %7974 = vmatmul.mubr.msk.f32.gmra.mxu0 %vm2740_vm12, %v7286_v20 }
 0x4d6   : > { %7960 = vmatprep.mubr.msk.f32.mxu1 %vm8538_vm11, %v8528_v35  ;;  %7993 = vmatprep.mubr.msk.f32.mxu0 %vm8538_vm11, %v8528_v35 }
 0x4d7   : > { %8015 = vmatprep.subr.mxu0 %v8528_v35  ;;  %8002 = vmatprep.subr.mxu1 %v8528_v35  ;;  %v3569_v36 = vpop.permute.xlu0 %3568 }
 0x4d8   : > { %v3469_v63 = vpop.permute.xlu1 %3468 }
 0x4d9   : > { %7961 = vmatmul.mubr.msk.f32.gmra.mxu1 %vm2740_vm12, %v7280_v22  ;;  %7994 = vmatmul.mubr.msk.f32.vlgmr.msra.gmra.mxu0 %vm2740_vm12, %v7296_v23 }
 0x4da   : > { %8016 = vmatpush3.msra.mxu0 %v3469_v63  ;;  %7980 = vmatprep.mubr.msk.f32.mxu1 %vm8538_vm11, %v8528_v35 }
 0x4db   : > { %8017 = vmatprep.subr.mxu0 %v8528_v35  ;;  %7996 = vmatprep.mubr.msk.f32.mxu0 %vm8538_vm11, %v8528_v35 }
 0x4dc   : > { %8018 = vmatpush3.msra.mxu0 %v3467_v9  ;;  %v3571_v27 = vpop.permute.xlu1 %3570 }
 0x4dd   : > { %7981 = vmatmul.mubr.msk.f32.vlgmr.msra.gmra.mxu1 %vm2740_vm12, %v7290_v6  ;;  %7997 = vmatmul.mubr.msk.f32.gmra.mxu0 %vm2740_vm12, %v7297_v26 }
 0x4de   : > { %8003 = vmatpush3.msra.mxu1 %v3367_v21  ;;  %7983 = vmatprep.mubr.msk.f32.mxu1 %vm8538_vm11, %v8528_v35 }
 0x4df   : > { %8004 = vmatprep.subr.mxu1 %v8528_v35  ;;  %7999 = vmatprep.mubr.msk.f32.mxu0 %vm8538_vm11, %v8528_v35 }
 0x4e0   : > { %8005 = vmatpush3.msra.mxu1 %v3365_v60  ;;  %8041 = vmatprep.subr.mxu0 %v8528_v35 }
 0x4e1   : > { %7984 = vmatmul.mubr.msk.f32.gmra.mxu1 %vm2740_vm12, %v7291_v28  ;;  %8000 = vmatmul.mubr.msk.f32.gmra.mxu0 %vm2740_vm12, %v7298_v29 }
 0x4e2   : > { %7986 = vmatprep.mubr.msk.f32.mxu1 %vm8538_vm11, %v8528_v35  ;;  %8028 = vmatprep.subr.mxu1 %v8528_v35 }
 0x4e3   : > { %8019 = vmatprep.mubr.msk.f32.mxu0 %vm8538_vm11, %v8528_v35 }
 0x4e4   : > { %v2838_v14 = vpop.permute.xlu0 %2837 }
 0x4e5   : > { %7987 = vmatmul.mubr.msk.f32.gmra.mxu1 %vm2740_vm12, %v7292_v24  ;;  %8020 = vmatmul.mubr.msk.f32.vlgmr.msra.gmra.mxu0 %vm2740_vm12, %v7308_v25 }
 0x4e6   : > { %8006 = vmatprep.mubr.msk.f32.mxu1 %vm8538_vm11, %v8528_v35  ;;  %8022 = vmatprep.mubr.msk.f32.mxu0 %vm8538_vm11, %v8528_v35 }
 0x4e9   : > { %8007 = vmatmul.mubr.msk.f32.vlgmr.msra.gmra.mxu1 %vm2740_vm12, %v7302_v30  ;;  %8023 = vmatmul.mubr.msk.f32.gmra.mxu0 %vm2740_vm12, %v7309_v18  ;;  %v2833_v5 = vpop.permute.xlu1 %2832 }
 0x4ea   : > { %8029 = vmatpush3.msra.mxu1 %v3571_v27  ;;  %8009 = vmatprep.mubr.msk.f32.mxu1 %vm8538_vm11, %v8528_v35 }
 0x4eb   : > { %8030 = vmatprep.subr.mxu1 %v8528_v35  ;;  %8025 = vmatprep.mubr.msk.f32.mxu0 %vm8538_vm11, %v8528_v35 }
 0x4ec   : > { %8031 = vmatpush3.msra.mxu1 %v3569_v36 }
 0x4ed   : > { %8010 = vmatmul.mubr.msk.f32.gmra.mxu1 %vm2740_vm12, %v7303_v33  ;;  %8026 = vmatmul.mubr.msk.f32.gmra.mxu0 %vm2740_vm12, %v7310_v34  ;;  %v2843_v60 = vpop.permute.xlu1 %2842 }
 0x4ee   : > { %8012 = vmatprep.mubr.msk.f32.mxu1 %vm8538_vm11, %v8528_v35  ;;  %8059 = vmatprep.mubr.msk.f32.mxu0 %vm8538_vm11, %v8528_v35 }
 0x4f1   : > { %8013 = vmatmul.mubr.msk.f32.gmra.mxu1 %vm2740_vm12, %v7304_v32 }
 0x4f2   : > { %8032 = vmatprep.mubr.msk.f32.mxu1 %vm8538_vm11, %v8528_v35 }
 0x4f5   : > { %8033 = vmatmul.mubr.msk.f32.vlgmr.msra.gmra.mxu1 %vm2740_vm12, %v7314_v37 }
 0x4f6   : > { %8035 = vmatprep.mubr.msk.f32.mxu1 %vm8538_vm11, %v8528_v35 }
 0x4f9   : > { %8036 = vmatmul.mubr.msk.f32.gmra.mxu1 %vm2740_vm12, %v7315_v38 }
 0x4fa   : > { %8038 = vmatprep.mubr.msk.f32.mxu1 %vm8538_vm11, %v8528_v35 }
 0x4fd   : > { %8039 = vmatmul.mubr.msk.f32.gmra.mxu1 %vm2740_vm12, %v7316_v31 }
 0x511   : > { %v2816_v39 = vpop.f32.mrf.mxu1 }
 0x512   : > { %v2845_v13 = vadd.f32 %v2833_v5, %v2816_v39 }
 0x513   : > { %v7930_v40 = vpop.f32.mrf.mxu1 }
 0x515   : > { %v2821_v43 = vpop.f32.mrf.mxu1 }
 0x516   : > { %v2846_v4 = vadd.f32 %v2838_v14, %v2821_v43  ;;  %v3703_v14 = vld [vmem:[%s10274_s15 + $0x8] sm:$0xff] }
 0x517   : > { %v7933_v44 = vpop.f32.mrf.mxu1 }
 0x519   : > { %v2826_v41 = vpop.f32.mrf.mxu1 }
 0x51a   : > { %v2847_v6 = vadd.f32 %v2843_v60, %v2826_v41 }
 0x51b   : > { %v7936_v45 = vpop.f32.mrf.mxu1 }
 0x583   : > { %v2935_v46 = vpop.f32.mrf.mxu1 }
 0x584   : > { %v2949_v2 = vadd.f32 %v2935_v46, %v2845_v13  ;;  %v3705_v13 = vld [vmem:[%s10274_s15 + $0x18] sm:$0xff] }
 0x585   : > { %v7943_v42 = vpop.f32.mrf.mxu1 }
 0x588   : > { %v2940_v50 = vpop.f32.mrf.mxu1 }
 0x589   : > { %v2950_v22 = vadd.f32 %v2940_v50, %v2846_v4 }
 0x58a   : > { %v7946_v51 = vpop.f32.mrf.mxu1 }
 0x58c   : > { %v2945_v47 = vpop.f32.mrf.mxu1  ;;  %v3139_v53 = vpop.f32.mrf.mxu0 }
 0x58d   : > { %v2951_v24 = vadd.f32 %v2945_v47, %v2847_v6 }
 0x58e   : > { %v7949_v54 = vpop.f32.mrf.mxu1  ;;  %v7969_v48 = vpop.f32.mrf.mxu0 }
 0x590   : > { %v3037_v49 = vpop.f32.mrf.mxu1  ;;  %v3144_v59 = vpop.f32.mrf.mxu0 }
 0x591   : > { %v3051_v19 = vadd.f32 %v3037_v49, %v2949_v2  ;;  %v3702_v2 = vld [vmem:[%s10274_s15] sm:$0xff] }
 0x592   : > { %v7956_v52 = vpop.f32.mrf.mxu1  ;;  %v7972_v56 = vpop.f32.mrf.mxu0 }
 0x593   : > { %v3153_v26 = vadd.f32 %v3139_v53, %v3051_v19  ;;  %v3710_v52 = vld [vmem:[%s10274_s15 + $0x40] sm:$0x7]  ;;  %v3709_v56 = vld [vmem:[%s10274_s15 + $0x38] sm:$0xff] }
 0x594   : > { %8042 = vmatpush3.msk.msra.mxu0 %vm826_vm0, %v3710_v52  ;;  %vm4691_vm0 = vcmask 121856  }
 0x595   : > { %v3042_v61 = vpop.f32.mrf.mxu1  ;;  %v3149_v1 = vpop.f32.mrf.mxu0  ;;  %8043 = vmatprep.subr.mxu0 %v8528_v35 }
 0x596   : > { %v3052_v9 = vadd.f32 %v3042_v61, %v2950_v22  ;;  %8044 = vmatpush3.msra.mxu0 %v3709_v56 }
 0x597   : > { %v7959_v7 = vpop.f32.mrf.mxu1  ;;  %v7975_v11 = vpop.f32.mrf.mxu0  ;;  %8045 = vmatprep.subr.mxu0 %v8528_v35 }
 0x598   : > { %v3154_v27 = vadd.f32 %v3144_v59, %v3052_v9  ;;  %v3708_v11 = vld [vmem:[%s10274_s15 + $0x30] sm:$0xff]  ;;  %v3806_v9 = vld [vmem:[%s10264_s5] sm:$0xff] }
 0x599   : > { %v3047_v57 = vpop.f32.mrf.mxu1  ;;  %v3343_v62 = vpop.f32.mrf.mxu0  ;;  %8046 = vmatpush3.msra.mxu0 %v3708_v11  ;;  %8074 = vmatprep.mubr.msk.f32.mxu1 %vm3808_vm14, %v3806_v9  ;;  %v7342_v11 = vld [vmem:[%s10264_s5 + $0x50] sm:$0xff] }
 0x59a   : > { %v3053_v33 = vadd.f32 %v3047_v57, %v2951_v24  ;;  %8047 = vmatprep.subr.mxu0 %v8528_v35 }
 0x59b   : > { %v7962_v3 = vpop.f32.mrf.mxu1  ;;  %v7995_v55 = vpop.f32.mrf.mxu0 }
 0x59c   : > { %v3155_v39 = vadd.f32 %v3149_v1, %v3053_v33  ;;  %v3707_v55 = vld [vmem:[%s10274_s15 + $0x28] sm:$0xff]  ;;  %v7326_v33 = vld [vmem:[%s10264_s5 + $0x10] sm:$0xff] }
 0x59d   : > { %v3241_v58 = vpop.f32.mrf.mxu1  ;;  %v3348_v0 = vpop.f32.mrf.mxu0  ;;  %8048 = vmatpush3.msra.mxu0 %v3707_v55 }
 0x59e   : > { %v3255_v25 = vadd.f32 %v3241_v58, %v3153_v26  ;;  %8049 = vmatprep.subr.mxu0 %v8528_v35 }
 0x59f   : > { %v7982_v12 = vpop.f32.mrf.mxu1  ;;  %v7998_v10 = vpop.f32.mrf.mxu0 }
 0x5a0   : > { %v3357_v32 = vadd.f32 %v3343_v62, %v3255_v25  ;;  %v3706_v12 = vld [vmem:[%s10274_s15 + $0x20] sm:$0xff] }
 0x5a1   : > { %v3246_v15 = vpop.f32.mrf.mxu1  ;;  %v3353_v8 = vpop.f32.mrf.mxu0  ;;  %8050 = vmatpush3.msra.mxu0 %v3706_v12 }
 0x5a2   : > { %v3256_v37 = vadd.f32 %v3246_v15, %v3154_v27  ;;  %8051 = vmatprep.subr.mxu0 %v8528_v35  ;;  %v3807_v27 = vld [vmem:[%s10264_s5 + $0x8] sm:$0xff] }
 0x5a3   : > { %v7985_v16 = vpop.f32.mrf.mxu1  ;;  %v8001_v17 = vpop.f32.mrf.mxu0  ;;  %8052 = vmatpush3.msra.mxu0 %v3705_v13  ;;  %v7354_v13 = vld [vmem:[%s10264_s5 + $0x80] sm:$0xff] }
 0x5a4   : > { %v3358_v44 = vadd.f32 %v3348_v0, %v3256_v37  ;;  %8053 = vmatprep.subr.mxu0 %v8528_v35 }
 0x5a5   : > { %v3251_v20 = vpop.f32.mrf.mxu1  ;;  %v3547_v21 = vpop.f32.mrf.mxu0 }
 0x5a6   : > { %v3257_v41 = vadd.f32 %v3251_v20, %v3155_v39 }
 0x5a7   : > { %v7988_v23 = vpop.f32.mrf.mxu1  ;;  %v8021_v63 = vpop.f32.mrf.mxu0 }
 0x5a8   : > { %v3359_v51 = vadd.f32 %v3353_v8, %v3257_v41  ;;  %v3704_v8 = vld [vmem:[%s10274_s15 + $0x10] sm:$0xff] }
 0x5a9   : > { %v3445_v28 = vpop.f32.mrf.mxu1  ;;  %v3552_v29 = vpop.f32.mrf.mxu0  ;;  %8054 = vmatpush3.msra.mxu0 %v3704_v8 }
 0x5aa   : > { %v3459_v40 = vadd.f32 %v3445_v28, %v3357_v32  ;;  %8055 = vmatprep.subr.mxu0 %v8528_v35  ;;  %v3804_v32 = vld [vmem:[%s10265_s6] sm:$0xff] }
 0x5ab   : > { %v8008_v30 = vpop.f32.mrf.mxu1  ;;  %v8024_v18 = vpop.f32.mrf.mxu0  ;;  %8056 = vmatpush3.msra.mxu0 %v3703_v14  ;;  %v7355_v14 = vld [vmem:[%s10264_s5 + $0x88] sm:$0xff] }
 0x5ac   : > { %v3561_v46 = vadd.f32 %v3547_v21, %v3459_v40  ;;  %8057 = vmatprep.subr.mxu0 %v8528_v35 }
 0x5ad   : > { %v3450_v34 = vpop.f32.mrf.mxu1  ;;  %v3557_v36 = vpop.f32.mrf.mxu0  ;;  %8058 = vmatpush3.msra.mxu0 %v3702_v2 }
 0x5ae   : > { %v3460_v42 = vadd.f32 %v3450_v34, %v3358_v44  ;;  %v7334_v34 = vld [vmem:[%s10264_s5 + $0x30] sm:$0xff] }
 0x5af   : > { %v8011_v38 = vpop.f32.mrf.mxu1  ;;  %v8027_v31 = vpop.f32.mrf.mxu0 }
 0x5b0   : > { %v3562_v54 = vadd.f32 %v3552_v29, %v3460_v42  ;;  %v7327_v42 = vld [vmem:[%s10264_s5 + $0x18] sm:$0xff] }
 0x5b1   : > { %v3455_v43 = vpop.f32.mrf.mxu1 }
 0x5b2   : > { %v3461_v48 = vadd.f32 %v3455_v43, %v3359_v51 }
 0x5b3   : > { %v8014_v45 = vpop.f32.mrf.mxu1 }
 0x5b4   : > { %v3563_v57 = vadd.f32 %v3557_v36, %v3461_v48  ;;  %v3805_v36 = vld [vmem:[%s10265_s6 + $0x8] sm:$0xff] }
 0x5b5   : > { %v3649_v50 = vpop.f32.mrf.mxu1 }
 0x5b6   : > { %v3663_v47 = vadd.f32 %v3649_v50, %v3561_v46  ;;  %v7330_v50 = vld [vmem:[%s10264_s5 + $0x20] sm:$0xff] }
 0x5b7   : > { %v8034_v53 = vpop.f32.mrf.mxu1 }
 0x5b8   : > { %v3666_v49 = vmul.f32 0.01, %v3663_v47 }
 0x5b9   : > { %v3654_v59 = vpop.f32.mrf.mxu1 }
 0x5ba   : > { %v3669_v61 = vmax.f32 %v3663_v47, %v3666_v49  ;;  %v3664_v1 = vadd.f32 %v3654_v59, %v3562_v54  ;;  %v7331_v54 = vld [vmem:[%s10264_s5 + $0x28] sm:$0xff]  ;;  %v7335_v49 = vld [vmem:[%s10264_s5 + $0x38] sm:$0xff]  ;;  %v7338_v59 = vld [vmem:[%s10264_s5 + $0x40] sm:$0xff] }
 0x5bb   : > { %v8037_v7 = vpop.f32.mrf.mxu1 }
 0x5bc   : > { %v3667_v62 = vmul.f32 0.01, %v3664_v1  ;;  %3675 = vrot.lane.b32.xlu0 %v3669_v61, %s8529_s2 }
 0x5bd   : > { %v3659_v3 = vpop.f32.mrf.mxu1 }
 0x5be   : > { %v3670_v58 = vmax.f32 %v3664_v1, %v3667_v62  ;;  %v3665_v0 = vadd.f32 %v3659_v3, %v3563_v57  ;;  %v7343_v57 = vld [vmem:[%s10264_s5 + $0x58] sm:$0xff]  ;;  %v7346_v3 = vld [vmem:[%s10264_s5 + $0x60] sm:$0xff] }
 0x5bf   : > { %v8040_v5 = vpop.f32.mrf.mxu1 }
 0x5c0   : > { %v3668_v10 = vmul.f32 0.01, %v3665_v0  ;;  %3677 = vrot.lane.b32.xlu1 %v3670_v58, %s8529_s2  ;;  %v7350_v5 = vld [vmem:[%s10264_s5 + $0x70] sm:$0xff] }
 0x5c2   : > { %v3671_v15 = vmax.f32 %v3665_v0, %v3668_v10  ;;  %v7351_v10 = vld [vmem:[%s10264_s5 + $0x78] sm:$0xff] }
 0x5c4   : > { %3679 = vrot.lane.b32.xlu0 %v3671_v15, %s8529_s2 }
 0x62e   : > { %v3676_v16 = vpop.permute.xlu0 %3675 }
 0x62f   : > { %v3684_v17 = vmax.f32 %v3669_v61, %v3676_v16  ;;  %v7339_v61 = vld [vmem:[%s10264_s5 + $0x48] sm:$0xff] }
 0x631   : > { %3690 = vrot.lane.b32.xlu1 %v3684_v17, %s8539_s23 }
 0x632   : > { %v3678_v4 = vpop.permute.xlu1 %3677 }
 0x633   : > { %v3685_v19 = vmax.f32 %v3670_v58, %v3678_v4  ;;  %v7347_v58 = vld [vmem:[%s10264_s5 + $0x68] sm:$0xff] }
 0x635   : > { %3692 = vrot.lane.b32.xlu0 %v3685_v19, %s8539_s23 }
 0x636   : > { %v3680_v20 = vpop.permute.xlu0 %3679 }
 0x637   : > { %v3686_v21 = vmax.f32 %v3671_v15, %v3680_v20 }
 0x639   : > { %3694 = vrot.lane.b32.xlu1 %v3686_v21, %s8539_s23 }
 0x6a3   : > { %v3691_v60 = vpop.permute.xlu1 %3690 }
 0x6a4   : > { %v3699_v22 = vmax.f32 %v3684_v17, %v3691_v60 }
 0x6a6   : > { %8060 = vmatmul.mubr.msk.f32.vlgmr.msra.gmra.mxu0 %vm3711_vm13, %v3699_v22 }
 0x6a7   : > { %v3693_v23 = vpop.permute.xlu0 %3692  ;;  %8062 = vmatprep.mubr.msk.f32.mxu0 %vm8538_vm11, %v8528_v35 }
 0x6a8   : > { %v3700_v63 = vmax.f32 %v3685_v19, %v3693_v23 }
 0x6aa   : > { %8063 = vmatmul.mubr.msk.f32.gmra.mxu0 %vm3711_vm13, %v3700_v63 }
 0x6ab   : > { %v3695_v6 = vpop.permute.xlu1 %3694  ;;  %8065 = vmatprep.mubr.msk.f32.mxu0 %vm8538_vm11, %v8528_v35 }
 0x6ac   : > { %v3701_v26 = vmax.f32 %v3686_v21, %v3695_v6 }
 0x6ae   : > { %8066 = vmatmul.mubr.msk.f32.gmra.mxu0 %vm3711_vm13, %v3701_v26 }
 0x6af   : > { %8101 = vmatprep.mubr.msk.f32.mxu0 %vm3808_vm14, %v7334_v34 }
 0x766   : > { %v3790_v28 = vpop.f32.mrf.mxu0 }
 0x767   : > { %3908 = vrot.lane.b32.xlu0 %v3790_v28, %s8529_s2  ;;  %4003 = vrot.lane.b32.xlu1 %v3790_v28, %s10301_s27 }
 0x768   : > { %v8061_v29 = vpop.f32.mrf.mxu0 }
 0x76a   : > { %v3795_v24 = vpop.f32.mrf.mxu0 }
 0x76b   : > { %4098 = vrot.lane.b32.xlu1 %v3790_v28, %s10286_s21  ;;  %4005 = vrot.lane.b32.xlu0 %v3795_v24, %s10301_s27 }
 0x76c   : > { %v8064_v25 = vpop.f32.mrf.mxu0 }
 0x76e   : > { %v3800_v30 = vpop.f32.mrf.mxu0 }
 0x76f   : > { %4193 = vrot.lane.b32.xlu1 %v3790_v28, %s8545_s24  ;;  %4195 = vrot.lane.b32.xlu0 %v3795_v24, %s8545_s24 }
 0x770   : > { %8068 = vmatprep.subr.mxu1 %v3800_v30  ;;  %v8067_v18 = vpop.f32.mrf.mxu0 }
 0x771   : > { %8069 = vmatpush3.msra.mxu1 %v3800_v30 }
 0x772   : > { %8070 = vmatprep.subr.mxu1 %v3795_v24 }
 0x773   : > { %8071 = vmatpush3.msra.mxu1 %v3795_v24  ;;  %3910 = vrot.lane.b32.xlu1 %v3795_v24, %s8529_s2 }
 0x774   : > { %3912 = vrot.lane.b32.xlu0 %v3800_v30, %s8529_s2  ;;  %8072 = vmatprep.subr.mxu1 %v3790_v28 }
 0x775   : > { %8073 = vmatpush3.msra.mxu1 %v3790_v28 }
 0x776   : > { %8075 = vmatmul.mubr.msk.f32.vlgmr.msra.gmra.mxu1 %vm3808_vm14, %v3807_v27 }
 0x777   : > { %4100 = vrot.lane.b32.xlu1 %v3795_v24, %s10286_s21  ;;  %8083 = vmatprep.mubr.msk.f32.mxu1 %vm3808_vm14, %v7326_v33 }
 0x778   : > { %4385 = vrot.lane.b32.xlu0 %v3795_v24, %s10303_s20 }
 0x77b   : > { %4007 = vrot.lane.b32.xlu1 %v3800_v30, %s10301_s27 }
 0x77c   : > { %4102 = vrot.lane.b32.xlu0 %v3800_v30, %s10286_s21 }
 0x77f   : > { %4290 = vrot.lane.b32.xlu1 %v3795_v24, %s10288_s26 }
 0x780   : > { %4197 = vrot.lane.b32.xlu0 %v3800_v30, %s8545_s24  ;;  %s10306_s24 = smov 120  }
 0x783   : > { %4288 = vrot.lane.b32.xlu1 %v3790_v28, %s10288_s26 }
 0x784   : > { %4292 = vrot.lane.b32.xlu0 %v3800_v30, %s10288_s26 }
 0x787   : > { %4383 = vrot.lane.b32.xlu1 %v3790_v28, %s10303_s20 }
 0x788   : > { %4387 = vrot.lane.b32.xlu0 %v3800_v30, %s10303_s20 }
 0x78b   : > { %4480 = vrot.lane.b32.xlu1 %v3795_v24, %s8547_s0 }
 0x78c   : > { %4482 = vrot.lane.b32.xlu0 %v3800_v30, %s8547_s0 }
 0x78f   : > { %4478 = vrot.lane.b32.xlu1 %v3790_v28, %s8547_s0 }
 0x790   : > { %4577 = vrot.lane.b32.xlu0 %v3800_v30, %s8548_s12 }
 0x793   : > { %4573 = vrot.lane.b32.xlu1 %v3790_v28, %s8548_s12 }
 0x794   : > { %4575 = vrot.lane.b32.xlu0 %v3795_v24, %s8548_s12  ;;  %s8549_s12 = smov 124  }
 0x797   : > { %3897 = vperm.xlu1 %8498, %v3805_v36  }
 0x798   : > { %3892 = vperm.xlu0 %8497, %v3804_v32  }
 0x7d9   : > { %v4004_v37 = vpop.permute.xlu1 %4003  ;;  %v3909_v38 = vpop.permute.xlu0 %3908 }
 0x7dd   : > { %v4099_v31 = vpop.permute.xlu1 %4098  ;;  %v4006_v39 = vpop.permute.xlu0 %4005 }
 0x7e1   : > { %v4194_v40 = vpop.permute.xlu1 %4193  ;;  %v4196_v43 = vpop.permute.xlu0 %4195 }
 0x7e5   : > { %v3911_v44 = vpop.permute.xlu1 %3910 }
 0x7e6   : > { %v3913_v41 = vpop.permute.xlu0 %3912 }
 0x7e7   : > { %8077 = vmatprep.subr.mxu1 %v3913_v41 }
 0x7e8   : > { %8078 = vmatpush3.msra.mxu1 %v3913_v41 }
 0x7e9   : > { %8079 = vmatprep.subr.mxu1 %v3911_v44  ;;  %v4101_v45 = vpop.permute.xlu1 %4100 }
 0x7ea   : > { %8080 = vmatpush3.msra.mxu1 %v3911_v44  ;;  %v4386_v46 = vpop.permute.xlu0 %4385 }
 0x7eb   : > { %8081 = vmatprep.subr.mxu1 %v3909_v38 }
 0x7ec   : > { %8082 = vmatpush3.msra.mxu1 %v3909_v38 }
 0x7ed   : > { %8084 = vmatmul.mubr.msk.f32.vlgmr.msra.gmra.mxu1 %vm3808_vm14, %v7327_v42  ;;  %v4008_v51 = vpop.permute.xlu1 %4007 }
 0x7ee   : > { %v4103_v47 = vpop.permute.xlu0 %4102  ;;  %8086 = vmatprep.subr.mxu1 %v4008_v51  ;;  %8092 = vmatprep.mubr.msk.f32.mxu1 %vm3808_vm14, %v7330_v50 }
 0x7ef   : > { %8095 = vmatprep.subr.mxu0 %v4103_v47  ;;  %8087 = vmatpush3.msra.mxu1 %v4008_v51 }
 0x7f0   : > { %8096 = vmatpush3.msra.mxu0 %v4103_v47  ;;  %8088 = vmatprep.subr.mxu1 %v4006_v39 }
 0x7f1   : > { %8097 = vmatprep.subr.mxu0 %v4101_v45  ;;  %v4291_v53 = vpop.permute.xlu1 %4290  ;;  %8089 = vmatpush3.msra.mxu1 %v4006_v39 }
 0x7f2   : > { %8098 = vmatpush3.msra.mxu0 %v4101_v45  ;;  %v4198_v48 = vpop.permute.xlu0 %4197  ;;  %8090 = vmatprep.subr.mxu1 %v4004_v37 }
 0x7f3   : > { %8099 = vmatprep.subr.mxu0 %v4099_v31  ;;  %8091 = vmatpush3.msra.mxu1 %v4004_v37 }
 0x7f4   : > { %8100 = vmatpush3.msra.mxu0 %v4099_v31  ;;  %8093 = vmatmul.mubr.msk.f32.vlgmr.msra.gmra.mxu1 %vm3808_vm14, %v7331_v54 }
 0x7f5   : > { %8104 = vmatprep.subr.mxu1 %v4198_v48  ;;  %v4289_v52 = vpop.permute.xlu1 %4288  ;;  %8102 = vmatmul.mubr.msk.f32.vlgmr.msra.gmra.mxu0 %vm3808_vm14, %v7335_v49  ;;  %v4690_v49 = vld [vmem:[%s10275_s16 + $0x8] sm:$0x7f] }
 0x7f6   : > { %8105 = vmatpush3.msra.mxu1 %v4198_v48  ;;  %v4293_v56 = vpop.permute.xlu0 %4292  ;;  %8110 = vmatprep.mubr.msk.f32.mxu1 %vm3808_vm14, %v7338_v59  ;;  %v4689_v59 = vld [vmem:[%s10275_s16] sm:$0xff] }
 0x7f7   : > { %8106 = vmatprep.subr.mxu1 %v4196_v43  ;;  %8113 = vmatprep.subr.mxu0 %v4293_v56 }
 0x7f8   : > { %8107 = vmatpush3.msra.mxu1 %v4196_v43  ;;  %8114 = vmatpush3.msra.mxu0 %v4293_v56 }
 0x7f9   : > { %8108 = vmatprep.subr.mxu1 %v4194_v40  ;;  %8115 = vmatprep.subr.mxu0 %v4291_v53  ;;  %v4384_v1 = vpop.permute.xlu1 %4383 }
 0x7fa   : > { %8109 = vmatpush3.msra.mxu1 %v4194_v40  ;;  %8116 = vmatpush3.msra.mxu0 %v4291_v53  ;;  %v4388_v7 = vpop.permute.xlu0 %4387 }
 0x7fb   : > { %8111 = vmatmul.mubr.msk.f32.vlgmr.msra.gmra.mxu1 %vm3808_vm14, %v7339_v61  ;;  %8117 = vmatprep.subr.mxu0 %v4289_v52 }
 0x7fc   : > { %8122 = vmatprep.subr.mxu1 %v4388_v7  ;;  %8118 = vmatpush3.msra.mxu0 %v4289_v52 }
 0x7fd   : > { %8119 = vmatprep.mubr.msk.f32.mxu0 %vm3808_vm14, %v7342_v11  ;;  %8123 = vmatpush3.msra.mxu1 %v4388_v7  ;;  %v4481_v62 = vpop.permute.xlu1 %4480 }
 0x7fe   : > { %8120 = vmatmul.mubr.msk.f32.vlgmr.msra.gmra.mxu0 %vm3808_vm14, %v7343_v57  ;;  %8124 = vmatprep.subr.mxu1 %v4386_v46  ;;  %v4483_v55 = vpop.permute.xlu0 %4482 }
 0x7ff   : > { %8125 = vmatpush3.msra.mxu1 %v4386_v46  ;;  %8131 = vmatprep.subr.mxu0 %v4483_v55 }
 0x800   : > { %8126 = vmatprep.subr.mxu1 %v4384_v1  ;;  %8128 = vmatprep.mubr.msk.f32.mxu1 %vm3808_vm14, %v7346_v3  ;;  %v4781_v3 = vld [vmem:[%s10266_s7] sm:$0xff] }
 0x801   : > { %8127 = vmatpush3.msra.mxu1 %v4384_v1  ;;  %8132 = vmatpush3.msra.mxu0 %v4483_v55  ;;  %v4479_v0 = vpop.permute.xlu1 %4478  ;;  %v7365_v55 = vld [vmem:[%s10266_s7 + $0x20] sm:$0xff] }
 0x802   : > { %8129 = vmatmul.mubr.msk.f32.vlgmr.msra.gmra.mxu1 %vm3808_vm14, %v7347_v58  ;;  %8133 = vmatprep.subr.mxu0 %v4481_v62  ;;  %v4578_v12 = vpop.permute.xlu0 %4577 }
 0x803   : > { %8134 = vmatpush3.msra.mxu0 %v4481_v62  ;;  %8140 = vmatprep.subr.mxu1 %v4578_v12 }
 0x804   : > { %8135 = vmatprep.subr.mxu0 %v4479_v0  ;;  %8137 = vmatprep.mubr.msk.f32.mxu0 %vm3808_vm14, %v7350_v5  ;;  %v4782_v5 = vld [vmem:[%s10266_s7 + $0x8] sm:$0xff] }
 0x805   : > { %8136 = vmatpush3.msra.mxu0 %v4479_v0  ;;  %8141 = vmatpush3.msra.mxu1 %v4578_v12  ;;  %v4574_v8 = vpop.permute.xlu1 %4573  ;;  %v4783_v12 = vld [vmem:[%s10266_s7 + $0x10] sm:$0xff] }
 0x806   : > { %8138 = vmatmul.mubr.msk.f32.vlgmr.msra.gmra.mxu0 %vm3808_vm14, %v7351_v10  ;;  %v4576_v15 = vpop.permute.xlu0 %4575  ;;  %8146 = vmatprep.mubr.msk.f32.mxu1 %vm3808_vm14, %v7354_v13  ;;  %v4784_v10 = vld [vmem:[%s10266_s7 + $0x18] sm:$0xff]  ;;  %v7373_v13 = vld [vmem:[%s10266_s7 + $0x40] sm:$0xff] }
 0x807   : > { %8142 = vmatprep.subr.mxu1 %v4576_v15  ;;  %8149 = vmatprep.subr.msk.mxu0 %vm4698_vm15, %v4690_v49 }
 0x808   : > { %8143 = vmatpush3.msra.mxu1 %v4576_v15  ;;  %8150 = vmatpush3.msk.msra.mxu0 %vm4698_vm15, %v4690_v49  ;;  %v4777_v15 = vld [vmem:[%s10267_s8] sm:$0xff] }
 0x809   : > { %8144 = vmatprep.subr.mxu1 %v4574_v8  ;;  %8151 = vmatprep.subr.mxu0 %v4689_v59 }
 0x80a   : > { %8145 = vmatpush3.msra.mxu1 %v4574_v8  ;;  %8152 = vmatpush3.msra.mxu0 %v4689_v59  ;;  %v4778_v8 = vld [vmem:[%s10267_s8 + $0x8] sm:$0xff]  ;;  %v7416_v59 = vld [vmem:[%s10266_s7 + $0xf8] sm:$0xff] }
 0x80b   : > { %8147 = vmatmul.mubr.msk.f32.vlgmr.msra.gmra.mxu1 %vm3808_vm14, %v7355_v14  ;;  %v4779_v14 = vld [vmem:[%s10267_s8 + $0x10] sm:$0xff] }
 0x80c   : > { %8170 = vmatprep.mubr.msk.f32.mxu1 %vm2740_vm12, %v7365_v55 }
 0x812   : > { %v3898_v19 = vpop.permute.xlu1 %3897 }
 0x813   : > { %v3893_v60 = vpop.permute.xlu0 %3892 }
 0x836   : > { %v8076_v2 = vpop.f32.mrf.mxu1 }
 0x837   : > { %v3901_v21 = vadd.f32 %v8076_v2, %v3898_v19  ;;  %v4780_v2 = vld [vmem:[%s10267_s8 + $0x18] sm:$0xff]  ;;  %v7367_v19 = vld [vmem:[%s10266_s7 + $0x30] sm:$0xff] }
 0x838   : > { %v3881_v16 = vpop.f32.mrf.mxu1 }
 0x839   : > { %v3900_v22 = vadd.f32 %v3893_v60, %v3881_v16  ;;  %v7368_v60 = vld [vmem:[%s10266_s7 + $0x38] sm:$0xff] }
 0x8ad   : > { %v8085_v17 = vpop.f32.mrf.mxu1 }
 0x8ae   : > { %v3999_v23 = vadd.f32 %v8085_v17, %v3901_v21 }
 0x8af   : > { %v3989_v4 = vpop.f32.mrf.mxu1 }
 0x8b0   : > { %v3998_v26 = vadd.f32 %v3989_v4, %v3900_v22  ;;  %v7366_v4 = vld [vmem:[%s10266_s7 + $0x28] sm:$0xff] }
 0x8b1   : > { %v7374_v22 = vld [vmem:[%s10266_s7 + $0x48] sm:$0xff] }
 0x8b4   : > { %v8094_v20 = vpop.f32.mrf.mxu1 }
 0x8b5   : > { %v8103_v63 = vpop.f32.mrf.mxu0  ;;  %v4094_v9 = vadd.f32 %v8094_v20, %v3999_v23  ;;  %v7375_v23 = vld [vmem:[%s10266_s7 + $0x50] sm:$0xff] }
 0x8b6   : > { %v4084_v6 = vpop.f32.mrf.mxu1 }
 0x8b7   : > { %v4093_v29 = vadd.f32 %v4084_v6, %v3998_v26  ;;  %v4179_v24 = vpop.f32.mrf.mxu0  ;;  %v4189_v25 = vadd.f32 %v8103_v63, %v4094_v9  ;;  %v7381_v6 = vld [vmem:[%s10266_s7 + $0x60] sm:$0xff]  ;;  %v7376_v9 = vld [vmem:[%s10266_s7 + $0x58] sm:$0xff] }
 0x8b9   : > { %v4188_v27 = vadd.f32 %v4179_v24, %v4093_v29  ;;  %v7383_v24 = vld [vmem:[%s10266_s7 + $0x70] sm:$0xff] }
 0x8bb   : > { %v8112_v28 = vpop.f32.mrf.mxu1 }
 0x8bc   : > { %v4284_v33 = vadd.f32 %v8112_v28, %v4189_v25  ;;  %v7382_v28 = vld [vmem:[%s10266_s7 + $0x68] sm:$0xff]  ;;  %v7389_v25 = vld [vmem:[%s10266_s7 + $0x80] sm:$0xff] }
 0x8bd   : > { %v4274_v18 = vpop.f32.mrf.mxu1 }
 0x8be   : > { %v8121_v30 = vpop.f32.mrf.mxu0  ;;  %v4283_v36 = vadd.f32 %v4274_v18, %v4188_v27  ;;  %v7384_v18 = vld [vmem:[%s10266_s7 + $0x78] sm:$0xff]  ;;  %v7390_v27 = vld [vmem:[%s10266_s7 + $0x88] sm:$0xff] }
 0x8bf   : > { %v4379_v37 = vadd.f32 %v8121_v30, %v4284_v33 }
 0x8c0   : > { %v4369_v32 = vpop.f32.mrf.mxu0 }
 0x8c1   : > { %v4378_v39 = vadd.f32 %v4369_v32, %v4283_v36  ;;  %v7397_v36 = vld [vmem:[%s10266_s7 + $0xa0] sm:$0xff] }
 0x8c2   : > { %v8130_v34 = vpop.f32.mrf.mxu1 }
 0x8c3   : > { %v4474_v40 = vadd.f32 %v8130_v34, %v4379_v37  ;;  %v7391_v34 = vld [vmem:[%s10266_s7 + $0x90] sm:$0xff]  ;;  %v7392_v37 = vld [vmem:[%s10266_s7 + $0x98] sm:$0xff] }
 0x8c4   : > { %v4464_v31 = vpop.f32.mrf.mxu1 }
 0x8c5   : > { %v4473_v44 = vadd.f32 %v4464_v31, %v4378_v39  ;;  %v7399_v39 = vld [vmem:[%s10266_s7 + $0xb0] sm:$0xff] }
 0x8c6   : > { %v8139_v38 = vpop.f32.mrf.mxu0 }
 0x8c7   : > { %v4569_v41 = vadd.f32 %v8139_v38, %v4474_v40  ;;  %v7398_v38 = vld [vmem:[%s10266_s7 + $0xa8] sm:$0xff]  ;;  %v7405_v40 = vld [vmem:[%s10266_s7 + $0xc0] sm:$0xff] }
 0x8c8   : > { %v4559_v43 = vpop.f32.mrf.mxu0 }
 0x8c9   : > { %v4568_v46 = vadd.f32 %v4559_v43, %v4473_v44  ;;  %v7400_v44 = vld [vmem:[%s10266_s7 + $0xb8] sm:$0xff] }
 0x8cb   : > { %v8148_v45 = vpop.f32.mrf.mxu1 }
 0x8cc   : > { %v4664_v42 = vadd.f32 %v8148_v45, %v4569_v41  ;;  %v7406_v41 = vld [vmem:[%s10266_s7 + $0xc8] sm:$0xff] }
 0x8cd   : > { %v4654_v50 = vpop.f32.mrf.mxu1 }
 0x8ce   : > { %v4666_v51 = vmul.f32 0.01, %v4664_v42  ;;  %v4663_v47 = vadd.f32 %v4654_v50, %v4568_v46  ;;  %v7407_v46 = vld [vmem:[%s10266_s7 + $0xd0] sm:$0xff] }
 0x8d0   : > { %v4668_v53 = vmax.f32 %v4664_v42, %v4666_v51  ;;  %v4665_v54 = vmul.f32 0.01, %v4663_v47  ;;  %v7413_v42 = vld [vmem:[%s10266_s7 + $0xe0] sm:$0xff]  ;;  %v7408_v51 = vld [vmem:[%s10266_s7 + $0xd8] sm:$0xff] }
 0x8d2   : > { %v4667_v48 = vmax.f32 %v4663_v47, %v4665_v54  ;;  %4673 = vrot.lane.b32.xlu1 %v4668_v53, %s8529_s2  ;;  %v7414_v47 = vld [vmem:[%s10266_s7 + $0xe8] sm:$0xff]  ;;  %v7415_v54 = vld [vmem:[%s10266_s7 + $0xf0] sm:$0xff] }
 0x8d4   : > { %4671 = vrot.lane.b32.xlu0 %v4667_v48, %s8529_s2 }
 0x944   : > { %v4674_v52 = vpop.permute.xlu1 %4673 }
 0x945   : > { %v4678_v56 = vmax.f32 %v4668_v53, %v4674_v52  ;;  %v7422_v52 = vld [vmem:[%s10266_s7 + $0x108] sm:$0xff] }
 0x946   : > { %v4672_v61 = vpop.permute.xlu0 %4671 }
 0x947   : > { %v4677_v1 = vmax.f32 %v4667_v48, %v4672_v61  ;;  %4683 = vrot.lane.b32.xlu1 %v4678_v56, %s10286_s21  ;;  %v7421_v48 = vld [vmem:[%s10266_s7 + $0x100] sm:$0xff]  ;;  %v7424_v61 = vld [vmem:[%s10266_s7 + $0x118] sm:$0xff] }
 0x949   : > { %4681 = vrot.lane.b32.xlu0 %v4677_v1, %s10286_s21 }
 0x9b9   : > { %v4684_v7 = vpop.permute.xlu1 %4683 }
 0x9ba   : > { %v4688_v62 = vmax.f32 %v4678_v56, %v4684_v7  ;;  %v7423_v56 = vld [vmem:[%s10266_s7 + $0x110] sm:$0xff] }
 0x9bb   : > { %v4682_v11 = vpop.permute.xlu0 %4681 }
 0x9bc   : > { %v4687_v57 = vmax.f32 %v4677_v1, %v4682_v11  ;;  %v5812_v1 = vld [vmem:[%s10276_s17] sm:$0x3f] }
 0x9be   : > { %8153 = vmatprep.mubr.msk.f32.mxu0 %vm4691_vm0, %v4687_v57 }
 0x9bf   : > { %8154 = vmatmul.mubr.msk.f32.vlgmr.msra.gmra.mxu0 %vm4691_vm0, %v4688_v62 }
 0x9c0   : > { %8160 = vmatprep.mubr.msk.f32.mxu0 %vm2740_vm12, %v4781_v3 }
 0xa7f   : > { %v8155_v58 = vpop.f32.mrf.mxu0 }
 0xa80   : > { %4915 = vrot.lane.b32.xlu0 %v8155_v58, %s8529_s2  ;;  %8156 = vmatprep.subr.mxu0 %v8155_v58 }
 0xa81   : > { %v4768_v0 = vpop.f32.mrf.mxu0  ;;  %8157 = vmatpush3.msra.mxu0 %v8155_v58 }
 0xa82   : > { %4913 = vrot.lane.b32.xlu1 %v4768_v0, %s8529_s2  ;;  %8158 = vmatprep.subr.mxu0 %v4768_v0 }
 0xa83   : > { %8159 = vmatpush3.msra.mxu0 %v4768_v0 }
 0xa84   : > { %5027 = vrot.lane.b32.xlu0 %v8155_v58, %s10301_s27  ;;  %8161 = vmatmul.mubr.msk.f32.vlgmr.msra.gmra.mxu0 %vm2740_vm12, %v4782_v5 }
 0xa85   : > { %8163 = vmatprep.mubr.msk.f32.mxu0 %vm2740_vm12, %v4783_v12 }
 0xa86   : > { %5025 = vrot.lane.b32.xlu1 %v4768_v0, %s10301_s27 }
 0xa88   : > { %5139 = vrot.lane.b32.xlu0 %v8155_v58, %s8549_s12  ;;  %8164 = vmatmul.mubr.msk.f32.gmra.mxu0 %vm2740_vm12, %v4784_v10 }
 0xa89   : > { %8180 = vmatprep.mubr.msk.f32.mxu0 %vm2740_vm12, %v7373_v13 }
 0xa8a   : > { %5137 = vrot.lane.b32.xlu1 %v4768_v0, %s8549_s12 }
 0xa8c   : > { %5251 = vrot.lane.b32.xlu0 %v8155_v58, %s10290_s1 }
 0xa8e   : > { %5249 = vrot.lane.b32.xlu1 %v4768_v0, %s10290_s1 }
 0xa90   : > { %5363 = vrot.lane.b32.xlu0 %v8155_v58, %s10286_s21 }
 0xa92   : > { %5361 = vrot.lane.b32.xlu1 %v4768_v0, %s10286_s21 }
 0xa94   : > { %5475 = vrot.lane.b32.xlu0 %v8155_v58, %s10288_s26 }
 0xa96   : > { %5473 = vrot.lane.b32.xlu1 %v4768_v0, %s10288_s26 }
 0xa98   : > { %5587 = vrot.lane.b32.xlu0 %v8155_v58, %s10292_s28 }
 0xa9a   : > { %5585 = vrot.lane.b32.xlu1 %v4768_v0, %s10292_s28  ;;  %s10305_s28 = smov 122  }
 0xa9c   : > { %5699 = vrot.lane.b32.xlu0 %v8155_v58, %s8539_s23 }
 0xa9e   : > { %5697 = vrot.lane.b32.xlu1 %v4768_v0, %s8539_s23 }
 0xaa0   : > { %4884 = vperm.xlu0 %8497, %v4777_v15  }
 0xaa2   : > { %4889 = vperm.xlu1 %8498, %v4778_v8  }
 0xaa4   : > { %4894 = vperm.xlu0 %8497, %v4779_v14  }
 0xaa6   : > { %4899 = vperm.xlu1 %8498, %v4780_v2  }
 0xaf2   : > { %v4916_v16 = vpop.permute.xlu0 %4915 }
 0xaf3   : > { %8166 = vmatprep.subr.mxu1 %v4916_v16 }
 0xaf4   : > { %8167 = vmatpush3.msra.mxu1 %v4916_v16  ;;  %v4914_v17 = vpop.permute.xlu1 %4913 }
 0xaf5   : > { %8168 = vmatprep.subr.mxu1 %v4914_v17 }
 0xaf6   : > { %v5028_v20 = vpop.permute.xlu0 %5027  ;;  %8169 = vmatpush3.msra.mxu1 %v4914_v17 }
 0xaf7   : > { %8171 = vmatmul.mubr.msk.f32.vlgmr.msra.gmra.mxu1 %vm2740_vm12, %v7366_v4  ;;  %8176 = vmatprep.subr.mxu0 %v5028_v20 }
 0xaf8   : > { %v5026_v21 = vpop.permute.xlu1 %5025  ;;  %8177 = vmatpush3.msra.mxu0 %v5028_v20  ;;  %8173 = vmatprep.mubr.msk.f32.mxu1 %vm2740_vm12, %v7367_v19 }
 0xaf9   : > { %8178 = vmatprep.subr.mxu0 %v5026_v21 }
 0xafa   : > { %v5140_v63 = vpop.permute.xlu0 %5139  ;;  %8179 = vmatpush3.msra.mxu0 %v5026_v21 }
 0xafb   : > { %8174 = vmatmul.mubr.msk.f32.gmra.mxu1 %vm2740_vm12, %v7368_v60  ;;  %8181 = vmatmul.mubr.msk.f32.vlgmr.msra.gmra.mxu0 %vm2740_vm12, %v7374_v22 }
 0xafc   : > { %8186 = vmatprep.subr.mxu1 %v5140_v63  ;;  %v5138_v26 = vpop.permute.xlu1 %5137  ;;  %8183 = vmatprep.mubr.msk.f32.mxu0 %vm2740_vm12, %v7375_v23 }
 0xafd   : > { %8187 = vmatpush3.msra.mxu1 %v5140_v63  ;;  %8190 = vmatprep.mubr.msk.f32.mxu1 %vm2740_vm12, %v7381_v6 }
 0xafe   : > { %8188 = vmatprep.subr.mxu1 %v5138_v26  ;;  %v5252_v29 = vpop.permute.xlu0 %5251 }
 0xaff   : > { %8189 = vmatpush3.msra.mxu1 %v5138_v26  ;;  %8184 = vmatmul.mubr.msk.f32.gmra.mxu0 %vm2740_vm12, %v7376_v9 }
 0xb00   : > { %8191 = vmatmul.mubr.msk.f32.vlgmr.msra.gmra.mxu1 %vm2740_vm12, %v7382_v28  ;;  %8196 = vmatprep.subr.mxu0 %v5252_v29  ;;  %v5250_v30 = vpop.permute.xlu1 %5249 }
 0xb01   : > { %8197 = vmatpush3.msra.mxu0 %v5252_v29  ;;  %8193 = vmatprep.mubr.msk.f32.mxu1 %vm2740_vm12, %v7383_v24 }
 0xb02   : > { %8198 = vmatprep.subr.mxu0 %v5250_v30  ;;  %v5364_v33 = vpop.permute.xlu0 %5363  ;;  %8200 = vmatprep.mubr.msk.f32.mxu0 %vm2740_vm12, %v7389_v25 }
 0xb03   : > { %8199 = vmatpush3.msra.mxu0 %v5250_v30  ;;  %8206 = vmatprep.subr.mxu1 %v5364_v33 }
 0xb04   : > { %8194 = vmatmul.mubr.msk.f32.gmra.mxu1 %vm2740_vm12, %v7384_v18  ;;  %8201 = vmatmul.mubr.msk.f32.vlgmr.msra.gmra.mxu0 %vm2740_vm12, %v7390_v27  ;;  %v5362_v32 = vpop.permute.xlu1 %5361 }
 0xb05   : > { %8207 = vmatpush3.msra.mxu1 %v5364_v33  ;;  %8203 = vmatprep.mubr.msk.f32.mxu0 %vm2740_vm12, %v7391_v34 }
 0xb06   : > { %8208 = vmatprep.subr.mxu1 %v5362_v32  ;;  %v5476_v31 = vpop.permute.xlu0 %5475  ;;  %8210 = vmatprep.mubr.msk.f32.mxu1 %vm2740_vm12, %v7397_v36 }
 0xb07   : > { %8209 = vmatpush3.msra.mxu1 %v5362_v32  ;;  %8216 = vmatprep.subr.mxu0 %v5476_v31 }
 0xb08   : > { %8204 = vmatmul.mubr.msk.f32.gmra.mxu0 %vm2740_vm12, %v7392_v37  ;;  %8211 = vmatmul.mubr.msk.f32.vlgmr.msra.gmra.mxu1 %vm2740_vm12, %v7398_v38  ;;  %v5474_v43 = vpop.permute.xlu1 %5473 }
 0xb09   : > { %8217 = vmatpush3.msra.mxu0 %v5476_v31  ;;  %8213 = vmatprep.mubr.msk.f32.mxu1 %vm2740_vm12, %v7399_v39 }
 0xb0a   : > { %8218 = vmatprep.subr.mxu0 %v5474_v43  ;;  %v5588_v45 = vpop.permute.xlu0 %5587  ;;  %8220 = vmatprep.mubr.msk.f32.mxu0 %vm2740_vm12, %v7405_v40 }
 0xb0b   : > { %8219 = vmatpush3.msra.mxu0 %v5474_v43  ;;  %8226 = vmatprep.subr.mxu1 %v5588_v45 }
 0xb0c   : > { %8214 = vmatmul.mubr.msk.f32.gmra.mxu1 %vm2740_vm12, %v7400_v44  ;;  %8221 = vmatmul.mubr.msk.f32.vlgmr.msra.gmra.mxu0 %vm2740_vm12, %v7406_v41  ;;  %v5586_v50 = vpop.permute.xlu1 %5585 }
 0xb0d   : > { %8227 = vmatpush3.msra.mxu1 %v5588_v45  ;;  %8223 = vmatprep.mubr.msk.f32.mxu0 %vm2740_vm12, %v7407_v46 }
 0xb0e   : > { %8228 = vmatprep.subr.mxu1 %v5586_v50  ;;  %v5700_v53 = vpop.permute.xlu0 %5699  ;;  %8230 = vmatprep.mubr.msk.f32.mxu1 %vm2740_vm12, %v7413_v42 }
 0xb0f   : > { %8229 = vmatpush3.msra.mxu1 %v5586_v50  ;;  %8236 = vmatprep.subr.mxu0 %v5700_v53 }
 0xb10   : > { %8224 = vmatmul.mubr.msk.f32.gmra.mxu0 %vm2740_vm12, %v7408_v51  ;;  %8231 = vmatmul.mubr.msk.f32.vlgmr.msra.gmra.mxu1 %vm2740_vm12, %v7414_v47  ;;  %v5698_v49 = vpop.permute.xlu1 %5697 }
 0xb11   : > { %8237 = vmatpush3.msra.mxu0 %v5700_v53  ;;  %8233 = vmatprep.mubr.msk.f32.mxu1 %vm2740_vm12, %v7415_v54 }
 0xb12   : > { %8238 = vmatprep.subr.mxu0 %v5698_v49  ;;  %8240 = vmatprep.mubr.msk.f32.mxu0 %vm2740_vm12, %v7421_v48 }
 0xb13   : > { %8239 = vmatpush3.msra.mxu0 %v5698_v49  ;;  %8246 = vmatprep.subr.msk.mxu1 %vm5826_vm1, %v5812_v1 }
 0xb14   : > { %8234 = vmatmul.mubr.msk.f32.gmra.mxu1 %vm2740_vm12, %v7416_v59  ;;  %8241 = vmatmul.mubr.msk.f32.vlgmr.msra.gmra.mxu0 %vm2740_vm12, %v7422_v52 }
 0xb15   : > { %8243 = vmatprep.mubr.msk.f32.mxu0 %vm2740_vm12, %v7423_v56  ;;  %8254 = vmatprep.subr.mxu0 %v8528_v35 }
 0xb16   : > { %8247 = vmatpush3.msk.msra.mxu1 %vm5826_vm1, %v5812_v1 }
 0xb17   : > { %8277 = vmatprep.subr.mxu1 %v8528_v35 }
 0xb18   : > { %8244 = vmatmul.mubr.msk.f32.gmra.mxu0 %vm2740_vm12, %v7424_v61 }
 0xb19   : > { %8262 = vmatprep.mubr.msk.f32.mxu0 %vm8538_vm11, %v8528_v35 }
 0xb1b   : > { %v4885_v2 = vpop.permute.xlu0 %4884 }
 0xb1d   : > { %v4890_v15 = vpop.permute.xlu1 %4889 }
 0xb1f   : > { %v4895_v6 = vpop.permute.xlu0 %4894 }
 0xb21   : > { %v4900_v21 = vpop.permute.xlu1 %4899 }
 0xb44   : > { %v8162_v7 = vpop.f32.mrf.mxu0 }
 0xb45   : > { %v4903_v4 = vadd.f32 %v8162_v7, %v4890_v15 }
 0xb46   : > { %v4863_v11 = vpop.f32.mrf.mxu0 }
 0xb47   : > { %v4902_v60 = vadd.f32 %v4885_v2, %v4863_v11 }
 0xb48   : > { %v8165_v57 = vpop.f32.mrf.mxu0 }
 0xb49   : > { %v4905_v26 = vadd.f32 %v8165_v57, %v4900_v21 }
 0xb4a   : > { %v4873_v3 = vpop.f32.mrf.mxu0 }
 0xb4b   : > { %v4904_v25 = vadd.f32 %v4895_v6, %v4873_v3  ;;  %v5921_v6 = vld [vmem:[%s10268_s9 + $0x8] sm:$0xff] }
 0xbb7   : > { %v8172_v62 = vpop.f32.mrf.mxu1 }
 0xbb8   : > { %v5017_v22 = vadd.f32 %v8172_v62, %v4903_v4 }
 0xbb9   : > { %v4997_v55 = vpop.f32.mrf.mxu1 }
 0xbba   : > { %v5016_v9 = vadd.f32 %v4997_v55, %v4902_v60 }
 0xbbb   : > { %v8175_v58 = vpop.f32.mrf.mxu1  ;;  %v8182_v0 = vpop.f32.mrf.mxu0 }
 0xbbc   : > { %v5129_v28 = vadd.f32 %v8182_v0, %v5017_v22  ;;  %v5019_v30 = vadd.f32 %v8175_v58, %v4905_v26  ;;  %v5922_v26 = vld [vmem:[%s10268_s9 + $0x10] sm:$0xff] }
 0xbbd   : > { %v5007_v5 = vpop.f32.mrf.mxu1  ;;  %v5109_v12 = vpop.f32.mrf.mxu0 }
 0xbbe   : > { %v5128_v18 = vadd.f32 %v5109_v12, %v5016_v9  ;;  %v5018_v36 = vadd.f32 %v5007_v5, %v4904_v25  ;;  %v5923_v9 = vld [vmem:[%s10268_s9 + $0x18] sm:$0xff] }
 0xbbf   : > { %v8185_v10 = vpop.f32.mrf.mxu0  ;;  %v5918_v25 = vld [vmem:[%s10269_s10 + $0x18] sm:$0xff] }
 0xbc0   : > { %v8192_v13 = vpop.f32.mrf.mxu1  ;;  %v5131_v32 = vadd.f32 %v8185_v10, %v5019_v30  ;;  %v5917_v30 = vld [vmem:[%s10269_s10 + $0x10] sm:$0xff] }
 0xbc1   : > { %v5119_v8 = vpop.f32.mrf.mxu0  ;;  %v5241_v27 = vadd.f32 %v8192_v13, %v5129_v28  ;;  %v5924_v28 = vld [vmem:[%s10268_s9 + $0x20] sm:$0xff] }
 0xbc2   : > { %v5221_v14 = vpop.f32.mrf.mxu1  ;;  %v5130_v40 = vadd.f32 %v5119_v8, %v5018_v36 }
 0xbc3   : > { %v5240_v37 = vadd.f32 %v5221_v14, %v5128_v18  ;;  %v5919_v18 = vld [vmem:[%s10269_s10 + $0x20] sm:$0xff] }
 0xbc4   : > { %v8195_v16 = vpop.f32.mrf.mxu1  ;;  %v8202_v17 = vpop.f32.mrf.mxu0 }
 0xbc5   : > { %v5353_v38 = vadd.f32 %v8202_v17, %v5241_v27  ;;  %v5243_v43 = vadd.f32 %v8195_v16, %v5131_v32  ;;  %v7439_v32 = vld [vmem:[%s10268_s9 + $0x28] sm:$0xff] }
 0xbc6   : > { %v5231_v19 = vpop.f32.mrf.mxu1  ;;  %v5333_v20 = vpop.f32.mrf.mxu0 }
 0xbc7   : > { %v5352_v44 = vadd.f32 %v5333_v20, %v5240_v37  ;;  %v5242_v42 = vadd.f32 %v5231_v19, %v5130_v40 }
 0xbc8   : > { %v8205_v23 = vpop.f32.mrf.mxu0  ;;  %v8212_v63 = vpop.f32.mrf.mxu1 }
 0xbc9   : > { %v5465_v41 = vadd.f32 %v8212_v63, %v5353_v38  ;;  %v5355_v50 = vadd.f32 %v8205_v23, %v5243_v43  ;;  %v5920_v63 = vld [vmem:[%s10268_s9] sm:$0xff]  ;;  %v7441_v43 = vld [vmem:[%s10268_s9 + $0x38] sm:$0xff] }
 0xbca   : > { %v5343_v29 = vpop.f32.mrf.mxu0  ;;  %v5445_v24 = vpop.f32.mrf.mxu1 }
 0xbcb   : > { %v5464_v51 = vadd.f32 %v5445_v24, %v5352_v44  ;;  %v5354_v48 = vadd.f32 %v5343_v29, %v5242_v42  ;;  %v5916_v29 = vld [vmem:[%s10269_s10 + $0x8] sm:$0xff]  ;;  %v5915_v24 = vld [vmem:[%s10269_s10] sm:$0xff]  ;;  %v7449_v44 = vld [vmem:[%s10268_s9 + $0x50] sm:$0xff] }
 0xbcc   : > { %v8215_v33 = vpop.f32.mrf.mxu1  ;;  %v8222_v34 = vpop.f32.mrf.mxu0  ;;  %v7450_v42 = vld [vmem:[%s10268_s9 + $0x58] sm:$0xff] }
 0xbcd   : > { %v5577_v47 = vadd.f32 %v8222_v34, %v5465_v41  ;;  %v5467_v49 = vadd.f32 %v8215_v33, %v5355_v50 }
 0xbce   : > { %v5455_v31 = vpop.f32.mrf.mxu1  ;;  %v5557_v39 = vpop.f32.mrf.mxu0 }
 0xbcf   : > { %v5576_v59 = vadd.f32 %v5557_v39, %v5464_v51  ;;  %v5466_v1 = vadd.f32 %v5455_v31, %v5354_v48  ;;  %v7440_v31 = vld [vmem:[%s10268_s9 + $0x30] sm:$0xff] }
 0xbd0   : > { %v8225_v45 = vpop.f32.mrf.mxu0  ;;  %v8232_v46 = vpop.f32.mrf.mxu1 }
 0xbd1   : > { %v5689_v52 = vadd.f32 %v8232_v46, %v5577_v47  ;;  %v5579_v7 = vadd.f32 %v8225_v45, %v5467_v49  ;;  %v7442_v46 = vld [vmem:[%s10268_s9 + $0x40] sm:$0xff]  ;;  %v7452_v49 = vld [vmem:[%s10268_s9 + $0x68] sm:$0xff] }
 0xbd2   : > { %v5567_v53 = vpop.f32.mrf.mxu0  ;;  %v5669_v54 = vpop.f32.mrf.mxu1  ;;  %v7451_v47 = vld [vmem:[%s10268_s9 + $0x60] sm:$0xff] }
 0xbd3   : > { %v5688_v11 = vadd.f32 %v5669_v54, %v5576_v59  ;;  %v5578_v55 = vadd.f32 %v5567_v53, %v5466_v1  ;;  %v7443_v54 = vld [vmem:[%s10268_s9 + $0x48] sm:$0xff] }
 0xbd4   : > { %v8235_v56 = vpop.f32.mrf.mxu1  ;;  %v8242_v61 = vpop.f32.mrf.mxu0 }
 0xbd5   : > { %v5801_v57 = vadd.f32 %v8242_v61, %v5689_v52  ;;  %v5691_v58 = vadd.f32 %v8235_v56, %v5579_v7  ;;  %v7459_v52 = vld [vmem:[%s10268_s9 + $0x78] sm:$0xff]  ;;  %v7453_v61 = vld [vmem:[%s10268_s9 + $0x70] sm:$0xff]  ;;  %v7460_v7 = vld [vmem:[%s10268_s9 + $0x80] sm:$0xff] }
 0xbd6   : > { %v5679_v62 = vpop.f32.mrf.mxu1  ;;  %v5781_v3 = vpop.f32.mrf.mxu0 }
 0xbd7   : > { %v5800_v0 = vadd.f32 %v5781_v3, %v5688_v11  ;;  %v5805_v5 = vmul.f32 0.01, %v5801_v57  ;;  %v5690_v10 = vadd.f32 %v5679_v62, %v5578_v55  ;;  %v7461_v3 = vld [vmem:[%s10268_s9 + $0x88] sm:$0xff] }
 0xbd8   : > { %v8245_v12 = vpop.f32.mrf.mxu0 }
 0xbd9   : > { %v5804_v13 = vmul.f32 0.01, %v5800_v0  ;;  %v5803_v15 = vadd.f32 %v8245_v12, %v5691_v58  ;;  %v5809_v16 = vmax.f32 %v5801_v57, %v5805_v5  ;;  %v7469_v57 = vld [vmem:[%s10268_s9 + $0xa0] sm:$0xff]  ;;  %v7470_v5 = vld [vmem:[%s10268_s9 + $0xa8] sm:$0xff] }
 0xbda   : > { %v5791_v8 = vpop.f32.mrf.mxu0 }
 0xbdb   : > { %v5808_v14 = vmax.f32 %v5800_v0, %v5804_v13  ;;  %v5802_v2 = vadd.f32 %v5791_v8, %v5690_v10  ;;  %v5807_v17 = vmul.f32 0.01, %v5803_v15  ;;  %v7462_v0 = vld [vmem:[%s10268_s9 + $0x90] sm:$0xff]  ;;  %v7463_v13 = vld [vmem:[%s10268_s9 + $0x98] sm:$0xff] }
 0xbdd   : > { %v5806_v4 = vmul.f32 0.01, %v5802_v2  ;;  %8248 = vmatprep.mubr.msk.f32.mxu1 %vm5813_vm2, %v5808_v14  ;;  %v5811_v20 = vmax.f32 %v5803_v15, %v5807_v17  ;;  %v7471_v15 = vld [vmem:[%s10268_s9 + $0xb0] sm:$0xff] }
 0xbde   : > { %8249 = vmatmul.mubr.msk.f32.vlgmr.msra.gmra.mxu1 %vm5813_vm2, %v5809_v16  ;;  %v7479_v16 = vld [vmem:[%s10268_s9 + $0xc8] sm:$0xff] }
 0xbdf   : > { %v5810_v19 = vmax.f32 %v5802_v2, %v5806_v4  ;;  %v7472_v2 = vld [vmem:[%s10268_s9 + $0xb8] sm:$0xff] }
 0xbe1   : > { %8251 = vmatprep.mubr.msk.f32.mxu1 %vm5813_vm2, %v5810_v19  ;;  %v7473_v19 = vld [vmem:[%s10268_s9 + $0xc0] sm:$0xff] }
 0xbe2   : > { %8252 = vmatmul.mubr.msk.f32.gmra.mxu1 %vm5813_vm2, %v5811_v20  ;;  %v7480_v20 = vld [vmem:[%s10268_s9 + $0xd0] sm:$0xff] }
 0xbe3   : > { %8285 = vmatprep.mubr.msk.f32.mxu1 %vm8538_vm11, %v8528_v35 }
 0xc9e   : > { %v8250_v21 = vpop.f32.mrf.mxu1 }
 0xc9f   : > { %6073 = vrot.lane.b32.xlu1 %v8250_v21, %s8529_s2 }
 0xca0   : > { %v5896_v60 = vpop.f32.mrf.mxu1 }
 0xca2   : > { %v8253_v22 = vpop.f32.mrf.mxu1 }
 0xca3   : > { %6077 = vrot.lane.b32.xlu0 %v8253_v22, %s8529_s2  ;;  %8255 = vmatpush3.msra.mxu0 %v8253_v22 }
 0xca4   : > { %v5906_v23 = vpop.f32.mrf.mxu1  ;;  %8256 = vmatprep.subr.mxu0 %v8528_v35 }
 0xca5   : > { %6075 = vrot.lane.b32.xlu1 %v5906_v23, %s8529_s2  ;;  %8257 = vmatpush3.msra.mxu0 %v5906_v23 }
 0xca6   : > { %8258 = vmatprep.subr.mxu0 %v8528_v35 }
 0xca7   : > { %6205 = vrot.lane.b32.xlu0 %v8253_v22, %s10301_s27  ;;  %8259 = vmatpush3.msra.mxu0 %v8250_v21 }
 0xca8   : > { %8260 = vmatprep.subr.mxu0 %v8528_v35 }
 0xca9   : > { %6071 = vrot.lane.b32.xlu1 %v5896_v60, %s8529_s2  ;;  %8261 = vmatpush3.msra.mxu0 %v5896_v60 }
 0xcaa   : > { %8263 = vmatmul.mubr.msk.f32.vlgmr.msra.gmra.mxu0 %vm5925_vm3, %v5920_v63  ;;  %8300 = vmatprep.subr.mxu0 %v8528_v35 }
 0xcab   : > { %6203 = vrot.lane.b32.xlu0 %v5906_v23, %s10301_s27  ;;  %8265 = vmatprep.mubr.msk.f32.mxu0 %vm8538_vm11, %v8528_v35 }
 0xcad   : > { %6199 = vrot.lane.b32.xlu1 %v5896_v60, %s10301_s27 }
 0xcae   : > { %8266 = vmatmul.mubr.msk.f32.gmra.mxu0 %vm5925_vm3, %v5921_v6  ;;  %v7490_v6 = vld [vmem:[%s10268_s9 + $0xf8] sm:$0xff] }
 0xcaf   : > { %6201 = vrot.lane.b32.xlu0 %v8250_v21, %s10301_s27  ;;  %8268 = vmatprep.mubr.msk.f32.mxu0 %vm8538_vm11, %v8528_v35  ;;  %s10304_s27 = smov 123  }
 0xcb1   : > { %6329 = vrot.lane.b32.xlu1 %v8250_v21, %s8549_s12 }
 0xcb2   : > { %8269 = vmatmul.mubr.msk.f32.gmra.mxu0 %vm5925_vm3, %v5922_v26  ;;  %v7482_v26 = vld [vmem:[%s10268_s9 + $0xe0] sm:$0xff] }
 0xcb3   : > { %6333 = vrot.lane.b32.xlu0 %v8253_v22, %s8549_s12  ;;  %8271 = vmatprep.mubr.msk.f32.mxu0 %vm8538_vm11, %v8528_v35 }
 0xcb5   : > { %6331 = vrot.lane.b32.xlu1 %v5906_v23, %s8549_s12 }
 0xcb6   : > { %8272 = vmatmul.mubr.msk.f32.gmra.mxu0 %vm5925_vm3, %v5923_v9 }
 0xcb7   : > { %6461 = vrot.lane.b32.xlu0 %v8253_v22, %s10304_s27  ;;  %8274 = vmatprep.mubr.msk.f32.mxu0 %vm8538_vm11, %v8528_v35 }
 0xcb9   : > { %6327 = vrot.lane.b32.xlu1 %v5896_v60, %s8549_s12  ;;  %s10307_s12 = smov 119  }
 0xcba   : > { %8275 = vmatmul.mubr.msk.f32.gmra.mxu0 %vm5925_vm3, %v5924_v28  ;;  %v7491_v28 = vld [vmem:[%s10268_s9 + $0x100] sm:$0xff] }
 0xcbb   : > { %6459 = vrot.lane.b32.xlu0 %v5906_v23, %s10304_s27  ;;  %8308 = vmatprep.mubr.msk.f32.mxu0 %vm8538_vm11, %v8528_v35 }
 0xcbd   : > { %6455 = vrot.lane.b32.xlu1 %v5896_v60, %s10304_s27 }
 0xcbf   : > { %6457 = vrot.lane.b32.xlu0 %v8250_v21, %s10304_s27 }
 0xcc1   : > { %6585 = vrot.lane.b32.xlu1 %v8250_v21, %s10305_s28 }
 0xcc3   : > { %6589 = vrot.lane.b32.xlu0 %v8253_v22, %s10305_s28 }
 0xcc5   : > { %6587 = vrot.lane.b32.xlu1 %v5906_v23, %s10305_s28 }
 0xcc7   : > { %6717 = vrot.lane.b32.xlu0 %v8253_v22, %s10306_s24 }
 0xcc9   : > { %6583 = vrot.lane.b32.xlu1 %v5896_v60, %s10305_s28  ;;  %s573_s28 = scalar_lea.vmem %s10277_s18, %s10309_s30 }
 0xccb   : > { %6715 = vrot.lane.b32.xlu0 %v5906_v23, %s10306_s24 }
 0xccd   : > { %6711 = vrot.lane.b32.xlu1 %v5896_v60, %s10306_s24 }
 0xccf   : > { %6713 = vrot.lane.b32.xlu0 %v8250_v21, %s10306_s24 }
 0xcd1   : > { %6841 = vrot.lane.b32.xlu1 %v8250_v21, %s10307_s12 }
 0xcd3   : > { %6845 = vrot.lane.b32.xlu0 %v8253_v22, %s10307_s12 }
 0xcd5   : > { %6843 = vrot.lane.b32.xlu1 %v5906_v23, %s10307_s12 }
 0xcd7   : > { %6973 = vrot.lane.b32.xlu0 %v8253_v22, %s8539_s23  ;;  %v7489_v22 = vld [vmem:[%s10268_s9 + $0xf0] sm:$0xff] }
 0xcd9   : > { %6839 = vrot.lane.b32.xlu1 %v5896_v60, %s10307_s12 }
 0xcdb   : > { %6971 = vrot.lane.b32.xlu0 %v5906_v23, %s8539_s23  ;;  %v7481_v23 = vld [vmem:[%s10268_s9 + $0xd8] sm:$0xff] }
 0xcdd   : > { %6967 = vrot.lane.b32.xlu1 %v5896_v60, %s8539_s23 }
 0xcdf   : > { %6969 = vrot.lane.b32.xlu0 %v8250_v21, %s8539_s23 }
 0xce1   : > { %6038 = vperm.xlu1 %8498, %v5916_v29  }
 0xce3   : > { %6033 = vperm.xlu0 %8497, %v5915_v24   ;;  %v7483_v24 = vld [vmem:[%s10268_s9 + $0xe8] sm:$0xff] }
 0xce5   : > { %6048 = vperm.xlu1 %8498, %v5918_v25   ;;  %v7492_v25 = vld [vmem:[%s10268_s9 + $0x108] sm:$0xff] }
 0xce7   : > { %6043 = vperm.xlu0 %8497, %v5917_v30   ;;  %v7499_v30 = vld [vmem:[%s10268_s9 + $0x118] sm:$0xff] }
 0xceb   : > { %6053 = vperm.xlu0 %8497, %v5919_v18   ;;  %v7493_v18 = vld [vmem:[%s10268_s9 + $0x110] sm:$0xff] }
 0xd11   : > { %v6074_v27 = vpop.permute.xlu1 %6073 }
 0xd15   : > { %v6078_v33 = vpop.permute.xlu0 %6077 }
 0xd16   : > { %8278 = vmatpush3.msra.mxu1 %v6078_v33  ;;  %v7509_v33 = vld [vmem:[%s10268_s9 + $0x140] sm:$0xff] }
 0xd17   : > { %8279 = vmatprep.subr.mxu1 %v8528_v35  ;;  %v6076_v34 = vpop.permute.xlu1 %6075 }
 0xd18   : > { %8280 = vmatpush3.msra.mxu1 %v6076_v34  ;;  %v7501_v34 = vld [vmem:[%s10268_s9 + $0x128] sm:$0xff] }
 0xd19   : > { %v6206_v36 = vpop.permute.xlu0 %6205  ;;  %8281 = vmatprep.subr.mxu1 %v8528_v35 }
 0xd1a   : > { %8282 = vmatpush3.msra.mxu1 %v6074_v27  ;;  %8301 = vmatpush3.msra.mxu0 %v6206_v36  ;;  %v7500_v27 = vld [vmem:[%s10268_s9 + $0x120] sm:$0xff]  ;;  %v7510_v36 = vld [vmem:[%s10268_s9 + $0x148] sm:$0xff] }
 0xd1b   : > { %8283 = vmatprep.subr.mxu1 %v8528_v35  ;;  %v6072_v37 = vpop.permute.xlu1 %6071  ;;  %8302 = vmatprep.subr.mxu0 %v8528_v35 }
 0xd1c   : > { %8284 = vmatpush3.msra.mxu1 %v6072_v37  ;;  %v7511_v37 = vld [vmem:[%s10268_s9 + $0x150] sm:$0xff] }
 0xd1d   : > { %v6204_v38 = vpop.permute.xlu0 %6203  ;;  %8286 = vmatmul.mubr.msk.f32.vlgmr.msra.gmra.mxu1 %vm5925_vm3, %v7439_v32  ;;  %8323 = vmatprep.subr.mxu1 %v8528_v35  ;;  %v7502_v32 = vld [vmem:[%s10268_s9 + $0x130] sm:$0xff] }
 0xd1e   : > { %8303 = vmatpush3.msra.mxu0 %v6204_v38  ;;  %8288 = vmatprep.mubr.msk.f32.mxu1 %vm8538_vm11, %v8528_v35  ;;  %v7503_v38 = vld [vmem:[%s10268_s9 + $0x138] sm:$0xff] }
 0xd1f   : > { %v6200_v39 = vpop.permute.xlu1 %6199  ;;  %8304 = vmatprep.subr.mxu0 %v8528_v35 }
 0xd21   : > { %v6202_v40 = vpop.permute.xlu0 %6201  ;;  %8289 = vmatmul.mubr.msk.f32.gmra.mxu1 %vm5925_vm3, %v7440_v31 }
 0xd22   : > { %8305 = vmatpush3.msra.mxu0 %v6202_v40  ;;  %8291 = vmatprep.mubr.msk.f32.mxu1 %vm8538_vm11, %v8528_v35 }
 0xd23   : > { %v6330_v41 = vpop.permute.xlu1 %6329  ;;  %8306 = vmatprep.subr.mxu0 %v8528_v35 }
 0xd24   : > { %8307 = vmatpush3.msra.mxu0 %v6200_v39  ;;  %v7512_v39 = vld [vmem:[%s10268_s9 + $0x158] sm:$0xff] }
 0xd25   : > { %v6334_v45 = vpop.permute.xlu0 %6333  ;;  %8292 = vmatmul.mubr.msk.f32.gmra.mxu1 %vm5925_vm3, %v7441_v43  ;;  %8309 = vmatmul.mubr.msk.f32.vlgmr.msra.gmra.mxu0 %vm5925_vm3, %v7449_v44  ;;  %v7513_v44 = vld [vmem:[%s10268_s9 + $0x160] sm:$0xff] }
 0xd26   : > { %8324 = vmatpush3.msra.mxu1 %v6334_v45  ;;  %8294 = vmatprep.mubr.msk.f32.mxu1 %vm8538_vm11, %v8528_v35 }
 0xd27   : > { %8325 = vmatprep.subr.mxu1 %v8528_v35  ;;  %v6332_v50 = vpop.permute.xlu1 %6331  ;;  %8311 = vmatprep.mubr.msk.f32.mxu0 %vm8538_vm11, %v8528_v35 }
 0xd28   : > { %8326 = vmatpush3.msra.mxu1 %v6332_v50  ;;  %8346 = vmatprep.subr.mxu0 %v8528_v35 }
 0xd29   : > { %v6462_v51 = vpop.permute.xlu0 %6461  ;;  %8295 = vmatmul.mubr.msk.f32.gmra.mxu1 %vm5925_vm3, %v7442_v46  ;;  %8312 = vmatmul.mubr.msk.f32.gmra.mxu0 %vm5925_vm3, %v7450_v42 }
 0xd2a   : > { %8327 = vmatprep.subr.mxu1 %v8528_v35  ;;  %8347 = vmatpush3.msra.mxu0 %v6462_v51 }
 0xd2b   : > { %8328 = vmatpush3.msra.mxu1 %v6330_v41  ;;  %v6328_v53 = vpop.permute.xlu1 %6327  ;;  %8297 = vmatprep.mubr.msk.f32.mxu1 %vm8538_vm11, %v8528_v35 }
 0xd2c   : > { %8329 = vmatprep.subr.mxu1 %v8528_v35  ;;  %8314 = vmatprep.mubr.msk.f32.mxu0 %vm8538_vm11, %v8528_v35 }
 0xd2d   : > { %8330 = vmatpush3.msra.mxu1 %v6328_v53  ;;  %v6460_v48 = vpop.permute.xlu0 %6459  ;;  %8315 = vmatmul.mubr.msk.f32.gmra.mxu0 %vm5925_vm3, %v7451_v47 }
 0xd2e   : > { %8298 = vmatmul.mubr.msk.f32.gmra.mxu1 %vm5925_vm3, %v7443_v54  ;;  %8348 = vmatprep.subr.mxu0 %v8528_v35 }
 0xd2f   : > { %8349 = vmatpush3.msra.mxu0 %v6460_v48  ;;  %v6456_v59 = vpop.permute.xlu1 %6455  ;;  %8317 = vmatprep.mubr.msk.f32.mxu0 %vm8538_vm11, %v8528_v35 }
 0xd30   : > { %8331 = vmatprep.mubr.msk.f32.mxu1 %vm8538_vm11, %v8528_v35  ;;  %8350 = vmatprep.subr.mxu0 %v8528_v35 }
 0xd31   : > { %v6458_v56 = vpop.permute.xlu0 %6457  ;;  %8318 = vmatmul.mubr.msk.f32.gmra.mxu0 %vm5925_vm3, %v7452_v49  ;;  %8369 = vmatprep.subr.mxu1 %v8528_v35 }
 0xd32   : > { %8332 = vmatmul.mubr.msk.f32.vlgmr.msra.gmra.mxu1 %vm5925_vm3, %v7459_v52  ;;  %8351 = vmatpush3.msra.mxu0 %v6458_v56 }
 0xd33   : > { %v6586_v1 = vpop.permute.xlu1 %6585  ;;  %8352 = vmatprep.subr.mxu0 %v8528_v35  ;;  %8320 = vmatprep.mubr.msk.f32.mxu0 %vm8538_vm11, %v8528_v35 }
 0xd34   : > { %8334 = vmatprep.mubr.msk.f32.mxu1 %vm8538_vm11, %v8528_v35  ;;  %8353 = vmatpush3.msra.mxu0 %v6456_v59 }
 0xd35   : > { %v6590_v11 = vpop.permute.xlu0 %6589  ;;  %8321 = vmatmul.mubr.msk.f32.gmra.mxu0 %vm5925_vm3, %v7453_v61  ;;  %8392 = vmatprep.subr.mxu0 %v8528_v35 }
 0xd36   : > { %8335 = vmatmul.mubr.msk.f32.gmra.mxu1 %vm5925_vm3, %v7460_v7  ;;  %8354 = vmatprep.mubr.msk.f32.mxu0 %vm8538_vm11, %v8528_v35 }
 0xd37   : > { %8370 = vmatpush3.msra.mxu1 %v6590_v11  ;;  %v6588_v62 = vpop.permute.xlu1 %6587  ;;  %8337 = vmatprep.mubr.msk.f32.mxu1 %vm8538_vm11, %v8528_v35 }
 0xd38   : > { %8371 = vmatprep.subr.mxu1 %v8528_v35 }
 0xd39   : > { %8372 = vmatpush3.msra.mxu1 %v6588_v62  ;;  %v6718_v55 = vpop.permute.xlu0 %6717  ;;  %8355 = vmatmul.mubr.msk.f32.vlgmr.msra.gmra.mxu0 %vm5925_vm3, %v7469_v57 }
 0xd3a   : > { %8338 = vmatmul.mubr.msk.f32.gmra.mxu1 %vm5925_vm3, %v7461_v3  ;;  %8373 = vmatprep.subr.mxu1 %v8528_v35 }
 0xd3b   : > { %8374 = vmatpush3.msra.mxu1 %v6586_v1  ;;  %8393 = vmatpush3.msra.mxu0 %v6718_v55  ;;  %v6584_v58 = vpop.permute.xlu1 %6583 }
 0xd3c   : > { %8375 = vmatprep.subr.mxu1 %v8528_v35  ;;  %8340 = vmatprep.mubr.msk.f32.mxu1 %vm8538_vm11, %v8528_v35 }
 0xd3d   : > { %8357 = vmatprep.mubr.msk.f32.mxu0 %vm8538_vm11, %v8528_v35  ;;  %8376 = vmatpush3.msra.mxu1 %v6584_v58  ;;  %v6716_v12 = vpop.permute.xlu0 %6715 }
 0xd3e   : > { %8341 = vmatmul.mubr.msk.f32.gmra.mxu1 %vm5925_vm3, %v7462_v0  ;;  %8358 = vmatmul.mubr.msk.f32.gmra.mxu0 %vm5925_vm3, %v7470_v5 }
 0xd3f   : > { %8394 = vmatprep.subr.mxu0 %v8528_v35  ;;  %v6712_v10 = vpop.permute.xlu1 %6711  ;;  %8343 = vmatprep.mubr.msk.f32.mxu1 %vm8538_vm11, %v8528_v35 }
 0xd40   : > { %8395 = vmatpush3.msra.mxu0 %v6716_v12  ;;  %8360 = vmatprep.mubr.msk.f32.mxu0 %vm8538_vm11, %v8528_v35 }
 0xd41   : > { %v6714_v8 = vpop.permute.xlu0 %6713  ;;  %8396 = vmatprep.subr.mxu0 %v8528_v35  ;;  %8415 = vmatprep.subr.mxu1 %v8528_v35 }
 0xd42   : > { %8344 = vmatmul.mubr.msk.f32.gmra.mxu1 %vm5925_vm3, %v7463_v13  ;;  %8361 = vmatmul.mubr.msk.f32.gmra.mxu0 %vm5925_vm3, %v7471_v15 }
 0xd43   : > { %8397 = vmatpush3.msra.mxu0 %v6714_v8  ;;  %v6842_v14 = vpop.permute.xlu1 %6841  ;;  %8363 = vmatprep.mubr.msk.f32.mxu0 %vm8538_vm11, %v8528_v35 }
 0xd44   : > { %8398 = vmatprep.subr.mxu0 %v8528_v35  ;;  %8377 = vmatprep.mubr.msk.f32.mxu1 %vm8538_vm11, %v8528_v35 }
 0xd45   : > { %8399 = vmatpush3.msra.mxu0 %v6712_v10  ;;  %v6846_v17 = vpop.permute.xlu0 %6845 }
 0xd46   : > { %8364 = vmatmul.mubr.msk.f32.gmra.mxu0 %vm5925_vm3, %v7472_v2  ;;  %8378 = vmatmul.mubr.msk.f32.vlgmr.msra.gmra.mxu1 %vm5925_vm3, %v7479_v16 }
 0xd47   : > { %8416 = vmatpush3.msra.mxu1 %v6846_v17  ;;  %v6844_v4 = vpop.permute.xlu1 %6843  ;;  %8366 = vmatprep.mubr.msk.f32.mxu0 %vm8538_vm11, %v8528_v35 }
 0xd48   : > { %8417 = vmatprep.subr.mxu1 %v8528_v35  ;;  %8380 = vmatprep.mubr.msk.f32.mxu1 %vm8538_vm11, %v8528_v35 }
 0xd49   : > { %8418 = vmatpush3.msra.mxu1 %v6844_v4  ;;  %v6974_v21 = vpop.permute.xlu0 %6973  ;;  %8438 = vmatprep.subr.mxu0 %v8528_v35 }
 0xd4a   : > { %8367 = vmatmul.mubr.msk.f32.gmra.mxu0 %vm5925_vm3, %v7473_v19  ;;  %8381 = vmatmul.mubr.msk.f32.gmra.mxu1 %vm5925_vm3, %v7480_v20 }
 0xd4b   : > { %8419 = vmatprep.subr.mxu1 %v8528_v35  ;;  %v6840_v60 = vpop.permute.xlu1 %6839  ;;  %8383 = vmatprep.mubr.msk.f32.mxu1 %vm8538_vm11, %v8528_v35 }
 0xd4c   : > { %8420 = vmatpush3.msra.mxu1 %v6842_v14  ;;  %8400 = vmatprep.mubr.msk.f32.mxu0 %vm8538_vm11, %v8528_v35 }
 0xd4d   : > { %8421 = vmatprep.subr.mxu1 %v8528_v35  ;;  %v6972_v63 = vpop.permute.xlu0 %6971 }
 0xd4e   : > { %8422 = vmatpush3.msra.mxu1 %v6840_v60  ;;  %8401 = vmatmul.mubr.msk.f32.vlgmr.msra.gmra.mxu0 %vm5925_vm3, %v7489_v22 }
 0xd4f   : > { %8384 = vmatmul.mubr.msk.f32.gmra.mxu1 %vm5925_vm3, %v7481_v23  ;;  %8439 = vmatpush3.msra.mxu0 %v6974_v21  ;;  %v6968_v29 = vpop.permute.xlu1 %6967 }
 0xd50   : > { %8440 = vmatprep.subr.mxu0 %v8528_v35  ;;  %8386 = vmatprep.mubr.msk.f32.mxu1 %vm8538_vm11, %v8528_v35 }
 0xd51   : > { %8441 = vmatpush3.msra.mxu0 %v6972_v63  ;;  %8403 = vmatprep.mubr.msk.f32.mxu0 %vm8538_vm11, %v8528_v35  ;;  %v6970_v9 = vpop.permute.xlu0 %6969 }
 0xd52   : > { %8404 = vmatmul.mubr.msk.f32.gmra.mxu0 %vm5925_vm3, %v7490_v6  ;;  %8442 = vmatprep.subr.mxu0 %v8528_v35 }
 0xd53   : > { %8387 = vmatmul.mubr.msk.f32.gmra.mxu1 %vm5925_vm3, %v7482_v26  ;;  %8443 = vmatpush3.msra.mxu0 %v6970_v9 }
 0xd54   : > { %8444 = vmatprep.subr.mxu0 %v8528_v35  ;;  %8389 = vmatprep.mubr.msk.f32.mxu1 %vm8538_vm11, %v8528_v35 }
 0xd55   : > { %8406 = vmatprep.mubr.msk.f32.mxu0 %vm8538_vm11, %v8528_v35  ;;  %8445 = vmatpush3.msra.mxu0 %v6968_v29 }
 0xd56   : > { %8407 = vmatmul.mubr.msk.f32.gmra.mxu0 %vm5925_vm3, %v7491_v28 }
 0xd57   : > { %8390 = vmatmul.mubr.msk.f32.gmra.mxu1 %vm5925_vm3, %v7483_v24  ;;  %8409 = vmatprep.mubr.msk.f32.mxu0 %vm8538_vm11, %v8528_v35 }
 0xd58   : > { %8423 = vmatprep.mubr.msk.f32.mxu1 %vm8538_vm11, %v8528_v35 }
 0xd5a   : > { %8410 = vmatmul.mubr.msk.f32.gmra.mxu0 %vm5925_vm3, %v7492_v25 }
 0xd5b   : > { %8424 = vmatmul.mubr.msk.f32.vlgmr.msra.gmra.mxu1 %vm5925_vm3, %v7499_v30  ;;  %8412 = vmatprep.mubr.msk.f32.mxu0 %vm8538_vm11, %v8528_v35 }
 0xd5c   : > { %8426 = vmatprep.mubr.msk.f32.mxu1 %vm8538_vm11, %v8528_v35 }
 0xd5e   : > { %8413 = vmatmul.mubr.msk.f32.gmra.mxu0 %vm5925_vm3, %v7493_v18  ;;  %v6034_v53 = vpop.permute.xlu0 %6033 }
 0xd5f   : > { %8427 = vmatmul.mubr.msk.f32.gmra.mxu1 %vm5925_vm3, %v7500_v27  ;;  %8446 = vmatprep.mubr.msk.f32.mxu0 %vm8538_vm11, %v8528_v35 }
 0xd60   : > { %8429 = vmatprep.mubr.msk.f32.mxu1 %vm8538_vm11, %v8528_v35 }
 0xd62   : > { %8447 = vmatmul.mubr.msk.f32.vlgmr.msra.gmra.mxu0 %vm5925_vm3, %v7509_v33 }
 0xd63   : > { %8430 = vmatmul.mubr.msk.f32.gmra.mxu1 %vm5925_vm3, %v7501_v34  ;;  %8449 = vmatprep.mubr.msk.f32.mxu0 %vm8538_vm11, %v8528_v35 }
 0xd64   : > { %8432 = vmatprep.mubr.msk.f32.mxu1 %vm8538_vm11, %v8528_v35 }
 0xd66   : > { %8450 = vmatmul.mubr.msk.f32.gmra.mxu0 %vm5925_vm3, %v7510_v36 }
 0xd67   : > { %8433 = vmatmul.mubr.msk.f32.gmra.mxu1 %vm5925_vm3, %v7502_v32  ;;  %8452 = vmatprep.mubr.msk.f32.mxu0 %vm8538_vm11, %v8528_v35 }
 0xd68   : > { %8435 = vmatprep.mubr.msk.f32.mxu1 %vm8538_vm11, %v8528_v35 }
 0xd6a   : > { %8453 = vmatmul.mubr.msk.f32.gmra.mxu0 %vm5925_vm3, %v7511_v37  ;;  %v6007_v31 = vpop.f32.mrf.mxu0 }
 0xd6b   : > { %8436 = vmatmul.mubr.msk.f32.gmra.mxu1 %vm5925_vm3, %v7503_v38  ;;  %8455 = vmatprep.mubr.msk.f32.mxu0 %vm8538_vm11, %v8528_v35  ;;  %v6056_v54 = vadd.f32 %v6034_v53, %v6007_v31 }
 0xd6c   : > { %v8264_v40 = vpop.f32.mrf.mxu0 }
 0xd6e   : > { %8456 = vmatmul.mubr.msk.f32.gmra.mxu0 %vm5925_vm3, %v7512_v39  ;;  %v10181_v43 = vpop.f32.mrf.mxu0 }
 0xd6f   : > { %8458 = vmatprep.mubr.msk.f32.mxu0 %vm8538_vm11, %v8528_v35 }
 0xd70   : > { %v8267_v41 = vpop.f32.mrf.mxu0 }
 0xd72   : > { %8459 = vmatmul.mubr.msk.f32.gmra.mxu0 %vm5925_vm3, %v7513_v44  ;;  %v10189_v45 = vpop.f32.mrf.mxu0  ;;  %v6039_v44 = vpop.permute.xlu1 %6038 }
 0xd74   : > { %v8270_v46 = vpop.f32.mrf.mxu0 }
 0xd75   : > { %v6057_v46 = vadd.f32 %v6039_v44, %v10181_v43 }
 0xd76   : > { %v10191_v42 = vpop.f32.mrf.mxu0 }
 0xd78   : > { %v8273_v50 = vpop.f32.mrf.mxu0 }
 0xd7a   : > { %v10193_v51 = vpop.f32.mrf.mxu0 }
 0xd7c   : > { %v8276_v47 = vpop.f32.mrf.mxu0 }
 0xddd   : > { %v6164_v48 = vpop.f32.mrf.mxu1 }
 0xdde   : > { %v6188_v35 = vadd.f32 %v6164_v48, %v6056_v54 }
 0xddf   : > { %v8287_v49 = vpop.f32.mrf.mxu1 }
 0xde1   : > { %v6169_v59 = vpop.f32.mrf.mxu1 }
 0xde2   : > { %v6189_v54 = vadd.f32 %v6169_v59, %v6057_v46 }
 0xde3   : > { %v8290_v52 = vpop.f32.mrf.mxu1 }
 0xde4   : > { %v6044_v52 = vpop.permute.xlu0 %6043 }
 0xde5   : > { %v10195_v56 = vpop.f32.mrf.mxu1  ;;  %v6292_v61 = vpop.f32.mrf.mxu0 }
 0xde6   : > { %v6316_v50 = vadd.f32 %v6292_v61, %v6188_v35  ;;  %v6049_v35 = vpop.permute.xlu1 %6048 }
 0xde7   : > { %v8293_v1 = vpop.f32.mrf.mxu1  ;;  %v8310_v7 = vpop.f32.mrf.mxu0 }
 0xde8   : > { %v6058_v7 = vadd.f32 %v6044_v52, %v10189_v45  ;;  %v6054_v45 = vpop.permute.xlu0 %6053 }
 0xde9   : > { %v10197_v11 = vpop.f32.mrf.mxu1  ;;  %v6297_v57 = vpop.f32.mrf.mxu0 }
 0xdeb   : > { %v8296_v62 = vpop.f32.mrf.mxu1  ;;  %v8313_v3 = vpop.f32.mrf.mxu0 }
 0xdec   : > { %v6317_v62 = vadd.f32 %v6297_v57, %v6189_v54 }
 0xded   : > { %v10199_v55 = vpop.f32.mrf.mxu0 }
 0xdee   : > { %v10201_v58 = vpop.f32.mrf.mxu1 }
 0xdef   : > { %v8316_v0 = vpop.f32.mrf.mxu0 }
 0xdf0   : > { %v8299_v5 = vpop.f32.mrf.mxu1 }
 0xdf1   : > { %v10203_v12 = vpop.f32.mrf.mxu0 }
 0xdf2   : > { %v6420_v10 = vpop.f32.mrf.mxu1 }
 0xdf3   : > { %v8319_v13 = vpop.f32.mrf.mxu0  ;;  %v6444_v48 = vadd.f32 %v6420_v10, %v6316_v50 }
 0xdf4   : > { %v8333_v15 = vpop.f32.mrf.mxu1  ;;  %v6190_v13 = vadd.f32 %v10195_v56, %v6058_v7 }
 0xdf5   : > { %v10205_v8 = vpop.f32.mrf.mxu0 }
 0xdf6   : > { %v6425_v14 = vpop.f32.mrf.mxu1  ;;  %v6318_v59 = vadd.f32 %v10199_v55, %v6190_v13 }
 0xdf7   : > { %v8322_v2 = vpop.f32.mrf.mxu0  ;;  %v6445_v15 = vadd.f32 %v6425_v14, %v6317_v62  ;;  %v6060_v14 = vadd.f32 %v6054_v45, %v10193_v51 }
 0xdf8   : > { %v8336_v16 = vpop.f32.mrf.mxu1 }
 0xdf9   : > { %v6548_v17 = vpop.f32.mrf.mxu0  ;;  %v6059_v16 = vadd.f32 %v6049_v35, %v10191_v42 }
 0xdfa   : > { %v6430_v4 = vpop.f32.mrf.mxu1  ;;  %v6572_v3 = vadd.f32 %v6548_v17, %v6444_v48 }
 0xdfb   : > { %v8356_v19 = vpop.f32.mrf.mxu0  ;;  %v6191_v57 = vadd.f32 %v10197_v11, %v6059_v16  ;;  %v6446_v17 = vadd.f32 %v6430_v4, %v6318_v59 }
 0xdfc   : > { %v8339_v20 = vpop.f32.mrf.mxu1 }
 0xdfe   : > { %v10207_v21 = vpop.f32.mrf.mxu1  ;;  %v6553_v60 = vpop.f32.mrf.mxu0 }
 0xdff   : > { %v6573_v10 = vadd.f32 %v6553_v60, %v6445_v15  ;;  %v6192_v60 = vadd.f32 %v10201_v58, %v6060_v14  ;;  %v7099_v58 = vld [vmem:[%s10270_s11] sm:$0xff] }
 0xe00   : > { %v8342_v22 = vpop.f32.mrf.mxu1  ;;  %v8359_v23 = vpop.f32.mrf.mxu0 }
 0xe02   : > { %v10209_v63 = vpop.f32.mrf.mxu1  ;;  %v6558_v6 = vpop.f32.mrf.mxu0 }
 0xe04   : > { %v8345_v26 = vpop.f32.mrf.mxu1  ;;  %v8362_v9 = vpop.f32.mrf.mxu0 }
 0xe06   : > { %v10211_v28 = vpop.f32.mrf.mxu0  ;;  %v6676_v29 = vpop.f32.mrf.mxu1 }
 0xe07   : > { %v6700_v2 = vadd.f32 %v6676_v29, %v6572_v3  ;;  %v6319_v29 = vadd.f32 %v10203_v12, %v6191_v57 }
 0xe08   : > { %v8365_v24 = vpop.f32.mrf.mxu0  ;;  %v8379_v25 = vpop.f32.mrf.mxu1 }
 0xe09   : > { %v6574_v24 = vadd.f32 %v6558_v6, %v6446_v17 }
 0xe0a   : > { %v10213_v30 = vpop.f32.mrf.mxu0  ;;  %v6681_v18 = vpop.f32.mrf.mxu1 }
 0xe0b   : > { %v6701_v23 = vadd.f32 %v6681_v18, %v6573_v10 }
 0xe0c   : > { %v8368_v27 = vpop.f32.mrf.mxu0  ;;  %v8382_v33 = vpop.f32.mrf.mxu1 }
 0xe0d   : > { %v6447_v33 = vadd.f32 %v10207_v21, %v6319_v29 }
 0xe0e   : > { %v6804_v34 = vpop.f32.mrf.mxu0 }
 0xe0f   : > { %v6686_v36 = vpop.f32.mrf.mxu1  ;;  %v6828_v19 = vadd.f32 %v6804_v34, %v6700_v2  ;;  %v6575_v51 = vadd.f32 %v10211_v28, %v6447_v33  ;;  %v7100_v28 = vld [vmem:[%s10270_s11 + $0x8] sm:$0xff] }
 0xe10   : > { %v8402_v32 = vpop.f32.mrf.mxu0  ;;  %v6702_v34 = vadd.f32 %v6686_v36, %v6574_v24 }
 0xe11   : > { %v8385_v37 = vpop.f32.mrf.mxu1  ;;  %v6320_v32 = vadd.f32 %v10205_v8, %v6192_v60 }
 0xe12   : > { %v6809_v38 = vpop.f32.mrf.mxu0 }
 0xe13   : > { %v6691_v31 = vpop.f32.mrf.mxu1  ;;  %v6829_v42 = vadd.f32 %v6809_v38, %v6701_v23 }
 0xe14   : > { %v8405_v39 = vpop.f32.mrf.mxu0  ;;  %v6703_v36 = vadd.f32 %v6691_v31, %v6575_v51 }
 0xe15   : > { %v8388_v40 = vpop.f32.mrf.mxu1 }
 0xe16   : > { %v6814_v41 = vpop.f32.mrf.mxu0  ;;  %v6448_v40 = vadd.f32 %v10209_v63, %v6320_v32 }
 0xe17   : > { %v10216_v47 = vpop.f32.mrf.mxu1  ;;  %v6830_v39 = vadd.f32 %v6814_v41, %v6702_v34 }
 0xe18   : > { %v8408_v53 = vpop.f32.mrf.mxu0  ;;  %v6576_v8 = vadd.f32 %v10213_v30, %v6448_v40  ;;  %v7101_v30 = vld [vmem:[%s10270_s11 + $0x10] sm:$0xff] }
 0xe19   : > { %v8391_v49 = vpop.f32.mrf.mxu1 }
 0xe1a   : > { %v6819_v1 = vpop.f32.mrf.mxu0  ;;  %v6704_v52 = vadd.f32 %v10216_v47, %v6576_v8 }
 0xe1b   : > { %v6932_v0 = vpop.f32.mrf.mxu1  ;;  %v6831_v53 = vadd.f32 %v6819_v1, %v6703_v36 }
 0xe1c   : > { %v8411_v5 = vpop.f32.mrf.mxu0  ;;  %v6956_v26 = vadd.f32 %v6932_v0, %v6828_v19 }
 0xe1d   : > { %v8425_v43 = vpop.f32.mrf.mxu1 }
 0xe1e   : > { %v6824_v61 = vpop.f32.mrf.mxu0 }
 0xe1f   : > { %v6937_v20 = vpop.f32.mrf.mxu1  ;;  %v6832_v5 = vadd.f32 %v6824_v61, %v6704_v52  ;;  %v7102_v61 = vld [vmem:[%s10270_s11 + $0x18] sm:$0xff] }
 0xe20   : > { %v8414_v22 = vpop.f32.mrf.mxu0  ;;  %v6957_v11 = vadd.f32 %v6937_v20, %v6829_v42 }
 0xe21   : > { %v8428_v56 = vpop.f32.mrf.mxu1 }
 0xe22   : > { %v7060_v9 = vpop.f32.mrf.mxu0  ;;  %v7103_v56 = vld [vmem:[%s10270_s11 + $0x20] sm:$0xff] }
 0xe23   : > { %v6942_v25 = vpop.f32.mrf.mxu1  ;;  %v7084_v55 = vadd.f32 %v7060_v9, %v6956_v26 }
 0xe24   : > { %v8448_v27 = vpop.f32.mrf.mxu0  ;;  %v6958_v44 = vadd.f32 %v6942_v25, %v6830_v39 }
 0xe25   : > { %v7089_v4 = vmul.f32 0.01, %v7084_v55  ;;  %v8431_v18 = vpop.f32.mrf.mxu1 }
 0xe26   : > { %v7065_v37 = vpop.f32.mrf.mxu0  ;;  %v7127_v18 = vld [vmem:[#allocation2] sm:$0x1] }
 0xe27   : > { %v7094_v12 = vmax.f32 %v7084_v55, %v7089_v4  ;;  %v6947_v6 = vpop.f32.mrf.mxu1  ;;  %v7085_v38 = vadd.f32 %v7065_v37, %v6957_v11 }
 0xe28   : > { %v8451_v21 = vpop.f32.mrf.mxu0  ;;  %v6959_v62 = vadd.f32 %v6947_v6, %v6831_v53 }
 0xe29   : > { %v7090_v46 = vmul.f32 0.01, %v7085_v38  ;;  %v8434_v50 = vpop.f32.mrf.mxu1  ;;  %v7104_v54 = vmul.f32 %v7099_v58, %v7094_v12 }
 0xe2a   : > { %v7070_v41 = vpop.f32.mrf.mxu0 }
 0xe2b   : > { %v7095_v48 = vmax.f32 %v7085_v38, %v7090_v46  ;;  %v6952_v63 = vpop.f32.mrf.mxu1  ;;  %v7086_v49 = vadd.f32 %v7070_v41, %v6958_v44  ;;  %v7109_v15 = vsel %vm5813_vm2, %v7104_v54, 0.0 }
 0xe2c   : > { %v8454_v7 = vpop.f32.mrf.mxu0  ;;  %v6960_v47 = vadd.f32 %v6952_v63, %v6832_v5 }
 0xe2d   : > { %v7105_v31 = vmul.f32 %v7100_v28, %v7095_v48  ;;  %v7091_v3 = vmul.f32 0.01, %v7086_v49  ;;  %v8437_v0 = vpop.f32.mrf.mxu1 }
 0xe2e   : > { %v7075_v13 = vpop.f32.mrf.mxu0 }
 0xe2f   : > { %v7110_v1 = vsel %vm5813_vm2, %v7105_v31, 0.0  ;;  %v7096_v2 = vmax.f32 %v7086_v49, %v7091_v3  ;;  %v7087_v43 = vadd.f32 %v7075_v13, %v6959_v62 }
 0xe30   : > { %v7111_v35 = vadd.f32 %v7110_v1, %v7109_v15  ;;  %v8457_v16 = vpop.f32.mrf.mxu0 }
 0xe31   : > { %v7106_v59 = vmul.f32 %v7101_v30, %v7096_v2  ;;  %v7092_v10 = vmul.f32 0.01, %v7087_v43 }
 0xe32   : > { %v7080_v19 = vpop.f32.mrf.mxu0 }
 0xe33   : > { %v7112_v20 = vsel %vm5813_vm2, %v7106_v59, 0.0  ;;  %v7097_v22 = vmax.f32 %v7087_v43, %v7092_v10  ;;  %v7088_v45 = vadd.f32 %v7080_v19, %v6960_v47 }
 0xe34   : > { %v7113_v57 = vadd.f32 %v7112_v20, %v7111_v35  ;;  %v8460_v17 = vpop.f32.mrf.mxu0 }
 0xe35   : > { %v7107_v23 = vmul.f32 %v7102_v61, %v7097_v22  ;;  %v7093_v26 = vmul.f32 0.01, %v7088_v45 }
 0xe37   : > { %v7114_v14 = vsel %vm5813_vm2, %v7107_v23, 0.0  ;;  %v7098_v9 = vmax.f32 %v7088_v45, %v7093_v26 }
 0xe38   : > { %v7115_v29 = vadd.f32 %v7114_v14, %v7113_v57 }
 0xe39   : > { %v7108_v24 = vmul.f32 %v7103_v56, %v7098_v9 }
 0xe3b   : > { %v7116_v42 = vsel %vm5813_vm2, %v7108_v24, 0.0 }
 0xe3c   : > { %v7117_v25 = vadd.f32 %v7116_v42, %v7115_v29 }
 0xe3e   : > { %7118 = vadd.xlane.f32.xlu1 %v7117_v25 }
 0xec7   : > { %v7119_v55 = vpop.xlane.xlu1 %7118 }
 0xec8   : > { %v7120_v60 = vrot.slane %v7119_v55, 4 }
 0xeca   : > { %v7121_v27 = vadd.f32 %v7120_v60, %v7119_v55 }
 0xecc   : > { %v7122_v33 = vrot.slane %v7121_v27, 2 }
 0xece   : > { %v7123_v34 = vadd.f32 %v7122_v33, %v7121_v27 }
 0xed0   : > { %v7124_v11 = vrot.slane %v7123_v34, 1 }
 0xed2   : > { %v7125_v4 = vadd.f32 %v7124_v11, %v7123_v34 }
 0xed4   : > { %8461 = vpush %v7125_v4 }
 0xed5   : > { %8463 = vpush %v7127_v18 }
 0xf05   : > { %s8462_s21 = spop %8461 }
 0xf06   : > { %s8464_s27 = spop %8463 }
 0xf07   : > { %s7129_s24 = sadd.f32 %s8464_s27, %s8462_s21 }
 0xf09   : > { %v7130_v32 = vstv %s7129_s24 }
 0xf0a   : > { %7132 = vst.msk [vmem:[%s573_s28] sm:$0x1] %vm7131_vm4, %v7130_v32 }
 0xf0b PF: > { %s30_s29 = sadd.s32 1, %s8526_s29  }
 0xf0c   : > { %p27_p4 = scmp.ge.s32.totalorder %s30_s29, 4  }
 0xf0e   :  { %29 = sbr.rel (!%p27_p4) target bundleno = 4 (0x4), region = 162 }

</bundles_post_ra>
